<compile_context>
chip_gen: v7x
topology: tpu7x:2x2x1
jax: 0.10.0
libtpu: 0.0.40
codegen_flags: <defaults>
</compile_context>

<pallas_src>
import math
import jax
import jax.numpy as jnp
from jax.experimental import pallas as pl
from jax.experimental.pallas import tpu as pltpu

# ----------------------- synthetic config (small) -----------------------
B = 2
L_TXT = 8
L_SMI = 16
TXT_HIDDEN = 32
SMI_HIDDEN = 32
BI_HIDDEN = 32                      # bi_hidden_size == all_head_size
NUM_HEADS = 4                       # bi_num_attention_heads
HEAD_DIM = BI_HIDDEN // NUM_HEADS
TXT_INTER = 64
SMI_INTER = 64
NUM_LAYERS = 2                      # num_cross_hidden_layers
LN_EPS = 1e-12

NUM_PARAMS = 32                     # flat weight tensors per BertCrossLayer
SCALE = 1.0 / math.sqrt(HEAD_DIM)   # folded into packed Q weights/biases

RT = B * L_TXT                      # batch-stacked txt rows (16)
RS = B * L_SMI                      # batch-stacked smi rows (32)

# Column offsets inside the per-layer 32-row bf16 weight slab (lane-aligned segments).
# (This packing relies on TXT_HIDDEN == SMI_HIDDEN == BI_HIDDEN.)
C_QKV_TXT = 0        # (32, 96)  [query_txt*SCALE | key_txt | value_txt]
C_QKV_SMI = 128      # (32, 96)  [query_smi*SCALE | key_smi | value_smi]
C_AO_TXT = 256       # (32, 32)  BertBiSelfOutput.dense_txt
C_AO_SMI = 288       # (32, 32)  BertBiSelfOutput.dense_smi
C_FF1_TXT = 320      # (32, 64)  txt_intermediate.dense
C_FF1_SMI = 384      # (32, 64)  smi_intermediate.dense
W32_COLS = 512       # padded to a multiple of 128 lanes

assert TXT_HIDDEN == SMI_HIDDEN == BI_HIDDEN == 32
for _n in (B, L_TXT, L_SMI, HEAD_DIM, RT, RS):
    assert _n & (_n - 1) == 0, "mask construction assumes power-of-two sizes"


def _log2(n):
    return int(math.log2(n))


# ----------------------- compile-time 0/1 masks (built in-kernel from iota) -----------
def _block_diag_mask(shape, row_blk, col_blk):
    """mask[r, c] = 1 iff (r // row_blk) == (c // col_blk)."""
    r = jax.lax.broadcasted_iota(jnp.int32, shape, 0) >> _log2(row_blk)
    c = jax.lax.broadcasted_iota(jnp.int32, shape, 1) >> _log2(col_blk)
    return (r == c).astype(jnp.float32)


def _batch_mask(shape, q_len, kv_len):
    """mask[q_row, key_col] = 1 iff query batch == key batch (key cols laid out (h,b,j))."""
    qb = jax.lax.broadcasted_iota(jnp.int32, shape, 0) >> _log2(q_len)
    kb = (jax.lax.broadcasted_iota(jnp.int32, shape, 1) & (B * kv_len - 1)) >> _log2(kv_len)
    return (qb == kb).astype(jnp.float32)


# ----------------------- in-kernel math helpers -----------------------
def _layernorm(x, g, b):
    mu = jnp.mean(x, axis=-1, keepdims=True)
    xc = x - mu
    var = jnp.mean(xc * xc, axis=-1, keepdims=True)
    return xc * jax.lax.rsqrt(var + LN_EPS) * g + b


def _gelu(x):
    # tanh-approximate GELU (HF ACT2FN["gelu_new"]), the configured hidden_act.
    c = jnp.float32(math.sqrt(2.0 / math.pi))
    return 0.5 * x * (1.0 + jnp.tanh(c * (x + 0.044715 * x * x * x)))


def _tile_rows(x, n):
    # sublane tiling (row counts are multiples of 8): cheap vreg copies, no lane shuffles
    return jnp.concatenate([x] * n, axis=0)


def _attention(q, k, v, head_mask, batch_mask, ones_blk):
    """Batched multi-head cross attention in block-diagonal form.

    q:          (Rq, 32)  f32, softmax scale already folded into the Q projection
    k, v:       (Rk, 32)  f32 (batch-stacked rows)
    head_mask:  (H*Rk, 32) const — keeps only head h's feature columns in tile copy h
    batch_mask: (Rq, H*Rk) const — 1 where query batch == key batch
    ones_blk:   (H*Rk, H*Rk) const block-diag ones — per-head segment-sum broadcast
    returns ctx (Rq, 32) f32, already head-concatenated.
    """
    kb = (_tile_rows(k, NUM_HEADS) * head_mask).astype(jnp.bfloat16)   # (H*Rk, 32)
    vb = (_tile_rows(v, NUM_HEADS) * head_mask).astype(jnp.bfloat16)   # (H*Rk, 32)

    # scores[q, (h,b,j)] = Q_h(q) . K_h(b,j)  — single NT matmul, contraction = 32
    s = jax.lax.dot_general(q.astype(jnp.bfloat16), kb,
                            (((1,), (1,)), ((), ())),
                            preferred_element_type=jnp.float32)        # (Rq, H*Rk)

    # Row-wide max is a per-row constant -> per-head softmax is unchanged, exp <= 1.
    m = jnp.max(s, axis=-1, keepdims=True)
    e = jnp.exp(s - m) * batch_mask                                    # zero cross-batch
    # Per-(row, head) denominators, broadcast back across the head block via one matmul
    # (kept in f32: the MXU has enormous slack at these shapes).
    denom = jnp.dot(e, ones_blk, preferred_element_type=jnp.float32)   # (Rq, H*Rk)
    p = (e * pl.reciprocal(denom, approx=True)).astype(jnp.bfloat16)   # EUP slot

    # ctx[q, c] = sum_j p[q, (head(c), b(q), j)] * V[(b(q), j), c]  — already concatenated
    return jnp.dot(p, vb, preferred_element_type=jnp.float32)          # (Rq, 32)


def _cross_layer(txt, smi, w32_ref, w64_ref, vec_ref, masks, l):
    """One BertCrossLayer on batch-stacked f32 activations txt:(RT,32), smi:(RS,32)."""
    hm_s, hm_t, bm_s, bm_t, ones_s, ones_t = masks
    A = BI_HIDDEN
    vec = vec_ref[l]                                  # (8, 128) f32 bias / LayerNorm table

    def w32(c, n):                                    # bf16 (32, n) weight slice, layer l
        return w32_ref[l, :, c:c + n]

    def seg(r, c, n):                                 # f32 (1, n) bias / LN segment
        return vec[r:r + 1, c:c + n]

    # Hoisted per-layer bias / LayerNorm segments (each named, used exactly once).
    b_qkv_t = seg(0, 0, 3 * A)
    b_qkv_s = seg(1, 0, 3 * A)
    b_ao_t, g_ln1_t, b_ln1_t = seg(2, 0, A), seg(2, A, A), seg(2, 2 * A, A)
    b_ao_s, g_ln1_s, b_ln1_s = seg(3, 0, A), seg(3, A, A), seg(3, 2 * A, A)
    b_ff1_t, b_ff2_t = seg(4, 0, TXT_INTER), seg(4, TXT_INTER, A)
    b_ff1_s, b_ff2_s = seg(5, 0, SMI_INTER), seg(5, SMI_INTER, A)
    g_ln2_t, b_ln2_t = seg(6, 0, A), seg(6, A, A)
    g_ln2_s, b_ln2_s = seg(6, 2 * A, A), seg(6, 3 * A, A)

    # ---- fused Q/K/V projections (bf16 operands, f32 accumulation) ----
    qkv_t = jnp.dot(txt.astype(jnp.bfloat16), w32(C_QKV_TXT, 3 * A),
                    preferred_element_type=jnp.float32) + b_qkv_t
    qkv_s = jnp.dot(smi.astype(jnp.bfloat16), w32(C_QKV_SMI, 3 * A),
                    preferred_element_type=jnp.float32) + b_qkv_s
    q_t, k_t, v_t = qkv_t[:, :A], qkv_t[:, A:2 * A], qkv_t[:, 2 * A:]
    q_s, k_s, v_s = qkv_s[:, :A], qkv_s[:, A:2 * A], qkv_s[:, 2 * A:]

    # ---- BertBiSelfAttention (mode='normal'): one bidirectional cross pass ----
    ctx_t = _attention(q_t, k_s, v_s, hm_s, bm_s, ones_s)   # txt queries attend over smi
    ctx_s = _attention(q_s, k_t, v_t, hm_t, bm_t, ones_t)   # smi queries attend over txt

    # ---- BertBiSelfOutput: dense + residual(layer input) + LayerNorm ----
    # TODO(synk): the two streams' attn-out/FFN matmuls are kept separate; at these
    # shapes the per-row lane-selects a stream-fused formulation needs cost about as
    # much as the MXU issues they would save.
    att_t = _layernorm(
        jnp.dot(ctx_t.astype(jnp.bfloat16), w32(C_AO_TXT, A),
                preferred_element_type=jnp.float32) + b_ao_t + txt,
        g_ln1_t, b_ln1_t)
    att_s = _layernorm(
        jnp.dot(ctx_s.astype(jnp.bfloat16), w32(C_AO_SMI, A),
                preferred_element_type=jnp.float32) + b_ao_s + smi,
        g_ln1_s, b_ln1_s)

    # ---- FFN txt: dense -> GELU -> dense + residual + LayerNorm ----
    h_t = _gelu(jnp.dot(att_t.astype(jnp.bfloat16), w32(C_FF1_TXT, TXT_INTER),
                        preferred_element_type=jnp.float32) + b_ff1_t)
    out_t = _layernorm(
        jnp.dot(h_t.astype(jnp.bfloat16), w64_ref[l, :, 0:A],
                preferred_element_type=jnp.float32) + b_ff2_t + att_t,
        g_ln2_t, b_ln2_t)

    # ---- FFN smi ----
    h_s = _gelu(jnp.dot(att_s.astype(jnp.bfloat16), w32(C_FF1_SMI, SMI_INTER),
                        preferred_element_type=jnp.float32) + b_ff1_s)
    out_s = _layernorm(
        jnp.dot(h_s.astype(jnp.bfloat16), w64_ref[l, :, A:2 * A],
                preferred_element_type=jnp.float32) + b_ff2_s + att_s,
        g_ln2_s, b_ln2_s)

    return out_t, out_s


# ----------------------- Pallas kernel: whole encoder, whole (stacked) batch ----------
def encoder_kernel(txt_ref, smi_ref, w32_ref, w64_ref, vec_ref,
                   out_txt_ref, out_smi_ref):
    # Batch-stacked activations stay resident in VMEM/vregs across all fused layers.
    txt = txt_ref[...].astype(jnp.float32)            # (RT, 32)
    smi = smi_ref[...].astype(jnp.float32)            # (RS, 32)

    # Constant 0/1 masks, built once (2-D iota + shifts) and reused by every layer.
    masks = (
        _block_diag_mask((NUM_HEADS * RS, BI_HIDDEN), RS, HEAD_DIM),   # hm_s  (128, 32)
        _block_diag_mask((NUM_HEADS * RT, BI_HIDDEN), RT, HEAD_DIM),   # hm_t  ( 64, 32)
        _batch_mask((RT, NUM_HEADS * RS), L_TXT, L_SMI),               # bm_s  ( 16,128)
        _batch_mask((RS, NUM_HEADS * RT), L_SMI, L_TXT),               # bm_t  ( 32, 64)
        _block_diag_mask((NUM_HEADS * RS, NUM_HEADS * RS), RS, RS),    # ones_s(128,128)
        _block_diag_mask((NUM_HEADS * RT, NUM_HEADS * RT), RT, RT),    # ones_t( 64, 64)
    )

    # TODO(synk): if NUM_LAYERS is scaled up, replace this static unroll with a layer
    # grid axis ("arbitrary") and per-layer weight-slab index_maps (pipelined DMA,
    # bounded live ranges). For NUM_LAYERS=2 the unroll is the right choice.
    for l in range(NUM_LAYERS):
        txt, smi = _cross_layer(txt, smi, w32_ref, w64_ref, vec_ref, masks, l)

    # TODO(synk): sub-128-lane output stores (H=32) kept as-is; total payload is a few
    # vregs, so a lane-dense repack would cost more instructions than it saves.
    out_txt_ref[...] = txt.astype(out_txt_ref.dtype)
    out_smi_ref[...] = smi.astype(out_smi_ref.dtype)


def _cost_estimate():
    A = BI_HIDDEN
    mac = 0
    mac += (RT + RS) * A * 3 * A                                   # fused QKV
    mac += RT * A * NUM_HEADS * RS + RS * A * NUM_HEADS * RT       # scores (block-diag)
    mac += RT * (NUM_HEADS * RS) ** 2 + RS * (NUM_HEADS * RT) ** 2 # segment-sum matmuls
    mac += RT * NUM_HEADS * RS * A + RS * NUM_HEADS * RT * A       # context
    mac += (RT + RS) * A * A                                       # attn-out
    mac += (RT + RS) * A * TXT_INTER                               # FFN up
    mac += (RT + RS) * TXT_INTER * A                               # FFN down
    flops = 2 * mac * NUM_LAYERS
    transcendentals = NUM_LAYERS * (
        RT * NUM_HEADS * RS + RS * NUM_HEADS * RT                  # exp in both softmaxes
        + RT * TXT_INTER + RS * SMI_INTER)                         # tanh in GELU
    bytes_accessed = (
        4 * 2 * (RT * TXT_HIDDEN + RS * SMI_HIDDEN)                        # acts in+out
        + NUM_LAYERS * (2 * (32 * W32_COLS + 64 * 2 * A) + 4 * 8 * 128))   # bf16 slabs + f32 vec
    return pl.CostEstimate(flops=flops, transcendentals=transcendentals,
                           bytes_accessed=bytes_accessed)


def bert_cross_encoder_pallas(txt, smi, packed):
    """BertCrossEncoder.forward (masks=None, output_attentions/hidden_states=False).

    Single pallas_call, grid=(1,): all layers fused, batch folded along sublanes,
    parameters pre-packed into 3 lane-aligned slabs (weights in bf16).
    """
    w32, w64, vec = packed
    txt2 = txt.reshape(RT, TXT_HIDDEN)                # batch folded along sublanes
    smi2 = smi.reshape(RS, SMI_HIDDEN)
    out_t, out_s = pl.pallas_call(
        encoder_kernel,
        out_shape=(
            jax.ShapeDtypeStruct((RT, TXT_HIDDEN), txt.dtype),
            jax.ShapeDtypeStruct((RS, SMI_HIDDEN), smi.dtype),
        ),
        grid_spec=pltpu.PrefetchScalarGridSpec(
            num_scalar_prefetch=0,
            grid=(1,),                                # single step: no per-batch grid overhead
            in_specs=[
                pl.BlockSpec((RT, TXT_HIDDEN), lambda i: (0, 0)),
                pl.BlockSpec((RS, SMI_HIDDEN), lambda i: (0, 0)),
                pl.BlockSpec(w32.shape, lambda i: (0, 0, 0)),   # weight slabs: one DMA each
                pl.BlockSpec(w64.shape, lambda i: (0, 0, 0)),
                pl.BlockSpec(vec.shape, lambda i: (0, 0, 0)),
            ],
            out_specs=[
                pl.BlockSpec((RT, TXT_HIDDEN), lambda i: (0, 0)),
                pl.BlockSpec((RS, SMI_HIDDEN), lambda i: (0, 0)),
            ],
        ),
        compiler_params=pltpu.CompilerParams(
            dimension_semantics=("arbitrary",)),
        cost_estimate=_cost_estimate(),
    )(txt2, smi2, w32, w64, vec)
    return (out_t.reshape(B, L_TXT, TXT_HIDDEN),
            out_s.reshape(B, L_SMI, SMI_HIDDEN))


# ----------------------- parameter packing (32 tensors/layer -> 3 slabs) --------------
def pack_params(layer_params):
    """Pack per-layer params into:
         w32 (L, 32, 512) bf16 weight slab (softmax scale folded into Q weights),
         w64 (L, 64, 64)  bf16 FFN-down slab,
         vec (L, 8, 128)  f32 bias / LayerNorm table (Q biases pre-scaled too)."""
    w32_l, w64_l, vec_l = [], [], []

    def z(r, c):
        return jnp.zeros((r, c), jnp.float32)

    for p in layer_params:
        w32 = jnp.concatenate(
            [p[0] * SCALE, p[8], p[10], z(32, 32),   # [  0:128) q_txt*s | k_txt | v_txt | pad
             p[6] * SCALE, p[2], p[4], z(32, 32),    # [128:256) q_smi*s | k_smi | v_smi | pad
             p[12], p[16],                           # [256:320) attn-out dense_txt | dense_smi
             p[20],                                  # [320:384) txt_intermediate
             p[26],                                  # [384:448) smi_intermediate
             z(32, 64)], axis=1)                     # [448:512) pad
        w64 = jnp.concatenate([p[22], p[28]], axis=1)          # [txt_output | smi_output]
        zv = z(1, 32)
        vec = jnp.concatenate([
            jnp.concatenate([p[1] * SCALE, p[9], p[11], zv], axis=1),   # row0: qkv_txt bias
            jnp.concatenate([p[7] * SCALE, p[3], p[5], zv], axis=1),    # row1: qkv_smi bias
            jnp.concatenate([p[13], p[14], p[15], zv], axis=1),         # row2: att txt: b | LN g | LN b
            jnp.concatenate([p[17], p[18], p[19], zv], axis=1),         # row3: att smi: b | LN g | LN b
            jnp.concatenate([p[21], p[23], zv], axis=1),                # row4: txt inter b | txt out b
            jnp.concatenate([p[27], p[29], zv], axis=1),                # row5: smi inter b | smi out b
            jnp.concatenate([p[24], p[25], p[30], p[31]], axis=1),      # row6: out LN txt g,b | smi g,b
            z(1, 128),                                                  # row7: pad
        ], axis=0)
        w32_l.append(w32.astype(jnp.bfloat16))
        w64_l.append(w64.astype(jnp.bfloat16))
        vec_l.append(vec)
    return jnp.stack(w32_l), jnp.stack(w64_l), jnp.stack(vec_l)


# ----------------------- deterministic parameter init -----------------------
def init_layer_params(key):
    keys = list(jax.random.split(key, 40))
    it = iter(keys)

    def dense(din, dout):
        w = jax.random.normal(next(it), (din, dout), jnp.float32) * 0.02
        b = jax.random.normal(next(it), (1, dout), jnp.float32) * 0.02
        return [w, b]

    def lnp(d):
        g = 1.0 + 0.01 * jax.random.normal(next(it), (1, d), jnp.float32)
        b = 0.01 * jax.random.normal(next(it), (1, d), jnp.float32)
        return [g, b]

    params = []
    # attention projections
    params += dense(TXT_HIDDEN, BI_HIDDEN)   # query_txt
    params += dense(SMI_HIDDEN, BI_HIDDEN)   # key_smi
    params += dense(SMI_HIDDEN, BI_HIDDEN)   # value_smi
    params += dense(SMI_HIDDEN, BI_HIDDEN)   # query_smi
    params += dense(TXT_HIDDEN, BI_HIDDEN)   # key_txt
    params += dense(TXT_HIDDEN, BI_HIDDEN)   # value_txt
    # BertBiSelfOutput
    params += dense(BI_HIDDEN, TXT_HIDDEN)   # dense_txt
    params += lnp(TXT_HIDDEN)                # LayerNorm_txt
    params += dense(BI_HIDDEN, SMI_HIDDEN)   # dense_smi
    params += lnp(SMI_HIDDEN)                # LayerNorm_smi
    # txt FFN
    params += dense(TXT_HIDDEN, TXT_INTER)   # txt_intermediate
    params += dense(TXT_INTER, TXT_HIDDEN)   # txt_output.dense
    params += lnp(TXT_HIDDEN)                # txt_output.LayerNorm
    # smi FFN
    params += dense(SMI_HIDDEN, SMI_INTER)   # smi_intermediate
    params += dense(SMI_INTER, SMI_HIDDEN)   # smi_output.dense
    params += lnp(SMI_HIDDEN)                # smi_output.LayerNorm
    assert len(params) == NUM_PARAMS
    return params


# ----------------------- pure-JAX f32 reference (mirrors PyTorch math) -----------------
def _ref_layer(txt, smi, p):
    def lin(x, w, b):
        return x @ w + b

    def lnorm(x, g, b):
        mu = x.mean(-1, keepdims=True)
        xc = x - mu
        var = (xc * xc).mean(-1, keepdims=True)
        return xc / jnp.sqrt(var + LN_EPS) * g + b

    def gelu(x):
        c = math.sqrt(2.0 / math.pi)
        return 0.5 * x * (1.0 + jnp.tanh(c * (x + 0.044715 * x ** 3)))

    def mha(xq, xkv, wq, bq, wk, bk, wv, bv):
        Bq, Lq, _ = xq.shape
        Lk = xkv.shape[1]
        q = lin(xq, wq, bq).reshape(Bq, Lq, NUM_HEADS, HEAD_DIM).transpose(0, 2, 1, 3)
        k = lin(xkv, wk, bk).reshape(Bq, Lk, NUM_HEADS, HEAD_DIM).transpose(0, 2, 1, 3)
        v = lin(xkv, wv, bv).reshape(Bq, Lk, NUM_HEADS, HEAD_DIM).transpose(0, 2, 1, 3)
        s = jnp.einsum('bhqd,bhkd->bhqk', q, k) / math.sqrt(HEAD_DIM)
        pr = jax.nn.softmax(s, axis=-1)
        return jnp.einsum('bhqk,bhkd->bhqd', pr, v).transpose(0, 2, 1, 3).reshape(Bq, Lq, -1)

    ctx_txt = mha(txt, smi, p[0], p[1], p[2], p[3], p[4], p[5])
    ctx_smi = mha(smi, txt, p[6], p[7], p[8], p[9], p[10], p[11])
    attn_txt = lnorm(lin(ctx_txt, p[12], p[13]) + txt, p[14], p[15])
    attn_smi = lnorm(lin(ctx_smi, p[16], p[17]) + smi, p[18], p[19])
    out_txt = lnorm(lin(gelu(lin(attn_txt, p[20], p[21])), p[22], p[23]) + attn_txt, p[24], p[25])
    out_smi = lnorm(lin(gelu(lin(attn_smi, p[26], p[27])), p[28], p[29]) + attn_smi, p[30], p[31])
    return out_txt, out_smi


def _ref_encoder(txt, smi, layer_params):
    for p in layer_params:
        txt, smi = _ref_layer(txt, smi, p)
    return txt, smi


# ----------------------- main -----------------------
if __name__ == "__main__":
    key = jax.random.PRNGKey(0)
    k_txt, k_smi, k_params = jax.random.split(key, 3)

    hidden_states_txt = jax.random.normal(k_txt, (B, L_TXT, TXT_HIDDEN), jnp.float32)
    hidden_states_smi = jax.random.normal(k_smi, (B, L_SMI, SMI_HIDDEN), jnp.float32)

    layer_keys = jax.random.split(k_params, NUM_LAYERS)
    layer_params = [init_layer_params(layer_keys[i]) for i in range(NUM_LAYERS)]
    packed = pack_params(layer_params)

    out_txt, out_smi = bert_cross_encoder_pallas(
        hidden_states_txt, hidden_states_smi, packed)
    out_txt = jax.block_until_ready(out_txt)
    out_smi = jax.block_until_ready(out_smi)

    ref_txt, ref_smi = _ref_encoder(hidden_states_txt, hidden_states_smi, layer_params)

    # Tolerance 1e-2: the kernel feeds the MXU bf16 operands (f32 accumulation) and uses
    # the EUP approximate reciprocal for the softmax normalization; at these scales the
    # measured deviation from the pure-f32 reference is ~1e-3 and is further damped by
    # the residual + LayerNorm structure.
    err_t = float(jnp.max(jnp.abs(out_txt - ref_txt)))
    err_s = float(jnp.max(jnp.abs(out_smi - ref_smi)))
    assert jnp.allclose(out_txt, ref_txt, rtol=1e-2, atol=1e-2), f"txt mismatch (max abs err {err_t})"
    assert jnp.allclose(out_smi, ref_smi, rtol=1e-2, atol=1e-2), f"smi mismatch (max abs err {err_s})"

    # TODO(synk): attention masks / dropout / output_attentions paths not exercised
    # (forward defaults: masks=None, eval-mode dropout is identity).
    print("KERNEL_OK")
</pallas_src>

<mosaic_0001>
module attributes {stable_mosaic.version = 11 : i64} {
  func.func @encoder_kernel(%arg0: i32, %arg1: memref<16x32xf32, #tpu.memory_space<vmem>>, %arg2: memref<32x32xf32, #tpu.memory_space<vmem>>, %arg3: memref<2x32x512xbf16, #tpu.memory_space<vmem>>, %arg4: memref<2x64x64xbf16, #tpu.memory_space<vmem>>, %arg5: memref<2x8x128xf32, #tpu.memory_space<vmem>>, %arg6: memref<16x32xf32, #tpu.memory_space<vmem>>, %arg7: memref<32x32xf32, #tpu.memory_space<vmem>>) attributes {dimension_semantics = [#tpu.dimension_semantics<arbitrary>], iteration_bounds = array<i64: 1>, scalar_prefetch = 0 : i64, scratch_operands = 0 : i64, tpu.core_type = #tpu.core_type<tc>, window_params = [{pipeline_mode = #tpu.pipeline_mode<synchronous>, transform_indices = @transform_0, window_bounds = array<i64: 16, 32>}, {pipeline_mode = #tpu.pipeline_mode<synchronous>, transform_indices = @transform_1, window_bounds = array<i64: 32, 32>}, {pipeline_mode = #tpu.pipeline_mode<synchronous>, transform_indices = @transform_2, window_bounds = array<i64: 2, 32, 512>}, {pipeline_mode = #tpu.pipeline_mode<synchronous>, transform_indices = @transform_3, window_bounds = array<i64: 2, 64, 64>}, {pipeline_mode = #tpu.pipeline_mode<synchronous>, transform_indices = @transform_4, window_bounds = array<i64: 2, 8, 128>}, {pipeline_mode = #tpu.pipeline_mode<synchronous>, transform_indices = @transform_5, window_bounds = array<i64: 16, 32>}, {pipeline_mode = #tpu.pipeline_mode<synchronous>, transform_indices = @transform_6, window_bounds = array<i64: 32, 32>}]} {
    %c0 = arith.constant 0 : index
    %c0_0 = arith.constant 0 : index
    %0 = vector.load %arg1[%c0, %c0_0] : memref<16x32xf32, #tpu.memory_space<vmem>>, vector<16x32xf32>
    %c0_1 = arith.constant 0 : index
    %c0_2 = arith.constant 0 : index
    %1 = vector.load %arg2[%c0_1, %c0_2] : memref<32x32xf32, #tpu.memory_space<vmem>>, vector<32x32xf32>
    %2 = tpu.iota {dimensions = array<i32: 0>} : vector<128x32xi32>
    %c5_i32 = arith.constant 5 : i32
    %3 = vector.broadcast %c5_i32 : i32 to vector<128x32xi32>
    %4 = arith.shrsi %2, %3 : vector<128x32xi32>
    %5 = tpu.iota {dimensions = array<i32: 1>} : vector<128x32xi32>
    %c3_i32 = arith.constant 3 : i32
    %6 = vector.broadcast %c3_i32 : i32 to vector<128x32xi32>
    %7 = arith.shrsi %5, %6 : vector<128x32xi32>
    %8 = arith.cmpi eq, %4, %7 : vector<128x32xi32>
    %9 = arith.extui %8 : vector<128x32xi1> to vector<128x32xi32>
    %10 = arith.sitofp %9 : vector<128x32xi32> to vector<128x32xf32>
    %11 = tpu.iota {dimensions = array<i32: 0>} : vector<64x32xi32>
    %c4_i32 = arith.constant 4 : i32
    %12 = vector.broadcast %c4_i32 : i32 to vector<64x32xi32>
    %13 = arith.shrsi %11, %12 : vector<64x32xi32>
    %14 = tpu.iota {dimensions = array<i32: 1>} : vector<64x32xi32>
    %c3_i32_3 = arith.constant 3 : i32
    %15 = vector.broadcast %c3_i32_3 : i32 to vector<64x32xi32>
    %16 = arith.shrsi %14, %15 : vector<64x32xi32>
    %17 = arith.cmpi eq, %13, %16 : vector<64x32xi32>
    %18 = arith.extui %17 : vector<64x32xi1> to vector<64x32xi32>
    %19 = arith.sitofp %18 : vector<64x32xi32> to vector<64x32xf32>
    %20 = tpu.iota {dimensions = array<i32: 0>} : vector<16x128xi32>
    %c3_i32_4 = arith.constant 3 : i32
    %21 = vector.broadcast %c3_i32_4 : i32 to vector<16x128xi32>
    %22 = arith.shrsi %20, %21 : vector<16x128xi32>
    %23 = tpu.iota {dimensions = array<i32: 1>} : vector<16x128xi32>
    %c31_i32 = arith.constant 31 : i32
    %24 = vector.broadcast %c31_i32 : i32 to vector<16x128xi32>
    %25 = arith.andi %23, %24 : vector<16x128xi32>
    %c4_i32_5 = arith.constant 4 : i32
    %26 = vector.broadcast %c4_i32_5 : i32 to vector<16x128xi32>
    %27 = arith.shrsi %25, %26 : vector<16x128xi32>
    %28 = arith.cmpi eq, %22, %27 : vector<16x128xi32>
    %29 = arith.extui %28 : vector<16x128xi1> to vector<16x128xi32>
    %30 = arith.sitofp %29 : vector<16x128xi32> to vector<16x128xf32>
    %31 = tpu.iota {dimensions = array<i32: 0>} : vector<32x64xi32>
    %c4_i32_6 = arith.constant 4 : i32
    %32 = vector.broadcast %c4_i32_6 : i32 to vector<32x64xi32>
    %33 = arith.shrsi %31, %32 : vector<32x64xi32>
    %34 = tpu.iota {dimensions = array<i32: 1>} : vector<32x64xi32>
    %c15_i32 = arith.constant 15 : i32
    %35 = vector.broadcast %c15_i32 : i32 to vector<32x64xi32>
    %36 = arith.andi %34, %35 : vector<32x64xi32>
    %c3_i32_7 = arith.constant 3 : i32
    %37 = vector.broadcast %c3_i32_7 : i32 to vector<32x64xi32>
    %38 = arith.shrsi %36, %37 : vector<32x64xi32>
    %39 = arith.cmpi eq, %33, %38 : vector<32x64xi32>
    %40 = arith.extui %39 : vector<32x64xi1> to vector<32x64xi32>
    %41 = arith.sitofp %40 : vector<32x64xi32> to vector<32x64xf32>
    %42 = tpu.iota {dimensions = array<i32: 0>} : vector<128x128xi32>
    %c5_i32_8 = arith.constant 5 : i32
    %43 = vector.broadcast %c5_i32_8 : i32 to vector<128x128xi32>
    %44 = arith.shrsi %42, %43 : vector<128x128xi32>
    %45 = tpu.iota {dimensions = array<i32: 1>} : vector<128x128xi32>
    %c5_i32_9 = arith.constant 5 : i32
    %46 = vector.broadcast %c5_i32_9 : i32 to vector<128x128xi32>
    %47 = arith.shrsi %45, %46 : vector<128x128xi32>
    %48 = arith.cmpi eq, %44, %47 : vector<128x128xi32>
    %49 = arith.extui %48 : vector<128x128xi1> to vector<128x128xi32>
    %50 = arith.sitofp %49 : vector<128x128xi32> to vector<128x128xf32>
    %51 = tpu.iota {dimensions = array<i32: 0>} : vector<64x64xi32>
    %c4_i32_10 = arith.constant 4 : i32
    %52 = vector.broadcast %c4_i32_10 : i32 to vector<64x64xi32>
    %53 = arith.shrsi %51, %52 : vector<64x64xi32>
    %54 = tpu.iota {dimensions = array<i32: 1>} : vector<64x64xi32>
    %c4_i32_11 = arith.constant 4 : i32
    %55 = vector.broadcast %c4_i32_11 : i32 to vector<64x64xi32>
    %56 = arith.shrsi %54, %55 : vector<64x64xi32>
    %57 = arith.cmpi eq, %53, %56 : vector<64x64xi32>
    %58 = arith.extui %57 : vector<64x64xi1> to vector<64x64xi32>
    %59 = arith.sitofp %58 : vector<64x64xi32> to vector<64x64xf32>
    %c0_12 = arith.constant 0 : index
    %c0_13 = arith.constant 0 : index
    %c0_14 = arith.constant 0 : index
    %60 = vector.load %arg5[%c0_12, %c0_13, %c0_14] : memref<2x8x128xf32, #tpu.memory_space<vmem>>, vector<1x8x128xf32>
    %61 = vector.shape_cast %60 : vector<1x8x128xf32> to vector<8x128xf32>
    %62 = vector.extract_strided_slice %61 {offsets = [0, 0], sizes = [1, 96], strides = [1, 1]} : vector<8x128xf32> to vector<1x96xf32>
    %63 = vector.extract_strided_slice %61 {offsets = [1, 0], sizes = [1, 96], strides = [1, 1]} : vector<8x128xf32> to vector<1x96xf32>
    %64 = vector.extract_strided_slice %61 {offsets = [2, 0], sizes = [1, 32], strides = [1, 1]} : vector<8x128xf32> to vector<1x32xf32>
    %65 = vector.extract_strided_slice %61 {offsets = [2, 32], sizes = [1, 32], strides = [1, 1]} : vector<8x128xf32> to vector<1x32xf32>
    %66 = vector.extract_strided_slice %61 {offsets = [2, 64], sizes = [1, 32], strides = [1, 1]} : vector<8x128xf32> to vector<1x32xf32>
    %67 = vector.extract_strided_slice %61 {offsets = [3, 0], sizes = [1, 32], strides = [1, 1]} : vector<8x128xf32> to vector<1x32xf32>
    %68 = vector.extract_strided_slice %61 {offsets = [3, 32], sizes = [1, 32], strides = [1, 1]} : vector<8x128xf32> to vector<1x32xf32>
    %69 = vector.extract_strided_slice %61 {offsets = [3, 64], sizes = [1, 32], strides = [1, 1]} : vector<8x128xf32> to vector<1x32xf32>
    %70 = vector.extract_strided_slice %61 {offsets = [4, 0], sizes = [1, 64], strides = [1, 1]} : vector<8x128xf32> to vector<1x64xf32>
    %71 = vector.extract_strided_slice %61 {offsets = [4, 64], sizes = [1, 32], strides = [1, 1]} : vector<8x128xf32> to vector<1x32xf32>
    %72 = vector.extract_strided_slice %61 {offsets = [5, 0], sizes = [1, 64], strides = [1, 1]} : vector<8x128xf32> to vector<1x64xf32>
    %73 = vector.extract_strided_slice %61 {offsets = [5, 64], sizes = [1, 32], strides = [1, 1]} : vector<8x128xf32> to vector<1x32xf32>
    %74 = vector.extract_strided_slice %61 {offsets = [6, 0], sizes = [1, 32], strides = [1, 1]} : vector<8x128xf32> to vector<1x32xf32>
    %75 = vector.extract_strided_slice %61 {offsets = [6, 32], sizes = [1, 32], strides = [1, 1]} : vector<8x128xf32> to vector<1x32xf32>
    %76 = vector.extract_strided_slice %61 {offsets = [6, 64], sizes = [1, 32], strides = [1, 1]} : vector<8x128xf32> to vector<1x32xf32>
    %77 = vector.extract_strided_slice %61 {offsets = [6, 96], sizes = [1, 32], strides = [1, 1]} : vector<8x128xf32> to vector<1x32xf32>
    %78 = arith.truncf %0 : vector<16x32xf32> to vector<16x32xbf16>
    %c0_15 = arith.constant 0 : index
    %c0_16 = arith.constant 0 : index
    %c0_17 = arith.constant 0 : index
    %79 = vector.load %arg3[%c0_15, %c0_16, %c0_17] : memref<2x32x512xbf16, #tpu.memory_space<vmem>>, vector<1x32x96xbf16>
    %80 = vector.shape_cast %79 : vector<1x32x96xbf16> to vector<32x96xbf16>
    %cst = arith.constant dense<0.000000e+00> : vector<16x96xf32>
    %81 = tpu.matmul %78, %80, %cst {dimension_numbers = #tpu.dot_dimension_numbers<[1], [0], [0], [1], [0, 0, 1, 1], [], []>} : vector<16x32xbf16>, vector<32x96xbf16>, vector<16x96xf32> -> vector<16x96xf32>
    %82 = vector.broadcast %62 : vector<1x96xf32> to vector<16x96xf32>
    %83 = arith.addf %81, %82 : vector<16x96xf32>
    %84 = arith.truncf %1 : vector<32x32xf32> to vector<32x32xbf16>
    %c0_18 = arith.constant 0 : index
    %c0_19 = arith.constant 0 : index
    %c128 = arith.constant 128 : index
    %85 = vector.load %arg3[%c0_18, %c0_19, %c128] : memref<2x32x512xbf16, #tpu.memory_space<vmem>>, vector<1x32x96xbf16>
    %86 = vector.shape_cast %85 : vector<1x32x96xbf16> to vector<32x96xbf16>
    %cst_20 = arith.constant dense<0.000000e+00> : vector<32x96xf32>
    %87 = tpu.matmul %84, %86, %cst_20 {dimension_numbers = #tpu.dot_dimension_numbers<[1], [0], [0], [1], [0, 0, 1, 1], [], []>} : vector<32x32xbf16>, vector<32x96xbf16>, vector<32x96xf32> -> vector<32x96xf32>
    %88 = vector.broadcast %63 : vector<1x96xf32> to vector<32x96xf32>
    %89 = arith.addf %87, %88 : vector<32x96xf32>
    %90 = vector.extract_strided_slice %83 {offsets = [0, 0], sizes = [16, 32], strides = [1, 1]} : vector<16x96xf32> to vector<16x32xf32>
    %91 = vector.extract_strided_slice %83 {offsets = [0, 32], sizes = [16, 32], strides = [1, 1]} : vector<16x96xf32> to vector<16x32xf32>
    %92 = vector.extract_strided_slice %83 {offsets = [0, 64], sizes = [16, 32], strides = [1, 1]} : vector<16x96xf32> to vector<16x32xf32>
    %93 = vector.extract_strided_slice %89 {offsets = [0, 0], sizes = [32, 32], strides = [1, 1]} : vector<32x96xf32> to vector<32x32xf32>
    %94 = vector.extract_strided_slice %89 {offsets = [0, 32], sizes = [32, 32], strides = [1, 1]} : vector<32x96xf32> to vector<32x32xf32>
    %95 = vector.extract_strided_slice %89 {offsets = [0, 64], sizes = [32, 32], strides = [1, 1]} : vector<32x96xf32> to vector<32x32xf32>
    %96 = tpu.concatenate %94, %94, %94, %94 in 0 : vector<32x32xf32>, vector<32x32xf32>, vector<32x32xf32>, vector<32x32xf32> -> vector<128x32xf32>
    %97 = arith.mulf %96, %10 : vector<128x32xf32>
    %98 = arith.truncf %97 : vector<128x32xf32> to vector<128x32xbf16>
    %99 = tpu.concatenate %95, %95, %95, %95 in 0 : vector<32x32xf32>, vector<32x32xf32>, vector<32x32xf32>, vector<32x32xf32> -> vector<128x32xf32>
    %100 = arith.mulf %99, %10 : vector<128x32xf32>
    %101 = arith.truncf %100 : vector<128x32xf32> to vector<128x32xbf16>
    %102 = arith.truncf %90 : vector<16x32xf32> to vector<16x32xbf16>
    %cst_21 = arith.constant dense<0.000000e+00> : vector<16x128xf32>
    %103 = tpu.matmul %102, %98, %cst_21 {dimension_numbers = #tpu.dot_dimension_numbers<[1], [1], [0], [0], [0, 0, 1, 0], [], []>} : vector<16x32xbf16>, vector<128x32xbf16>, vector<16x128xf32> -> vector<16x128xf32>
    %cst_22 = arith.constant dense<0xFF800000> : vector<16xf32>
    %104 = vector.multi_reduction <maximumf>, %103, %cst_22 [1] : vector<16x128xf32> to vector<16xf32>
    %105 = vector.shape_cast %104 : vector<16xf32> to vector<16x1xf32>
    %106 = vector.broadcast %105 : vector<16x1xf32> to vector<16x128xf32>
    %107 = arith.subf %103, %106 : vector<16x128xf32>
    %108 = math.exp %107 : vector<16x128xf32>
    %109 = arith.mulf %108, %30 : vector<16x128xf32>
    %cst_23 = arith.constant dense<0.000000e+00> : vector<16x128xf32>
    %110 = tpu.matmul %109, %50, %cst_23 {dimension_numbers = #tpu.dot_dimension_numbers<[1], [0], [0], [1], [0, 0, 1, 1], [], []>} : vector<16x128xf32>, vector<128x128xf32>, vector<16x128xf32> -> vector<16x128xf32>
    %111 = tpu.reciprocal %110 {approx = true} : vector<16x128xf32> -> vector<16x128xf32>
    %112 = arith.mulf %109, %111 : vector<16x128xf32>
    %113 = arith.truncf %112 : vector<16x128xf32> to vector<16x128xbf16>
    %cst_24 = arith.constant dense<0.000000e+00> : vector<16x32xf32>
    %114 = tpu.matmul %113, %101, %cst_24 {dimension_numbers = #tpu.dot_dimension_numbers<[1], [0], [0], [1], [0, 0, 1, 1], [], []>} : vector<16x128xbf16>, vector<128x32xbf16>, vector<16x32xf32> -> vector<16x32xf32>
    %115 = tpu.concatenate %91, %91, %91, %91 in 0 : vector<16x32xf32>, vector<16x32xf32>, vector<16x32xf32>, vector<16x32xf32> -> vector<64x32xf32>
    %116 = arith.mulf %115, %19 : vector<64x32xf32>
    %117 = arith.truncf %116 : vector<64x32xf32> to vector<64x32xbf16>
    %118 = tpu.concatenate %92, %92, %92, %92 in 0 : vector<16x32xf32>, vector<16x32xf32>, vector<16x32xf32>, vector<16x32xf32> -> vector<64x32xf32>
    %119 = arith.mulf %118, %19 : vector<64x32xf32>
    %120 = arith.truncf %119 : vector<64x32xf32> to vector<64x32xbf16>
    %121 = arith.truncf %93 : vector<32x32xf32> to vector<32x32xbf16>
    %cst_25 = arith.constant dense<0.000000e+00> : vector<32x64xf32>
    %122 = tpu.matmul %121, %117, %cst_25 {dimension_numbers = #tpu.dot_dimension_numbers<[1], [1], [0], [0], [0, 0, 1, 0], [], []>} : vector<32x32xbf16>, vector<64x32xbf16>, vector<32x64xf32> -> vector<32x64xf32>
    %cst_26 = arith.constant dense<0xFF800000> : vector<32xf32>
    %123 = vector.multi_reduction <maximumf>, %122, %cst_26 [1] : vector<32x64xf32> to vector<32xf32>
    %124 = vector.shape_cast %123 : vector<32xf32> to vector<32x1xf32>
    %125 = vector.broadcast %124 : vector<32x1xf32> to vector<32x64xf32>
    %126 = arith.subf %122, %125 : vector<32x64xf32>
    %127 = math.exp %126 : vector<32x64xf32>
    %128 = arith.mulf %127, %41 : vector<32x64xf32>
    %cst_27 = arith.constant dense<0.000000e+00> : vector<32x64xf32>
    %129 = tpu.matmul %128, %59, %cst_27 {dimension_numbers = #tpu.dot_dimension_numbers<[1], [0], [0], [1], [0, 0, 1, 1], [], []>} : vector<32x64xf32>, vector<64x64xf32>, vector<32x64xf32> -> vector<32x64xf32>
    %130 = tpu.reciprocal %129 {approx = true} : vector<32x64xf32> -> vector<32x64xf32>
    %131 = arith.mulf %128, %130 : vector<32x64xf32>
    %132 = arith.truncf %131 : vector<32x64xf32> to vector<32x64xbf16>
    %cst_28 = arith.constant dense<0.000000e+00> : vector<32x32xf32>
    %133 = tpu.matmul %132, %120, %cst_28 {dimension_numbers = #tpu.dot_dimension_numbers<[1], [0], [0], [1], [0, 0, 1, 1], [], []>} : vector<32x64xbf16>, vector<64x32xbf16>, vector<32x32xf32> -> vector<32x32xf32>
    %134 = arith.truncf %114 : vector<16x32xf32> to vector<16x32xbf16>
    %c0_29 = arith.constant 0 : index
    %c0_30 = arith.constant 0 : index
    %c256 = arith.constant 256 : index
    %135 = vector.load %arg3[%c0_29, %c0_30, %c256] : memref<2x32x512xbf16, #tpu.memory_space<vmem>>, vector<1x32x32xbf16>
    %136 = vector.shape_cast %135 : vector<1x32x32xbf16> to vector<32x32xbf16>
    %cst_31 = arith.constant dense<0.000000e+00> : vector<16x32xf32>
    %137 = tpu.matmul %134, %136, %cst_31 {dimension_numbers = #tpu.dot_dimension_numbers<[1], [0], [0], [1], [0, 0, 1, 1], [], []>} : vector<16x32xbf16>, vector<32x32xbf16>, vector<16x32xf32> -> vector<16x32xf32>
    %138 = vector.broadcast %64 : vector<1x32xf32> to vector<16x32xf32>
    %139 = arith.addf %137, %138 : vector<16x32xf32>
    %140 = arith.addf %139, %0 : vector<16x32xf32>
    %cst_32 = arith.constant dense<0.000000e+00> : vector<16xf32>
    %141 = vector.multi_reduction <add>, %140, %cst_32 [1] : vector<16x32xf32> to vector<16xf32>
    %142 = vector.shape_cast %141 : vector<16xf32> to vector<16x1xf32>
    %cst_33 = arith.constant 3.200000e+01 : f32
    %143 = vector.broadcast %cst_33 : f32 to vector<16x1xf32>
    %144 = arith.divf %142, %143 : vector<16x1xf32>
    %145 = vector.broadcast %144 : vector<16x1xf32> to vector<16x32xf32>
    %146 = arith.subf %140, %145 : vector<16x32xf32>
    %147 = arith.mulf %146, %146 : vector<16x32xf32>
    %cst_34 = arith.constant dense<0.000000e+00> : vector<16xf32>
    %148 = vector.multi_reduction <add>, %147, %cst_34 [1] : vector<16x32xf32> to vector<16xf32>
    %149 = vector.shape_cast %148 : vector<16xf32> to vector<16x1xf32>
    %cst_35 = arith.constant 3.200000e+01 : f32
    %150 = vector.broadcast %cst_35 : f32 to vector<16x1xf32>
    %151 = arith.divf %149, %150 : vector<16x1xf32>
    %cst_36 = arith.constant 9.99999996E-13 : f32
    %152 = vector.broadcast %cst_36 : f32 to vector<16x1xf32>
    %153 = arith.addf %151, %152 : vector<16x1xf32>
    %154 = math.rsqrt %153 : vector<16x1xf32>
    %155 = vector.broadcast %154 : vector<16x1xf32> to vector<16x32xf32>
    %156 = arith.mulf %146, %155 : vector<16x32xf32>
    %157 = vector.broadcast %65 : vector<1x32xf32> to vector<16x32xf32>
    %158 = arith.mulf %156, %157 : vector<16x32xf32>
    %159 = vector.broadcast %66 : vector<1x32xf32> to vector<16x32xf32>
    %160 = arith.addf %158, %159 : vector<16x32xf32>
    %161 = arith.truncf %133 : vector<32x32xf32> to vector<32x32xbf16>
    %c0_37 = arith.constant 0 : index
    %c0_38 = arith.constant 0 : index
    %c288 = arith.constant 288 : index
    %162 = vector.load %arg3[%c0_37, %c0_38, %c288] : memref<2x32x512xbf16, #tpu.memory_space<vmem>>, vector<1x32x32xbf16>
    %163 = vector.shape_cast %162 : vector<1x32x32xbf16> to vector<32x32xbf16>
    %cst_39 = arith.constant dense<0.000000e+00> : vector<32x32xf32>
    %164 = tpu.matmul %161, %163, %cst_39 {dimension_numbers = #tpu.dot_dimension_numbers<[1], [0], [0], [1], [0, 0, 1, 1], [], []>} : vector<32x32xbf16>, vector<32x32xbf16>, vector<32x32xf32> -> vector<32x32xf32>
    %165 = vector.broadcast %67 : vector<1x32xf32> to vector<32x32xf32>
    %166 = arith.addf %164, %165 : vector<32x32xf32>
    %167 = arith.addf %166, %1 : vector<32x32xf32>
    %cst_40 = arith.constant dense<0.000000e+00> : vector<32xf32>
    %168 = vector.multi_reduction <add>, %167, %cst_40 [1] : vector<32x32xf32> to vector<32xf32>
    %169 = vector.shape_cast %168 : vector<32xf32> to vector<32x1xf32>
    %cst_41 = arith.constant 3.200000e+01 : f32
    %170 = vector.broadcast %cst_41 : f32 to vector<32x1xf32>
    %171 = arith.divf %169, %170 : vector<32x1xf32>
    %172 = vector.broadcast %171 : vector<32x1xf32> to vector<32x32xf32>
    %173 = arith.subf %167, %172 : vector<32x32xf32>
    %174 = arith.mulf %173, %173 : vector<32x32xf32>
    %cst_42 = arith.constant dense<0.000000e+00> : vector<32xf32>
    %175 = vector.multi_reduction <add>, %174, %cst_42 [1] : vector<32x32xf32> to vector<32xf32>
    %176 = vector.shape_cast %175 : vector<32xf32> to vector<32x1xf32>
    %cst_43 = arith.constant 3.200000e+01 : f32
    %177 = vector.broadcast %cst_43 : f32 to vector<32x1xf32>
    %178 = arith.divf %176, %177 : vector<32x1xf32>
    %cst_44 = arith.constant 9.99999996E-13 : f32
    %179 = vector.broadcast %cst_44 : f32 to vector<32x1xf32>
    %180 = arith.addf %178, %179 : vector<32x1xf32>
    %181 = math.rsqrt %180 : vector<32x1xf32>
    %182 = vector.broadcast %181 : vector<32x1xf32> to vector<32x32xf32>
    %183 = arith.mulf %173, %182 : vector<32x32xf32>
    %184 = vector.broadcast %68 : vector<1x32xf32> to vector<32x32xf32>
    %185 = arith.mulf %183, %184 : vector<32x32xf32>
    %186 = vector.broadcast %69 : vector<1x32xf32> to vector<32x32xf32>
    %187 = arith.addf %185, %186 : vector<32x32xf32>
    %188 = arith.truncf %160 : vector<16x32xf32> to vector<16x32xbf16>
    %c0_45 = arith.constant 0 : index
    %c0_46 = arith.constant 0 : index
    %c320 = arith.constant 320 : index
    %189 = vector.load %arg3[%c0_45, %c0_46, %c320] : memref<2x32x512xbf16, #tpu.memory_space<vmem>>, vector<1x32x64xbf16>
    %190 = vector.shape_cast %189 : vector<1x32x64xbf16> to vector<32x64xbf16>
    %cst_47 = arith.constant dense<0.000000e+00> : vector<16x64xf32>
    %191 = tpu.matmul %188, %190, %cst_47 {dimension_numbers = #tpu.dot_dimension_numbers<[1], [0], [0], [1], [0, 0, 1, 1], [], []>} : vector<16x32xbf16>, vector<32x64xbf16>, vector<16x64xf32> -> vector<16x64xf32>
    %192 = vector.broadcast %70 : vector<1x64xf32> to vector<16x64xf32>
    %193 = arith.addf %191, %192 : vector<16x64xf32>
    %cst_48 = arith.constant 5.000000e-01 : f32
    %194 = vector.broadcast %cst_48 : f32 to vector<16x64xf32>
    %195 = arith.mulf %194, %193 : vector<16x64xf32>
    %cst_49 = arith.constant 4.471500e-02 : f32
    %196 = vector.broadcast %cst_49 : f32 to vector<16x64xf32>
    %197 = arith.mulf %196, %193 : vector<16x64xf32>
    %198 = arith.mulf %197, %193 : vector<16x64xf32>
    %199 = arith.mulf %198, %193 : vector<16x64xf32>
    %200 = arith.addf %193, %199 : vector<16x64xf32>
    %cst_50 = arith.constant 0.797884583 : f32
    %201 = vector.broadcast %cst_50 : f32 to vector<16x64xf32>
    %202 = arith.mulf %201, %200 : vector<16x64xf32>
    %203 = math.tanh %202 : vector<16x64xf32>
    %cst_51 = arith.constant 1.000000e+00 : f32
    %204 = vector.broadcast %cst_51 : f32 to vector<16x64xf32>
    %205 = arith.addf %204, %203 : vector<16x64xf32>
    %206 = arith.mulf %195, %205 : vector<16x64xf32>
    %207 = arith.truncf %206 : vector<16x64xf32> to vector<16x64xbf16>
    %c0_52 = arith.constant 0 : index
    %c0_53 = arith.constant 0 : index
    %c0_54 = arith.constant 0 : index
    %208 = vector.load %arg4[%c0_52, %c0_53, %c0_54] : memref<2x64x64xbf16, #tpu.memory_space<vmem>>, vector<1x64x32xbf16>
    %209 = vector.shape_cast %208 : vector<1x64x32xbf16> to vector<64x32xbf16>
    %cst_55 = arith.constant dense<0.000000e+00> : vector<16x32xf32>
    %210 = tpu.matmul %207, %209, %cst_55 {dimension_numbers = #tpu.dot_dimension_numbers<[1], [0], [0], [1], [0, 0, 1, 1], [], []>} : vector<16x64xbf16>, vector<64x32xbf16>, vector<16x32xf32> -> vector<16x32xf32>
    %211 = vector.broadcast %71 : vector<1x32xf32> to vector<16x32xf32>
    %212 = arith.addf %210, %211 : vector<16x32xf32>
    %213 = arith.addf %212, %160 : vector<16x32xf32>
    %cst_56 = arith.constant dense<0.000000e+00> : vector<16xf32>
    %214 = vector.multi_reduction <add>, %213, %cst_56 [1] : vector<16x32xf32> to vector<16xf32>
    %215 = vector.shape_cast %214 : vector<16xf32> to vector<16x1xf32>
    %cst_57 = arith.constant 3.200000e+01 : f32
    %216 = vector.broadcast %cst_57 : f32 to vector<16x1xf32>
    %217 = arith.divf %215, %216 : vector<16x1xf32>
    %218 = vector.broadcast %217 : vector<16x1xf32> to vector<16x32xf32>
    %219 = arith.subf %213, %218 : vector<16x32xf32>
    %220 = arith.mulf %219, %219 : vector<16x32xf32>
    %cst_58 = arith.constant dense<0.000000e+00> : vector<16xf32>
    %221 = vector.multi_reduction <add>, %220, %cst_58 [1] : vector<16x32xf32> to vector<16xf32>
    %222 = vector.shape_cast %221 : vector<16xf32> to vector<16x1xf32>
    %cst_59 = arith.constant 3.200000e+01 : f32
    %223 = vector.broadcast %cst_59 : f32 to vector<16x1xf32>
    %224 = arith.divf %222, %223 : vector<16x1xf32>
    %cst_60 = arith.constant 9.99999996E-13 : f32
    %225 = vector.broadcast %cst_60 : f32 to vector<16x1xf32>
    %226 = arith.addf %224, %225 : vector<16x1xf32>
    %227 = math.rsqrt %226 : vector<16x1xf32>
    %228 = vector.broadcast %227 : vector<16x1xf32> to vector<16x32xf32>
    %229 = arith.mulf %219, %228 : vector<16x32xf32>
    %230 = vector.broadcast %74 : vector<1x32xf32> to vector<16x32xf32>
    %231 = arith.mulf %229, %230 : vector<16x32xf32>
    %232 = vector.broadcast %75 : vector<1x32xf32> to vector<16x32xf32>
    %233 = arith.addf %231, %232 : vector<16x32xf32>
    %234 = arith.truncf %187 : vector<32x32xf32> to vector<32x32xbf16>
    %c0_61 = arith.constant 0 : index
    %c0_62 = arith.constant 0 : index
    %c384 = arith.constant 384 : index
    %235 = vector.load %arg3[%c0_61, %c0_62, %c384] : memref<2x32x512xbf16, #tpu.memory_space<vmem>>, vector<1x32x64xbf16>
    %236 = vector.shape_cast %235 : vector<1x32x64xbf16> to vector<32x64xbf16>
    %cst_63 = arith.constant dense<0.000000e+00> : vector<32x64xf32>
    %237 = tpu.matmul %234, %236, %cst_63 {dimension_numbers = #tpu.dot_dimension_numbers<[1], [0], [0], [1], [0, 0, 1, 1], [], []>} : vector<32x32xbf16>, vector<32x64xbf16>, vector<32x64xf32> -> vector<32x64xf32>
    %238 = vector.broadcast %72 : vector<1x64xf32> to vector<32x64xf32>
    %239 = arith.addf %237, %238 : vector<32x64xf32>
    %cst_64 = arith.constant 5.000000e-01 : f32
    %240 = vector.broadcast %cst_64 : f32 to vector<32x64xf32>
    %241 = arith.mulf %240, %239 : vector<32x64xf32>
    %cst_65 = arith.constant 4.471500e-02 : f32
    %242 = vector.broadcast %cst_65 : f32 to vector<32x64xf32>
    %243 = arith.mulf %242, %239 : vector<32x64xf32>
    %244 = arith.mulf %243, %239 : vector<32x64xf32>
    %245 = arith.mulf %244, %239 : vector<32x64xf32>
    %246 = arith.addf %239, %245 : vector<32x64xf32>
    %cst_66 = arith.constant 0.797884583 : f32
    %247 = vector.broadcast %cst_66 : f32 to vector<32x64xf32>
    %248 = arith.mulf %247, %246 : vector<32x64xf32>
    %249 = math.tanh %248 : vector<32x64xf32>
    %cst_67 = arith.constant 1.000000e+00 : f32
    %250 = vector.broadcast %cst_67 : f32 to vector<32x64xf32>
    %251 = arith.addf %250, %249 : vector<32x64xf32>
    %252 = arith.mulf %241, %251 : vector<32x64xf32>
    %253 = arith.truncf %252 : vector<32x64xf32> to vector<32x64xbf16>
    %c0_68 = arith.constant 0 : index
    %c0_69 = arith.constant 0 : index
    %c32 = arith.constant 32 : index
    %254 = vector.load %arg4[%c0_68, %c0_69, %c32] : memref<2x64x64xbf16, #tpu.memory_space<vmem>>, vector<1x64x32xbf16>
    %255 = vector.shape_cast %254 : vector<1x64x32xbf16> to vector<64x32xbf16>
    %cst_70 = arith.constant dense<0.000000e+00> : vector<32x32xf32>
    %256 = tpu.matmul %253, %255, %cst_70 {dimension_numbers = #tpu.dot_dimension_numbers<[1], [0], [0], [1], [0, 0, 1, 1], [], []>} : vector<32x64xbf16>, vector<64x32xbf16>, vector<32x32xf32> -> vector<32x32xf32>
    %257 = vector.broadcast %73 : vector<1x32xf32> to vector<32x32xf32>
    %258 = arith.addf %256, %257 : vector<32x32xf32>
    %259 = arith.addf %258, %187 : vector<32x32xf32>
    %cst_71 = arith.constant dense<0.000000e+00> : vector<32xf32>
    %260 = vector.multi_reduction <add>, %259, %cst_71 [1] : vector<32x32xf32> to vector<32xf32>
    %261 = vector.shape_cast %260 : vector<32xf32> to vector<32x1xf32>
    %cst_72 = arith.constant 3.200000e+01 : f32
    %262 = vector.broadcast %cst_72 : f32 to vector<32x1xf32>
    %263 = arith.divf %261, %262 : vector<32x1xf32>
    %264 = vector.broadcast %263 : vector<32x1xf32> to vector<32x32xf32>
    %265 = arith.subf %259, %264 : vector<32x32xf32>
    %266 = arith.mulf %265, %265 : vector<32x32xf32>
    %cst_73 = arith.constant dense<0.000000e+00> : vector<32xf32>
    %267 = vector.multi_reduction <add>, %266, %cst_73 [1] : vector<32x32xf32> to vector<32xf32>
    %268 = vector.shape_cast %267 : vector<32xf32> to vector<32x1xf32>
    %cst_74 = arith.constant 3.200000e+01 : f32
    %269 = vector.broadcast %cst_74 : f32 to vector<32x1xf32>
    %270 = arith.divf %268, %269 : vector<32x1xf32>
    %cst_75 = arith.constant 9.99999996E-13 : f32
    %271 = vector.broadcast %cst_75 : f32 to vector<32x1xf32>
    %272 = arith.addf %270, %271 : vector<32x1xf32>
    %273 = math.rsqrt %272 : vector<32x1xf32>
    %274 = vector.broadcast %273 : vector<32x1xf32> to vector<32x32xf32>
    %275 = arith.mulf %265, %274 : vector<32x32xf32>
    %276 = vector.broadcast %76 : vector<1x32xf32> to vector<32x32xf32>
    %277 = arith.mulf %275, %276 : vector<32x32xf32>
    %278 = vector.broadcast %77 : vector<1x32xf32> to vector<32x32xf32>
    %279 = arith.addf %277, %278 : vector<32x32xf32>
    %c1 = arith.constant 1 : index
    %c0_76 = arith.constant 0 : index
    %c0_77 = arith.constant 0 : index
    %280 = vector.load %arg5[%c1, %c0_76, %c0_77] : memref<2x8x128xf32, #tpu.memory_space<vmem>>, vector<1x8x128xf32>
    %281 = vector.shape_cast %280 : vector<1x8x128xf32> to vector<8x128xf32>
    %282 = vector.extract_strided_slice %281 {offsets = [0, 0], sizes = [1, 96], strides = [1, 1]} : vector<8x128xf32> to vector<1x96xf32>
    %283 = vector.extract_strided_slice %281 {offsets = [1, 0], sizes = [1, 96], strides = [1, 1]} : vector<8x128xf32> to vector<1x96xf32>
    %284 = vector.extract_strided_slice %281 {offsets = [2, 0], sizes = [1, 32], strides = [1, 1]} : vector<8x128xf32> to vector<1x32xf32>
    %285 = vector.extract_strided_slice %281 {offsets = [2, 32], sizes = [1, 32], strides = [1, 1]} : vector<8x128xf32> to vector<1x32xf32>
    %286 = vector.extract_strided_slice %281 {offsets = [2, 64], sizes = [1, 32], strides = [1, 1]} : vector<8x128xf32> to vector<1x32xf32>
    %287 = vector.extract_strided_slice %281 {offsets = [3, 0], sizes = [1, 32], strides = [1, 1]} : vector<8x128xf32> to vector<1x32xf32>
    %288 = vector.extract_strided_slice %281 {offsets = [3, 32], sizes = [1, 32], strides = [1, 1]} : vector<8x128xf32> to vector<1x32xf32>
    %289 = vector.extract_strided_slice %281 {offsets = [3, 64], sizes = [1, 32], strides = [1, 1]} : vector<8x128xf32> to vector<1x32xf32>
    %290 = vector.extract_strided_slice %281 {offsets = [4, 0], sizes = [1, 64], strides = [1, 1]} : vector<8x128xf32> to vector<1x64xf32>
    %291 = vector.extract_strided_slice %281 {offsets = [4, 64], sizes = [1, 32], strides = [1, 1]} : vector<8x128xf32> to vector<1x32xf32>
    %292 = vector.extract_strided_slice %281 {offsets = [5, 0], sizes = [1, 64], strides = [1, 1]} : vector<8x128xf32> to vector<1x64xf32>
    %293 = vector.extract_strided_slice %281 {offsets = [5, 64], sizes = [1, 32], strides = [1, 1]} : vector<8x128xf32> to vector<1x32xf32>
    %294 = vector.extract_strided_slice %281 {offsets = [6, 0], sizes = [1, 32], strides = [1, 1]} : vector<8x128xf32> to vector<1x32xf32>
    %295 = vector.extract_strided_slice %281 {offsets = [6, 32], sizes = [1, 32], strides = [1, 1]} : vector<8x128xf32> to vector<1x32xf32>
    %296 = vector.extract_strided_slice %281 {offsets = [6, 64], sizes = [1, 32], strides = [1, 1]} : vector<8x128xf32> to vector<1x32xf32>
    %297 = vector.extract_strided_slice %281 {offsets = [6, 96], sizes = [1, 32], strides = [1, 1]} : vector<8x128xf32> to vector<1x32xf32>
    %298 = arith.truncf %233 : vector<16x32xf32> to vector<16x32xbf16>
    %c1_78 = arith.constant 1 : index
    %c0_79 = arith.constant 0 : index
    %c0_80 = arith.constant 0 : index
    %299 = vector.load %arg3[%c1_78, %c0_79, %c0_80] : memref<2x32x512xbf16, #tpu.memory_space<vmem>>, vector<1x32x96xbf16>
    %300 = vector.shape_cast %299 : vector<1x32x96xbf16> to vector<32x96xbf16>
    %cst_81 = arith.constant dense<0.000000e+00> : vector<16x96xf32>
    %301 = tpu.matmul %298, %300, %cst_81 {dimension_numbers = #tpu.dot_dimension_numbers<[1], [0], [0], [1], [0, 0, 1, 1], [], []>} : vector<16x32xbf16>, vector<32x96xbf16>, vector<16x96xf32> -> vector<16x96xf32>
    %302 = vector.broadcast %282 : vector<1x96xf32> to vector<16x96xf32>
    %303 = arith.addf %301, %302 : vector<16x96xf32>
    %304 = arith.truncf %279 : vector<32x32xf32> to vector<32x32xbf16>
    %c1_82 = arith.constant 1 : index
    %c0_83 = arith.constant 0 : index
    %c128_84 = arith.constant 128 : index
    %305 = vector.load %arg3[%c1_82, %c0_83, %c128_84] : memref<2x32x512xbf16, #tpu.memory_space<vmem>>, vector<1x32x96xbf16>
    %306 = vector.shape_cast %305 : vector<1x32x96xbf16> to vector<32x96xbf16>
    %cst_85 = arith.constant dense<0.000000e+00> : vector<32x96xf32>
    %307 = tpu.matmul %304, %306, %cst_85 {dimension_numbers = #tpu.dot_dimension_numbers<[1], [0], [0], [1], [0, 0, 1, 1], [], []>} : vector<32x32xbf16>, vector<32x96xbf16>, vector<32x96xf32> -> vector<32x96xf32>
    %308 = vector.broadcast %283 : vector<1x96xf32> to vector<32x96xf32>
    %309 = arith.addf %307, %308 : vector<32x96xf32>
    %310 = vector.extract_strided_slice %303 {offsets = [0, 0], sizes = [16, 32], strides = [1, 1]} : vector<16x96xf32> to vector<16x32xf32>
    %311 = vector.extract_strided_slice %303 {offsets = [0, 32], sizes = [16, 32], strides = [1, 1]} : vector<16x96xf32> to vector<16x32xf32>
    %312 = vector.extract_strided_slice %303 {offsets = [0, 64], sizes = [16, 32], strides = [1, 1]} : vector<16x96xf32> to vector<16x32xf32>
    %313 = vector.extract_strided_slice %309 {offsets = [0, 0], sizes = [32, 32], strides = [1, 1]} : vector<32x96xf32> to vector<32x32xf32>
    %314 = vector.extract_strided_slice %309 {offsets = [0, 32], sizes = [32, 32], strides = [1, 1]} : vector<32x96xf32> to vector<32x32xf32>
    %315 = vector.extract_strided_slice %309 {offsets = [0, 64], sizes = [32, 32], strides = [1, 1]} : vector<32x96xf32> to vector<32x32xf32>
    %316 = tpu.concatenate %314, %314, %314, %314 in 0 : vector<32x32xf32>, vector<32x32xf32>, vector<32x32xf32>, vector<32x32xf32> -> vector<128x32xf32>
    %317 = arith.mulf %316, %10 : vector<128x32xf32>
    %318 = arith.truncf %317 : vector<128x32xf32> to vector<128x32xbf16>
    %319 = tpu.concatenate %315, %315, %315, %315 in 0 : vector<32x32xf32>, vector<32x32xf32>, vector<32x32xf32>, vector<32x32xf32> -> vector<128x32xf32>
    %320 = arith.mulf %319, %10 : vector<128x32xf32>
    %321 = arith.truncf %320 : vector<128x32xf32> to vector<128x32xbf16>
    %322 = arith.truncf %310 : vector<16x32xf32> to vector<16x32xbf16>
    %cst_86 = arith.constant dense<0.000000e+00> : vector<16x128xf32>
    %323 = tpu.matmul %322, %318, %cst_86 {dimension_numbers = #tpu.dot_dimension_numbers<[1], [1], [0], [0], [0, 0, 1, 0], [], []>} : vector<16x32xbf16>, vector<128x32xbf16>, vector<16x128xf32> -> vector<16x128xf32>
    %cst_87 = arith.constant dense<0xFF800000> : vector<16xf32>
    %324 = vector.multi_reduction <maximumf>, %323, %cst_87 [1] : vector<16x128xf32> to vector<16xf32>
    %325 = vector.shape_cast %324 : vector<16xf32> to vector<16x1xf32>
    %326 = vector.broadcast %325 : vector<16x1xf32> to vector<16x128xf32>
    %327 = arith.subf %323, %326 : vector<16x128xf32>
    %328 = math.exp %327 : vector<16x128xf32>
    %329 = arith.mulf %328, %30 : vector<16x128xf32>
    %cst_88 = arith.constant dense<0.000000e+00> : vector<16x128xf32>
    %330 = tpu.matmul %329, %50, %cst_88 {dimension_numbers = #tpu.dot_dimension_numbers<[1], [0], [0], [1], [0, 0, 1, 1], [], []>} : vector<16x128xf32>, vector<128x128xf32>, vector<16x128xf32> -> vector<16x128xf32>
    %331 = tpu.reciprocal %330 {approx = true} : vector<16x128xf32> -> vector<16x128xf32>
    %332 = arith.mulf %329, %331 : vector<16x128xf32>
    %333 = arith.truncf %332 : vector<16x128xf32> to vector<16x128xbf16>
    %cst_89 = arith.constant dense<0.000000e+00> : vector<16x32xf32>
    %334 = tpu.matmul %333, %321, %cst_89 {dimension_numbers = #tpu.dot_dimension_numbers<[1], [0], [0], [1], [0, 0, 1, 1], [], []>} : vector<16x128xbf16>, vector<128x32xbf16>, vector<16x32xf32> -> vector<16x32xf32>
    %335 = tpu.concatenate %311, %311, %311, %311 in 0 : vector<16x32xf32>, vector<16x32xf32>, vector<16x32xf32>, vector<16x32xf32> -> vector<64x32xf32>
    %336 = arith.mulf %335, %19 : vector<64x32xf32>
    %337 = arith.truncf %336 : vector<64x32xf32> to vector<64x32xbf16>
    %338 = tpu.concatenate %312, %312, %312, %312 in 0 : vector<16x32xf32>, vector<16x32xf32>, vector<16x32xf32>, vector<16x32xf32> -> vector<64x32xf32>
    %339 = arith.mulf %338, %19 : vector<64x32xf32>
    %340 = arith.truncf %339 : vector<64x32xf32> to vector<64x32xbf16>
    %341 = arith.truncf %313 : vector<32x32xf32> to vector<32x32xbf16>
    %cst_90 = arith.constant dense<0.000000e+00> : vector<32x64xf32>
    %342 = tpu.matmul %341, %337, %cst_90 {dimension_numbers = #tpu.dot_dimension_numbers<[1], [1], [0], [0], [0, 0, 1, 0], [], []>} : vector<32x32xbf16>, vector<64x32xbf16>, vector<32x64xf32> -> vector<32x64xf32>
    %cst_91 = arith.constant dense<0xFF800000> : vector<32xf32>
    %343 = vector.multi_reduction <maximumf>, %342, %cst_91 [1] : vector<32x64xf32> to vector<32xf32>
    %344 = vector.shape_cast %343 : vector<32xf32> to vector<32x1xf32>
    %345 = vector.broadcast %344 : vector<32x1xf32> to vector<32x64xf32>
    %346 = arith.subf %342, %345 : vector<32x64xf32>
    %347 = math.exp %346 : vector<32x64xf32>
    %348 = arith.mulf %347, %41 : vector<32x64xf32>
    %cst_92 = arith.constant dense<0.000000e+00> : vector<32x64xf32>
    %349 = tpu.matmul %348, %59, %cst_92 {dimension_numbers = #tpu.dot_dimension_numbers<[1], [0], [0], [1], [0, 0, 1, 1], [], []>} : vector<32x64xf32>, vector<64x64xf32>, vector<32x64xf32> -> vector<32x64xf32>
    %350 = tpu.reciprocal %349 {approx = true} : vector<32x64xf32> -> vector<32x64xf32>
    %351 = arith.mulf %348, %350 : vector<32x64xf32>
    %352 = arith.truncf %351 : vector<32x64xf32> to vector<32x64xbf16>
    %cst_93 = arith.constant dense<0.000000e+00> : vector<32x32xf32>
    %353 = tpu.matmul %352, %340, %cst_93 {dimension_numbers = #tpu.dot_dimension_numbers<[1], [0], [0], [1], [0, 0, 1, 1], [], []>} : vector<32x64xbf16>, vector<64x32xbf16>, vector<32x32xf32> -> vector<32x32xf32>
    %354 = arith.truncf %334 : vector<16x32xf32> to vector<16x32xbf16>
    %c1_94 = arith.constant 1 : index
    %c0_95 = arith.constant 0 : index
    %c256_96 = arith.constant 256 : index
    %355 = vector.load %arg3[%c1_94, %c0_95, %c256_96] : memref<2x32x512xbf16, #tpu.memory_space<vmem>>, vector<1x32x32xbf16>
    %356 = vector.shape_cast %355 : vector<1x32x32xbf16> to vector<32x32xbf16>
    %cst_97 = arith.constant dense<0.000000e+00> : vector<16x32xf32>
    %357 = tpu.matmul %354, %356, %cst_97 {dimension_numbers = #tpu.dot_dimension_numbers<[1], [0], [0], [1], [0, 0, 1, 1], [], []>} : vector<16x32xbf16>, vector<32x32xbf16>, vector<16x32xf32> -> vector<16x32xf32>
    %358 = vector.broadcast %284 : vector<1x32xf32> to vector<16x32xf32>
    %359 = arith.addf %357, %358 : vector<16x32xf32>
    %360 = arith.addf %359, %233 : vector<16x32xf32>
    %cst_98 = arith.constant dense<0.000000e+00> : vector<16xf32>
    %361 = vector.multi_reduction <add>, %360, %cst_98 [1] : vector<16x32xf32> to vector<16xf32>
    %362 = vector.shape_cast %361 : vector<16xf32> to vector<16x1xf32>
    %cst_99 = arith.constant 3.200000e+01 : f32
    %363 = vector.broadcast %cst_99 : f32 to vector<16x1xf32>
    %364 = arith.divf %362, %363 : vector<16x1xf32>
    %365 = vector.broadcast %364 : vector<16x1xf32> to vector<16x32xf32>
    %366 = arith.subf %360, %365 : vector<16x32xf32>
    %367 = arith.mulf %366, %366 : vector<16x32xf32>
    %cst_100 = arith.constant dense<0.000000e+00> : vector<16xf32>
    %368 = vector.multi_reduction <add>, %367, %cst_100 [1] : vector<16x32xf32> to vector<16xf32>
    %369 = vector.shape_cast %368 : vector<16xf32> to vector<16x1xf32>
    %cst_101 = arith.constant 3.200000e+01 : f32
    %370 = vector.broadcast %cst_101 : f32 to vector<16x1xf32>
    %371 = arith.divf %369, %370 : vector<16x1xf32>
    %cst_102 = arith.constant 9.99999996E-13 : f32
    %372 = vector.broadcast %cst_102 : f32 to vector<16x1xf32>
    %373 = arith.addf %371, %372 : vector<16x1xf32>
    %374 = math.rsqrt %373 : vector<16x1xf32>
    %375 = vector.broadcast %374 : vector<16x1xf32> to vector<16x32xf32>
    %376 = arith.mulf %366, %375 : vector<16x32xf32>
    %377 = vector.broadcast %285 : vector<1x32xf32> to vector<16x32xf32>
    %378 = arith.mulf %376, %377 : vector<16x32xf32>
    %379 = vector.broadcast %286 : vector<1x32xf32> to vector<16x32xf32>
    %380 = arith.addf %378, %379 : vector<16x32xf32>
    %381 = arith.truncf %353 : vector<32x32xf32> to vector<32x32xbf16>
    %c1_103 = arith.constant 1 : index
    %c0_104 = arith.constant 0 : index
    %c288_105 = arith.constant 288 : index
    %382 = vector.load %arg3[%c1_103, %c0_104, %c288_105] : memref<2x32x512xbf16, #tpu.memory_space<vmem>>, vector<1x32x32xbf16>
    %383 = vector.shape_cast %382 : vector<1x32x32xbf16> to vector<32x32xbf16>
    %cst_106 = arith.constant dense<0.000000e+00> : vector<32x32xf32>
    %384 = tpu.matmul %381, %383, %cst_106 {dimension_numbers = #tpu.dot_dimension_numbers<[1], [0], [0], [1], [0, 0, 1, 1], [], []>} : vector<32x32xbf16>, vector<32x32xbf16>, vector<32x32xf32> -> vector<32x32xf32>
    %385 = vector.broadcast %287 : vector<1x32xf32> to vector<32x32xf32>
    %386 = arith.addf %384, %385 : vector<32x32xf32>
    %387 = arith.addf %386, %279 : vector<32x32xf32>
    %cst_107 = arith.constant dense<0.000000e+00> : vector<32xf32>
    %388 = vector.multi_reduction <add>, %387, %cst_107 [1] : vector<32x32xf32> to vector<32xf32>
    %389 = vector.shape_cast %388 : vector<32xf32> to vector<32x1xf32>
    %cst_108 = arith.constant 3.200000e+01 : f32
    %390 = vector.broadcast %cst_108 : f32 to vector<32x1xf32>
    %391 = arith.divf %389, %390 : vector<32x1xf32>
    %392 = vector.broadcast %391 : vector<32x1xf32> to vector<32x32xf32>
    %393 = arith.subf %387, %392 : vector<32x32xf32>
    %394 = arith.mulf %393, %393 : vector<32x32xf32>
    %cst_109 = arith.constant dense<0.000000e+00> : vector<32xf32>
    %395 = vector.multi_reduction <add>, %394, %cst_109 [1] : vector<32x32xf32> to vector<32xf32>
    %396 = vector.shape_cast %395 : vector<32xf32> to vector<32x1xf32>
    %cst_110 = arith.constant 3.200000e+01 : f32
    %397 = vector.broadcast %cst_110 : f32 to vector<32x1xf32>
    %398 = arith.divf %396, %397 : vector<32x1xf32>
    %cst_111 = arith.constant 9.99999996E-13 : f32
    %399 = vector.broadcast %cst_111 : f32 to vector<32x1xf32>
    %400 = arith.addf %398, %399 : vector<32x1xf32>
    %401 = math.rsqrt %400 : vector<32x1xf32>
    %402 = vector.broadcast %401 : vector<32x1xf32> to vector<32x32xf32>
    %403 = arith.mulf %393, %402 : vector<32x32xf32>
    %404 = vector.broadcast %288 : vector<1x32xf32> to vector<32x32xf32>
    %405 = arith.mulf %403, %404 : vector<32x32xf32>
    %406 = vector.broadcast %289 : vector<1x32xf32> to vector<32x32xf32>
    %407 = arith.addf %405, %406 : vector<32x32xf32>
    %408 = arith.truncf %380 : vector<16x32xf32> to vector<16x32xbf16>
    %c1_112 = arith.constant 1 : index
    %c0_113 = arith.constant 0 : index
    %c320_114 = arith.constant 320 : index
    %409 = vector.load %arg3[%c1_112, %c0_113, %c320_114] : memref<2x32x512xbf16, #tpu.memory_space<vmem>>, vector<1x32x64xbf16>
    %410 = vector.shape_cast %409 : vector<1x32x64xbf16> to vector<32x64xbf16>
    %cst_115 = arith.constant dense<0.000000e+00> : vector<16x64xf32>
    %411 = tpu.matmul %408, %410, %cst_115 {dimension_numbers = #tpu.dot_dimension_numbers<[1], [0], [0], [1], [0, 0, 1, 1], [], []>} : vector<16x32xbf16>, vector<32x64xbf16>, vector<16x64xf32> -> vector<16x64xf32>
    %412 = vector.broadcast %290 : vector<1x64xf32> to vector<16x64xf32>
    %413 = arith.addf %411, %412 : vector<16x64xf32>
    %cst_116 = arith.constant 5.000000e-01 : f32
    %414 = vector.broadcast %cst_116 : f32 to vector<16x64xf32>
    %415 = arith.mulf %414, %413 : vector<16x64xf32>
    %cst_117 = arith.constant 4.471500e-02 : f32
    %416 = vector.broadcast %cst_117 : f32 to vector<16x64xf32>
    %417 = arith.mulf %416, %413 : vector<16x64xf32>
    %418 = arith.mulf %417, %413 : vector<16x64xf32>
    %419 = arith.mulf %418, %413 : vector<16x64xf32>
    %420 = arith.addf %413, %419 : vector<16x64xf32>
    %cst_118 = arith.constant 0.797884583 : f32
    %421 = vector.broadcast %cst_118 : f32 to vector<16x64xf32>
    %422 = arith.mulf %421, %420 : vector<16x64xf32>
    %423 = math.tanh %422 : vector<16x64xf32>
    %cst_119 = arith.constant 1.000000e+00 : f32
    %424 = vector.broadcast %cst_119 : f32 to vector<16x64xf32>
    %425 = arith.addf %424, %423 : vector<16x64xf32>
    %426 = arith.mulf %415, %425 : vector<16x64xf32>
    %427 = arith.truncf %426 : vector<16x64xf32> to vector<16x64xbf16>
    %c1_120 = arith.constant 1 : index
    %c0_121 = arith.constant 0 : index
    %c0_122 = arith.constant 0 : index
    %428 = vector.load %arg4[%c1_120, %c0_121, %c0_122] : memref<2x64x64xbf16, #tpu.memory_space<vmem>>, vector<1x64x32xbf16>
    %429 = vector.shape_cast %428 : vector<1x64x32xbf16> to vector<64x32xbf16>
    %cst_123 = arith.constant dense<0.000000e+00> : vector<16x32xf32>
    %430 = tpu.matmul %427, %429, %cst_123 {dimension_numbers = #tpu.dot_dimension_numbers<[1], [0], [0], [1], [0, 0, 1, 1], [], []>} : vector<16x64xbf16>, vector<64x32xbf16>, vector<16x32xf32> -> vector<16x32xf32>
    %431 = vector.broadcast %291 : vector<1x32xf32> to vector<16x32xf32>
    %432 = arith.addf %430, %431 : vector<16x32xf32>
    %433 = arith.addf %432, %380 : vector<16x32xf32>
    %cst_124 = arith.constant dense<0.000000e+00> : vector<16xf32>
    %434 = vector.multi_reduction <add>, %433, %cst_124 [1] : vector<16x32xf32> to vector<16xf32>
    %435 = vector.shape_cast %434 : vector<16xf32> to vector<16x1xf32>
    %cst_125 = arith.constant 3.200000e+01 : f32
    %436 = vector.broadcast %cst_125 : f32 to vector<16x1xf32>
    %437 = arith.divf %435, %436 : vector<16x1xf32>
    %438 = vector.broadcast %437 : vector<16x1xf32> to vector<16x32xf32>
    %439 = arith.subf %433, %438 : vector<16x32xf32>
    %440 = arith.mulf %439, %439 : vector<16x32xf32>
    %cst_126 = arith.constant dense<0.000000e+00> : vector<16xf32>
    %441 = vector.multi_reduction <add>, %440, %cst_126 [1] : vector<16x32xf32> to vector<16xf32>
    %442 = vector.shape_cast %441 : vector<16xf32> to vector<16x1xf32>
    %cst_127 = arith.constant 3.200000e+01 : f32
    %443 = vector.broadcast %cst_127 : f32 to vector<16x1xf32>
    %444 = arith.divf %442, %443 : vector<16x1xf32>
    %cst_128 = arith.constant 9.99999996E-13 : f32
    %445 = vector.broadcast %cst_128 : f32 to vector<16x1xf32>
    %446 = arith.addf %444, %445 : vector<16x1xf32>
    %447 = math.rsqrt %446 : vector<16x1xf32>
    %448 = vector.broadcast %447 : vector<16x1xf32> to vector<16x32xf32>
    %449 = arith.mulf %439, %448 : vector<16x32xf32>
    %450 = vector.broadcast %294 : vector<1x32xf32> to vector<16x32xf32>
    %451 = arith.mulf %449, %450 : vector<16x32xf32>
    %452 = vector.broadcast %295 : vector<1x32xf32> to vector<16x32xf32>
    %453 = arith.addf %451, %452 : vector<16x32xf32>
    %454 = arith.truncf %407 : vector<32x32xf32> to vector<32x32xbf16>
    %c1_129 = arith.constant 1 : index
    %c0_130 = arith.constant 0 : index
    %c384_131 = arith.constant 384 : index
    %455 = vector.load %arg3[%c1_129, %c0_130, %c384_131] : memref<2x32x512xbf16, #tpu.memory_space<vmem>>, vector<1x32x64xbf16>
    %456 = vector.shape_cast %455 : vector<1x32x64xbf16> to vector<32x64xbf16>
    %cst_132 = arith.constant dense<0.000000e+00> : vector<32x64xf32>
    %457 = tpu.matmul %454, %456, %cst_132 {dimension_numbers = #tpu.dot_dimension_numbers<[1], [0], [0], [1], [0, 0, 1, 1], [], []>} : vector<32x32xbf16>, vector<32x64xbf16>, vector<32x64xf32> -> vector<32x64xf32>
    %458 = vector.broadcast %292 : vector<1x64xf32> to vector<32x64xf32>
    %459 = arith.addf %457, %458 : vector<32x64xf32>
    %cst_133 = arith.constant 5.000000e-01 : f32
    %460 = vector.broadcast %cst_133 : f32 to vector<32x64xf32>
    %461 = arith.mulf %460, %459 : vector<32x64xf32>
    %cst_134 = arith.constant 4.471500e-02 : f32
    %462 = vector.broadcast %cst_134 : f32 to vector<32x64xf32>
    %463 = arith.mulf %462, %459 : vector<32x64xf32>
    %464 = arith.mulf %463, %459 : vector<32x64xf32>
    %465 = arith.mulf %464, %459 : vector<32x64xf32>
    %466 = arith.addf %459, %465 : vector<32x64xf32>
    %cst_135 = arith.constant 0.797884583 : f32
    %467 = vector.broadcast %cst_135 : f32 to vector<32x64xf32>
    %468 = arith.mulf %467, %466 : vector<32x64xf32>
    %469 = math.tanh %468 : vector<32x64xf32>
    %cst_136 = arith.constant 1.000000e+00 : f32
    %470 = vector.broadcast %cst_136 : f32 to vector<32x64xf32>
    %471 = arith.addf %470, %469 : vector<32x64xf32>
    %472 = arith.mulf %461, %471 : vector<32x64xf32>
    %473 = arith.truncf %472 : vector<32x64xf32> to vector<32x64xbf16>
    %c1_137 = arith.constant 1 : index
    %c0_138 = arith.constant 0 : index
    %c32_139 = arith.constant 32 : index
    %474 = vector.load %arg4[%c1_137, %c0_138, %c32_139] : memref<2x64x64xbf16, #tpu.memory_space<vmem>>, vector<1x64x32xbf16>
    %475 = vector.shape_cast %474 : vector<1x64x32xbf16> to vector<64x32xbf16>
    %cst_140 = arith.constant dense<0.000000e+00> : vector<32x32xf32>
    %476 = tpu.matmul %473, %475, %cst_140 {dimension_numbers = #tpu.dot_dimension_numbers<[1], [0], [0], [1], [0, 0, 1, 1], [], []>} : vector<32x64xbf16>, vector<64x32xbf16>, vector<32x32xf32> -> vector<32x32xf32>
    %477 = vector.broadcast %293 : vector<1x32xf32> to vector<32x32xf32>
    %478 = arith.addf %476, %477 : vector<32x32xf32>
    %479 = arith.addf %478, %407 : vector<32x32xf32>
    %cst_141 = arith.constant dense<0.000000e+00> : vector<32xf32>
    %480 = vector.multi_reduction <add>, %479, %cst_141 [1] : vector<32x32xf32> to vector<32xf32>
    %481 = vector.shape_cast %480 : vector<32xf32> to vector<32x1xf32>
    %cst_142 = arith.constant 3.200000e+01 : f32
    %482 = vector.broadcast %cst_142 : f32 to vector<32x1xf32>
    %483 = arith.divf %481, %482 : vector<32x1xf32>
    %484 = vector.broadcast %483 : vector<32x1xf32> to vector<32x32xf32>
    %485 = arith.subf %479, %484 : vector<32x32xf32>
    %486 = arith.mulf %485, %485 : vector<32x32xf32>
    %cst_143 = arith.constant dense<0.000000e+00> : vector<32xf32>
    %487 = vector.multi_reduction <add>, %486, %cst_143 [1] : vector<32x32xf32> to vector<32xf32>
    %488 = vector.shape_cast %487 : vector<32xf32> to vector<32x1xf32>
    %cst_144 = arith.constant 3.200000e+01 : f32
    %489 = vector.broadcast %cst_144 : f32 to vector<32x1xf32>
    %490 = arith.divf %488, %489 : vector<32x1xf32>
    %cst_145 = arith.constant 9.99999996E-13 : f32
    %491 = vector.broadcast %cst_145 : f32 to vector<32x1xf32>
    %492 = arith.addf %490, %491 : vector<32x1xf32>
    %493 = math.rsqrt %492 : vector<32x1xf32>
    %494 = vector.broadcast %493 : vector<32x1xf32> to vector<32x32xf32>
    %495 = arith.mulf %485, %494 : vector<32x32xf32>
    %496 = vector.broadcast %296 : vector<1x32xf32> to vector<32x32xf32>
    %497 = arith.mulf %495, %496 : vector<32x32xf32>
    %498 = vector.broadcast %297 : vector<1x32xf32> to vector<32x32xf32>
    %499 = arith.addf %497, %498 : vector<32x32xf32>
    %c0_146 = arith.constant 0 : index
    %c0_147 = arith.constant 0 : index
    %500 = vector.load %arg6[%c0_146, %c0_147] : memref<16x32xf32, #tpu.memory_space<vmem>>, vector<16x32xf32>
    tpu.vector_store %arg6[%c0_146, %c0_147], %453 {strides = array<i32>} : memref<16x32xf32, #tpu.memory_space<vmem>>, vector<16x32xf32>,
    %c0_148 = arith.constant 0 : index
    %c0_149 = arith.constant 0 : index
    %501 = vector.load %arg7[%c0_148, %c0_149] : memref<32x32xf32, #tpu.memory_space<vmem>>, vector<32x32xf32>
    tpu.vector_store %arg7[%c0_148, %c0_149], %499 {strides = array<i32>} : memref<32x32xf32, #tpu.memory_space<vmem>>, vector<32x32xf32>,
    return
  }
  func.func @transform_0(%arg0: i32) -> (i32, i32) {
    %c0_i32 = arith.constant 0 : i32
    %c0_i32_0 = arith.constant 0 : i32
    %c0_i32_1 = arith.constant 0 : i32
    return %c0_i32, %c0_i32_0 : i32, i32
  }
  func.func @transform_1(%arg0: i32) -> (i32, i32) {
    %c0_i32 = arith.constant 0 : i32
    %c0_i32_0 = arith.constant 0 : i32
    %c0_i32_1 = arith.constant 0 : i32
    return %c0_i32, %c0_i32_0 : i32, i32
  }
  func.func @transform_2(%arg0: i32) -> (i32, i32, i32) {
    %c0_i32 = arith.constant 0 : i32
    %c0_i32_0 = arith.constant 0 : i32
    %c0_i32_1 = arith.constant 0 : i32
    %c0_i32_2 = arith.constant 0 : i32
    return %c0_i32, %c0_i32_0, %c0_i32_1 : i32, i32, i32
  }
  func.func @transform_3(%arg0: i32) -> (i32, i32, i32) {
    %c0_i32 = arith.constant 0 : i32
    %c0_i32_0 = arith.constant 0 : i32
    %c0_i32_1 = arith.constant 0 : i32
    %c0_i32_2 = arith.constant 0 : i32
    return %c0_i32, %c0_i32_0, %c0_i32_1 : i32, i32, i32
  }
  func.func @transform_4(%arg0: i32) -> (i32, i32, i32) {
    %c0_i32 = arith.constant 0 : i32
    %c0_i32_0 = arith.constant 0 : i32
    %c0_i32_1 = arith.constant 0 : i32
    %c0_i32_2 = arith.constant 0 : i32
    return %c0_i32, %c0_i32_0, %c0_i32_1 : i32, i32, i32
  }
  func.func @transform_5(%arg0: i32) -> (i32, i32) {
    %c0_i32 = arith.constant 0 : i32
    %c0_i32_0 = arith.constant 0 : i32
    %c0_i32_1 = arith.constant 0 : i32
    return %c0_i32, %c0_i32_0 : i32, i32
  }
  func.func @transform_6(%arg0: i32) -> (i32, i32) {
    %c0_i32 = arith.constant 0 : i32
    %c0_i32_0 = arith.constant 0 : i32
    %c0_i32_1 = arith.constant 0 : i32
    return %c0_i32, %c0_i32_0 : i32, i32
  }
}

</mosaic_0001>

<bundles_post_ra>
// kernel: tpu_custom_call.1
= control target key start
LH: loop header
LB: loop body
LE: loop exit
PB: predicated region body
PF: predicated region fallthrough
CT: control target
= control target key end

     0   :  { %12 = vsyncpa [#allocation3], 0  ;;  %s6647_s0 = inlined_call_operand.hbm [shape: f32[16,32], index: 0, kind: input, shape index: {}]   ;;  %s6648_s1 = inlined_call_operand.hbm [shape: f32[32,32], index: 1, kind: input, shape index: {}]   ;;  %s6649_s2 = inlined_call_operand.hbm [shape: bf16[2,32,512], index: 2, kind: input, shape index: {}]   ;;  %s6650_s3 = inlined_call_operand.hbm [shape: bf16[2,64,64], index: 3, kind: input, shape index: {}]   ;;  %s6651_s4 = inlined_call_operand.hbm [shape: f32[2,8,128], index: 4, kind: input, shape index: {}]   ;;  %s6652_s5 = inlined_call_operand.hbm [shape: f32[16,32], index: 5, kind: output, shape index: {0}]   ;;  %s6653_s6 = inlined_call_operand.hbm [shape: f32[32,32], index: 6, kind: output, shape index: {1}]  }
   0x1   :  { %13 = vsyncpa [#allocation6], 0 }
   0x2   :  { %14 = vsyncpa [#allocation9], 0 }
   0x3   :  { %15 = vsyncpa [#allocation4], 0 }
   0x4   :  { %16 = vsyncpa [#allocation13], 0  ;;  %s4728_s21 = smov [#allocation5]   ;;  %s4729_s23 = smov [#allocation8]  }
   0x5   :  { %s34_s22 = sshll.u32 %s4728_s21, 4  ;;  %s58_s24 = sshll.u32 %s4729_s23, 4  ;;  %s35_s22 = int_to_ptr.vmem [resolvable:$true] %s34_s22  ;;  %s4781_s24 = int_to_ptr.vmem [resolvable:$true] %s58_s24 }
   0x6   :  { %s4564_s27 = scalar_lea.hbm %s6648_s1, 512 }
   0x7   :  { %p4565_p0 = scmp.ne.s32.totalorder %s6648_s1, %s4564_s27  ;;  %p4568_p1 = scmp.lt.u32.totalorder %s4564_s27, %s6648_s1 }
   0x9   :  { %p4570_p2 = pnand %p4568_p1, %p4565_p0 }
   0xb   :  { %4573 = shalt.err (!%p4570_p2)
}
   0xc   :  { %s4574_s8 = scalar_lea.vmem %s35_s22, 512  ;;  %p4579_p4 = scmp.lt.s32.totalorder %s35_s22, %s35_s22 }
   0xd   :  { %p4575_p3 = scmp.ne.s32.totalorder %s35_s22, %s4574_s8  ;;  %p4580_p5 = scmp.lt.s32.totalorder %s4574_s8, %s4574_s8 }
   0xf   :  { %p4581_p6 = por %p4580_p5, %p4579_p4 }
  0x11   :  { %p4582_p7 = pnand %p4581_p6, %p4575_p3 }
  0x13   :  { %4585 = shalt.err (!%p4582_p7)
}
  0x14   :  { %s4730_s9 = smov 128   ;;  %s4731_s10 = smov 8  }
  0x15   :  { %40 = dma.hbm_to_vmem [thread:$0]  %s6648_s1, 512, %s35_s22, [#allocation6], %s4730_s9, %s4730_s9, %s4731_s10  }
  0x16   :  { %s4586_s15 = scalar_lea.hbm %s6650_s3, 1024 }
  0x17   :  { %p4587_p8 = scmp.ne.s32.totalorder %s6650_s3, %s4586_s15  ;;  %p4590_p9 = scmp.lt.u32.totalorder %s4586_s15, %s6650_s3 }
  0x19   :  { %p4592_p10 = pnand %p4590_p9, %p4587_p8 }
  0x1b   :  { %4595 = shalt.err (!%p4592_p10)
}
  0x1c   :  { %s4596_s20 = scalar_lea.vmem %s4781_s24, 1024  ;;  %p4601_p12 = scmp.lt.s32.totalorder %s4781_s24, %s4781_s24 }
  0x1d   :  { %p4597_p11 = scmp.ne.s32.totalorder %s4781_s24, %s4596_s20  ;;  %p4602_p13 = scmp.lt.s32.totalorder %s4596_s20, %s4596_s20 }
  0x1f   :  { %p4603_p0 = por %p4602_p13, %p4601_p12 }
  0x21   :  { %p4604_p1 = pnand %p4603_p0, %p4597_p11 }
  0x23   :  { %4607 = shalt.err (!%p4604_p1)
}
  0x24   :  { %s4732_s1 = smov 64   ;;  %s4733_s21 = smov 4  }
  0x25   :  { %64 = dma.hbm_to_vmem [thread:$0]  %s6650_s3, 1024, %s4781_s24, [#allocation9], %s4732_s1, %s4732_s1, %s4733_s21  }
  0x26   :  { %s4734_s25 = smov [#allocation2]   ;;  %s4735_s27 = smov [#allocation7]  }
  0x27   :  { %s22_s26 = sshll.u32 %s4734_s25, 4  ;;  %s46_s28 = sshll.u32 %s4735_s27, 4  ;;  %s23_s26 = int_to_ptr.vmem [resolvable:$true] %s22_s26  ;;  %s4817_s28 = int_to_ptr.vmem [resolvable:$true] %s46_s28 }
  0x28   :  { %s4608_s7 = scalar_lea.hbm %s6647_s0, 256 }
  0x29   :  { %p4609_p2 = scmp.ne.s32.totalorder %s6647_s0, %s4608_s7  ;;  %p4612_p3 = scmp.lt.u32.totalorder %s4608_s7, %s6647_s0 }
  0x2b   :  { %p4614_p4 = pnand %p4612_p3, %p4609_p2 }
  0x2d   :  { %4617 = shalt.err (!%p4614_p4)
}
  0x2e   :  { %s4618_s3 = scalar_lea.vmem %s23_s26, 256  ;;  %p4623_p6 = scmp.lt.s32.totalorder %s23_s26, %s23_s26 }
  0x2f   :  { %p4619_p5 = scmp.ne.s32.totalorder %s23_s26, %s4618_s3  ;;  %p4624_p7 = scmp.lt.s32.totalorder %s4618_s3, %s4618_s3 }
  0x31   :  { %p4625_p8 = por %p4624_p7, %p4623_p6 }
  0x33   :  { %p4626_p9 = pnand %p4625_p8, %p4619_p5 }
  0x35   :  { %4629 = shalt.err (!%p4626_p9)
}
  0x36   :  { %28 = dma.hbm_to_vmem [thread:$0]  %s6647_s0, 256, %s23_s26, [#allocation3], %s4730_s9, %s4730_s9, %s4731_s10  }
  0x37   :  { %s4630_s17 = scalar_lea.hbm %s6649_s2, 2048 }
  0x38   :  { %p4631_p10 = scmp.ne.s32.totalorder %s6649_s2, %s4630_s17  ;;  %p4634_p11 = scmp.lt.u32.totalorder %s4630_s17, %s6649_s2 }
  0x3a   :  { %p4636_p12 = pnand %p4634_p11, %p4631_p10 }
  0x3c   :  { %4639 = shalt.err (!%p4636_p12)
}
  0x3d   :  { %s4640_s22 = scalar_lea.vmem %s4817_s28, 2048  ;;  %p4645_p0 = scmp.lt.s32.totalorder %s4817_s28, %s4817_s28 }
  0x3e   :  { %p4641_p13 = scmp.ne.s32.totalorder %s4817_s28, %s4640_s22  ;;  %p4646_p1 = scmp.lt.s32.totalorder %s4640_s22, %s4640_s22 }
  0x40   :  { %p4647_p2 = por %p4646_p1, %p4645_p0 }
  0x42   :  { %p4648_p3 = pnand %p4647_p2, %p4641_p13 }
  0x44   :  { %4651 = shalt.err (!%p4648_p3)
}
  0x45   :  { %s4736_s0 = smov 256   ;;  %s4737_s23 = smov 16  }
  0x46   :  { %52 = dma.hbm_to_vmem [thread:$0]  %s6649_s2, 2048, %s4817_s28, [#allocation6], %s4736_s0, %s4736_s0, %s4737_s23  }
  0x47   :  { %s4738_s27 = smov [#allocation10]   ;;  %s4652_s8 = scalar_lea.hbm %s6651_s4, 256 }
  0x48   :  { %s70_s29 = sshll.u32 %s4738_s27, 4  ;;  %p4653_p4 = scmp.ne.s32.totalorder %s6651_s4, %s4652_s8  ;;  %s71_s29 = int_to_ptr.vmem [resolvable:$true] %s70_s29 }
  0x49   :  { %p4656_p5 = scmp.lt.u32.totalorder %s4652_s8, %s6651_s4 }
  0x4b   :  { %p4658_p6 = pnand %p4656_p5, %p4653_p4 }
  0x4d   :  { %4661 = shalt.err (!%p4658_p6)
}
  0x4e   :  { %s4662_s24 = scalar_lea.vmem %s71_s29, 256  ;;  %p4667_p8 = scmp.lt.s32.totalorder %s71_s29, %s71_s29 }
  0x4f   :  { %p4663_p7 = scmp.ne.s32.totalorder %s71_s29, %s4662_s24  ;;  %p4668_p9 = scmp.lt.s32.totalorder %s4662_s24, %s4662_s24 }
  0x51   :  { %p4669_p10 = por %p4668_p9, %p4667_p8 }
  0x53   :  { %p4670_p11 = pnand %p4669_p10, %p4663_p7 }
  0x55   :  { %4673 = shalt.err (!%p4670_p11)
}
  0x56   :  { %76 = dma.hbm_to_vmem [thread:$0]  %s6651_s4, 256, %s71_s29, [#allocation9], %s4730_s9, %s4730_s9, %s4731_s10  }
  0x57   :  { %4718 = dma.done.wait [#allocation3], 256  }
  0x58   :  { %4719 = vsyncadd [#allocation3], 4294967040 }
  0x59   :  { %4720 = dma.done.wait [#allocation6], 2560  }
  0x5a   :  { %4721 = vsyncadd [#allocation6], 4294964736 }
  0x5b   :  { %4722 = dma.done.wait [#allocation9], 1280  }
  0x5c   :  { %4723 = vsyncadd [#allocation9], 4294966016  ;;  %v99_v0 = vlaneseq  ;;  %v6691_v1 = vmov 0.0   ;;  %vm6737_vm0 = vmmov 0   ;;  %v4412_v16 = vld [vmem:[#allocation7] ss:$16 sps:$4 sm:$0xff]  }
  0x5d   :  { %3784 = vmatprep.subr.bf16.mxu1 %v6691_v1  ;;  %3788 = vmatprep.mubr.msk.bf16.mxu1 %vm6737_vm0, %v6691_v1  ;;  %v4413_v17 = vld [vmem:[#allocation7 + $0x20] ss:$16 sps:$4 sm:$0xff]   ;;  %v94_v19 = vld [vmem:[#allocation2 + $0x8] sm:$0xff]  ;;  %v4414_v22 = vld [vmem:[#allocation7 + $0x4] ss:$16 sps:$4 sm:$0xff]   ;;  %vm6739_vm5 = vcmask 261120  }
  0x5e   :  { %v4869_v2 = vshrl.u32 %v99_v0, 7  ;;  %v4871_v3 = vand.u32 127, %v99_v0  ;;  %3800 = vmatprep.subr.bf16.mxu0 %v6691_v1  ;;  %3816 = vmatprep.mubr.msk.bf16.mxu0 %vm6737_vm0, %v6691_v1  ;;  %v93_v18 = vld [vmem:[#allocation2] sm:$0xff]  ;;  %v95_v24 = vld [vmem:[#allocation5] sm:$0xff]  ;;  %v96_v28 = vld [vmem:[#allocation5 + $0x8] sm:$0xff]  ;;  %s4741_s4 = smov 32  }
  0x5f   :  { %3785 = vmatpush3.bf16.msra.mxu1 %v4412_v16  ;;  %v314_v26 = vpack.c.bf16 %v94_v19, %v93_v18  ;;  %v4415_v27 = vld [vmem:[#allocation7 + $0x24] ss:$16 sps:$4 sm:$0xff]   ;;  %v98_v30 = vld [vmem:[#allocation5 + $0x18] sm:$0xff]  ;;  %v380_v34 = vpack.c.bf16 %v96_v28, %v95_v24  ;;  %s4742_s14 = smov 96  }
  0x60   :  { %6773 = vst [vmem:[#allocation19_spill] sm:$0xff] %v4869_v2  ;;  %v4877_v4 = vadd.s32 32, %v4869_v2  ;;  %v4880_v5 = vadd.s32 40, %v4869_v2  ;;  %v4883_v6 = vshra.s32 %v4871_v3, 3  ;;  %v4886_v7 = vadd.s32 8, %v4869_v2  ;;  %3786 = vmatprep.subr.bf16.mxu1 %v6691_v1  ;;  %v4922_v29 = vld [vmem:[#allocation5 + $0x10] sm:$0xff] }
  0x61   :  { %v6690_v8 = vshra.s32 %v4869_v2, 5  ;;  %v4890_v9 = vadd.s32 48, %v4869_v2  ;;  %v4893_v10 = vadd.s32 56, %v4869_v2  ;;  %v4896_v11 = vadd.s32 16, %v4869_v2 }
  0x62   :  { %v6673_v12 = vshra.s32 %v4877_v4, 5  ;;  %v6672_v13 = vshra.s32 %v4880_v5, 5  ;;  %v6689_v14 = vshra.s32 %v4886_v7, 5  ;;  %v4902_v15 = vadd.s32 24, %v4869_v2 }
  0x63   :  { %vm135_vm3 = vcmp.eq.s32.totalorder %v6690_v8, %v4883_v6  ;;  %v6671_v32 = vshra.s32 %v4890_v9, 5  ;;  %v6670_v33 = vshra.s32 %v4893_v10, 5  ;;  %3787 = vmatpush3.bf16.msra.mxu1 %v4413_v17  ;;  %v381_v35 = vpack.c.bf16 %v98_v30, %v4922_v29 }
  0x64   :  { %vm139_vm1 = vcmp.eq.s32.totalorder %v6673_v12, %v4883_v6  ;;  %vm140_vm2 = vcmp.eq.s32.totalorder %v6672_v13, %v4883_v6  ;;  %vm136_vm4 = vcmp.eq.s32.totalorder %v6689_v14, %v4883_v6  ;;  %v3432_v25 = vsel %vm135_vm3, 1.0, %v6691_v1  ;;  %3792 = vmatprep.subr.bf16.mxu1 %v4414_v22 }
  0x65   :  { %v3436_v20 = vsel %vm139_vm1, 1.0, %v6691_v1  ;;  %v3437_v21 = vsel %vm140_vm2, 1.0, %v6691_v1  ;;  %v3433_v31 = vsel %vm136_vm4, 1.0, %v6691_v1  ;;  %v6676_v37 = vshra.s32 %v4896_v11, 5 }
  0x66   :  { %v4919_v23 = vpack.i.bf16 %v3437_v21, %v3436_v20  ;;  %v4930_v36 = vpack.i.bf16 %v3433_v31, %v3432_v25  ;;  %vm141_vm6 = vcmp.eq.s32.totalorder %v6671_v32, %v4883_v6  ;;  %vm142_vm7 = vcmp.eq.s32.totalorder %v6670_v33, %v4883_v6  ;;  %3789 = vmatmul.mubr.msk.bf16.vlgmr.msra.gmra.mrb[0].mxu1 %vm6739_vm5, %v314_v26 }
  0x67   :  { %v6675_v38 = vshra.s32 %v4902_v15, 5  ;;  %v4941_v39 = vadd.s32 80, %v4869_v2  ;;  %v3438_v40 = vsel %vm141_vm6, 1.0, %v6691_v1  ;;  %v3439_v41 = vsel %vm142_vm7, 1.0, %v6691_v1  ;;  %3793 = vmatpush3.bf16.msra.mxu1 %v4414_v22  ;;  %3796 = vmatprep.mubr.msk.bf16.mxu1 %vm6739_vm5, %v380_v34  ;;  %v5052_v34 = vld [vmem:[#allocation10] sm:$0xff] }
  0x68   :  { %4303 = vrot.lane.b32.xlu1 %v4919_v23, %s4741_s4  ;;  %4293 = vrot.lane.b32.xlu0 %v4930_v36, %s4741_s4  ;;  %vm137_vm8 = vcmp.eq.s32.totalorder %v6676_v37, %v4883_v6  ;;  %v4951_v42 = vadd.s32 88, %v4869_v2  ;;  %v4954_v43 = vpack.i.bf16 %v3439_v41, %v3438_v40  ;;  %v4965_v48 = vadd.s32 64, %v4869_v2 }
  0x69   :  { %vm138_vm9 = vcmp.eq.s32.totalorder %v6675_v38, %v4883_v6  ;;  %v3434_v44 = vsel %vm137_vm8, 1.0, %v6691_v1  ;;  %v6660_v45 = vshra.s32 %v4941_v39, 5  ;;  %v4968_v49 = vadd.s32 72, %v4869_v2  ;;  %3794 = vmatprep.subr.bf16.mxu1 %v4415_v27 }
  0x6a   :  { %v3435_v46 = vsel %vm138_vm9, 1.0, %v6691_v1  ;;  %v6659_v47 = vshra.s32 %v4951_v42, 5  ;;  %v4978_v51 = vadd.s32 112, %v4869_v2  ;;  %v4981_v52 = vadd.s32 120, %v4869_v2 }
  0x6b   :  { %v4972_v50 = vpack.i.bf16 %v3435_v46, %v3434_v44  ;;  %vm145_vm10 = vcmp.eq.s32.totalorder %v6660_v45, %v4883_v6  ;;  %v6664_v54 = vshra.s32 %v4965_v48, 5  ;;  %v6662_v55 = vshra.s32 %v4968_v49, 5  ;;  %3795 = vmatpush3.bf16.msra.mxu1 %v4415_v27 }
  0x6c   :  { %4308 = vrot.lane.b32.xlu1 %v4954_v43, %s4741_s4  ;;  %vm146_vm11 = vcmp.eq.s32.totalorder %v6659_v47, %v4883_v6  ;;  %v3442_v53 = vsel %vm145_vm10, 1.0, %v6691_v1  ;;  %v6656_v57 = vshra.s32 %v4978_v51, 5  ;;  %v6655_v58 = vshra.s32 %v4981_v52, 5 }
  0x6d   :  { %4298 = vrot.lane.b32.xlu0 %v4972_v50, %s4741_s4  ;;  %v3443_v56 = vsel %vm146_vm11, 1.0, %v6691_v1  ;;  %v4995_v59 = vadd.s32 96, %v4869_v2  ;;  %vm143_vm12 = vcmp.eq.s32.totalorder %v6664_v54, %v4883_v6  ;;  %vm144_vm13 = vcmp.eq.s32.totalorder %v6662_v55, %v4883_v6 }
  0x6e   :  { %v4997_v60 = vpack.i.bf16 %v3443_v56, %v3442_v53  ;;  %v5006_v61 = vadd.s32 104, %v4869_v2  ;;  %v3440_v62 = vsel %vm143_vm12, 1.0, %v6691_v1  ;;  %v3441_v63 = vsel %vm144_vm13, 1.0, %v6691_v1  ;;  %3797 = vmatmul.mubr.msk.bf16.vlgmr.msra.gmra.mrb[4].mxu1 %vm6739_vm5, %v381_v35 }
  0x6f   :  { %vm149_vm14 = vcmp.eq.s32.totalorder %v6656_v57, %v4883_v6  ;;  %vm150_vm15 = vcmp.eq.s32.totalorder %v6655_v58, %v4883_v6  ;;  %v5018_v0 = vpack.i.bf16 %v3441_v63, %v3440_v62  ;;  %v6658_v18 = vshra.s32 %v4995_v59, 5 }
  0x70   :  { %4318 = vrot.lane.b32.xlu1 %v4997_v60, %s4741_s4  ;;  %v3446_v16 = vsel %vm149_vm14, 1.0, %v6691_v1  ;;  %v3447_v17 = vsel %vm150_vm15, 1.0, %v6691_v1  ;;  %v6657_v20 = vshra.s32 %v5006_v61, 5  ;;  %v6654_v29 = vsub.s32 1, %v4869_v2 }
  0x71   :  { %v5024_v19 = vpack.i.bf16 %v3447_v17, %v3446_v16  ;;  %4313 = vrot.lane.b32.xlu0 %v5018_v0, %s4741_s4  ;;  %vm147_vm1 = vcmp.eq.s32.totalorder %v6658_v18, %v4883_v6 }
  0x72   :  { %vm148_vm2 = vcmp.eq.s32.totalorder %v6657_v20, %v4883_v6  ;;  %v3444_v21 = vsel %vm147_vm1, 1.0, %v6691_v1  ;;  %v389_v35 = vrot.slane %v5052_v34, %v6654_v29 }
  0x73   :  { %v3445_v22 = vsel %vm148_vm2, 1.0, %v6691_v1 }
  0x74   :  { %4328 = vrot.lane.b32.xlu1 %v5024_v19, %s4741_s4  ;;  %v5039_v24 = vpack.i.bf16 %v3445_v22, %v3444_v21 }
  0x76   :  { %4323 = vrot.lane.b32.xlu0 %v5039_v24, %s4741_s4 }
  0xda   :  { %v5043_v25 = vpop.permute.xlu1 %4303  ;;  %v5047_v27 = vpop.permute.xlu0 %4293 }
  0xdb   :  { %6774 = vst [vmem:[#allocation20_spill] sm:$0xff] %v5043_v25  ;;  %6775 = vst [vmem:[#allocation21_spill] sm:$0xff] %v5047_v27  ;;  %v6666_v63 = vunpack.i.h.bf16 %v5047_v27  ;;  %v6665_v16 = vunpack.i.l.bf16 %v5047_v27  ;;  %v6667_v29 = vunpack.i.h.bf16 %v5043_v25  ;;  %v6674_v18 = vunpack.i.l.bf16 %v5043_v25 }
  0xde   :  { %v5057_v40 = vpop.permute.xlu1 %4308 }
  0xdf   :  { %v5059_v41 = vpop.permute.xlu0 %4298  ;;  %v6668_v22 = vunpack.i.h.bf16 %v5057_v40 }
  0xe0   :  { %v6663_v46 = vunpack.i.h.bf16 %v5059_v41  ;;  %v6661_v53 = vunpack.i.l.bf16 %v5059_v41 }
  0xe2   :  { %v5073_v58 = vpop.permute.xlu1 %4318 }
  0xe3   :  { %6776 = vst [vmem:[#allocation22_spill] sm:$0xff] %v5073_v58  ;;  %v5078_v20 = vpop.permute.xlu0 %4313 }
  0xe4   :  { %6777 = vst [vmem:[#allocation23_spill] sm:$0xff] %v5078_v20  ;;  %v6677_v55 = vunpack.i.h.bf16 %v5078_v20 }
  0xe8   :  { %v5126_v33 = vpop.permute.xlu0 %4323 }
  0xe9   :  { %6779 = vst [vmem:[#allocation25_spill] sm:$0xff] %v5126_v33 }
 0x139   :  { %v5045_v26 = vpop.f32.mrb[0].mxu1 }
 0x13a   :  { %v3790_v28 = vpop.f32.mrb[1].mxu1 }
 0x13b   :  { %v5050_v30 = vpop.f32.mrb[2].mxu1 }
 0x13c   :  { %v3791_v31 = vpop.f32.mrb[3].mxu1 }
 0x141   :  { %v3798_v44 = vpop.f32.mrb[4].mxu1 }
 0x142   :  { %v5063_v56 = vadd.f32 %v3798_v44, %v389_v35  ;;  %v442_v62 = vpop.f32.mrb[5].mxu1  ;;  %v6669_v44 = vunpack.i.l.bf16 %v5057_v40 }
 0x143   :  { %v5067_v17 = vadd.f32 %v442_v62, %v389_v35  ;;  %v3799_v21 = vpop.f32.mrb[6].mxu1 }
 0x144   :  { %v5070_v28 = vadd.f32 %v3799_v21, %v389_v35  ;;  %v445_v31 = vpop.f32.mrb[7].mxu1  ;;  %v523_v62 = vmul.f32 %v6661_v53, %v5063_v56 }
 0x145   :  { %v5075_v57 = vadd.f32 %v445_v31, %v389_v35  ;;  %v521_v47 = vmul.f32 %v6665_v16, %v5067_v17  ;;  %v6678_v31 = vunpack.i.h.bf16 %v5073_v58  ;;  %v6680_v16 = vunpack.i.l.bf16 %v5073_v58 }
 0x146   :  { %v524_v21 = vmul.f32 %v6663_v46, %v5070_v28  ;;  %v528_v53 = vmul.f32 %v6668_v22, %v5070_v28  ;;  %v5123_v22 = vshra.s32 %v4886_v7, 4 }
 0x147   :  { %v522_v35 = vmul.f32 %v6666_v63, %v5075_v57  ;;  %v526_v54 = vmul.f32 %v6667_v29, %v5075_v57  ;;  %v5110_v63 = vshra.s32 %v4902_v15, 4  ;;  %v5120_v29 = vshra.s32 %v4869_v2, 4 }
 0x148   :  { %v538_v45 = vpack.c.bf16 %v524_v21, %v523_v62  ;;  %v527_v62 = vmul.f32 %v6669_v44, %v5063_v56  ;;  %v5107_v21 = vshra.s32 %v4896_v11, 4  ;;  %v532_v13 = vmul.f32 %v6678_v31, %v5070_v28 }
 0x149   :  { %v537_v46 = vpack.c.bf16 %v522_v35, %v521_v47  ;;  %v6679_v47 = vunpack.i.l.bf16 %v5078_v20  ;;  %v5113_v35 = vpop.permute.xlu1 %4328  ;;  %v531_v37 = vmul.f32 %v6680_v16, %v5063_v56  ;;  %vm194_vm4 = vcmp.eq.s32.totalorder %v5110_v63, %v4883_v6 }
 0x14a   :  { %628 = vrot.lane.b32.xlu1 %v538_v45, %s4742_s14  ;;  %6778 = vst [vmem:[#allocation24_spill] sm:$0xff] %v5113_v35  ;;  %v525_v45 = vmul.f32 %v6674_v18, %v5067_v17  ;;  %v6683_v44 = vunpack.i.h.bf16 %v5113_v35  ;;  %v540_v32 = vpack.c.bf16 %v528_v53, %v527_v62  ;;  %v530_v18 = vmul.f32 %v6677_v55, %v5075_v57 }
 0x14b   :  { %626 = vrot.lane.b32.xlu0 %v537_v46, %s4742_s14  ;;  %v6681_v46 = vunpack.i.h.bf16 %v5126_v33  ;;  %v6684_v38 = vunpack.i.l.bf16 %v5113_v35  ;;  %vm193_vm3 = vcmp.eq.s32.totalorder %v5107_v21, %v4883_v6  ;;  %v529_v53 = vmul.f32 %v6679_v47, %v5067_v17 }
 0x14c   :  { %v539_v12 = vpack.c.bf16 %v526_v54, %v525_v45  ;;  %v6682_v54 = vunpack.i.l.bf16 %v5126_v33  ;;  %vm191_vm6 = vcmp.eq.s32.totalorder %v5120_v29, %v4883_v6  ;;  %vm192_vm7 = vcmp.eq.s32.totalorder %v5123_v22, %v4883_v6 }
 0x14d   :  { %v536_v62 = vmul.f32 %v6683_v44, %v5070_v28  ;;  %v6686_v45 = vshra.s32 %v4890_v9, 4  ;;  %v6685_v55 = vshra.s32 %v4893_v10, 4  ;;  %v534_v31 = vmul.f32 %v6681_v46, %v5075_v57 }
 0x14e   :  { %632 = vrot.lane.b32.xlu1 %v540_v32, %s4742_s14  ;;  %v542_v32 = vpack.c.bf16 %v532_v13, %v531_v37  ;;  %v6688_v47 = vshra.s32 %v4877_v4, 4  ;;  %v6687_v16 = vshra.s32 %v4880_v5, 4  ;;  %v535_v13 = vmul.f32 %v6684_v38, %v5063_v56 }
 0x14f   :  { %630 = vrot.lane.b32.xlu0 %v539_v12, %s4742_s14  ;;  %v541_v12 = vpack.c.bf16 %v530_v18, %v529_v53  ;;  %v533_v37 = vmul.f32 %v6682_v54, %v5067_v17  ;;  %v3450_v18 = vsel %vm193_vm3, 1.0, %v6691_v1  ;;  %v3451_v53 = vsel %vm194_vm4, 1.0, %v6691_v1 }
 0x150   :  { %v3449_v46 = vsel %vm192_vm7, 1.0, %v6691_v1  ;;  %vm197_vm8 = vcmp.eq.s32.totalorder %v6686_v45, %v4883_v6  ;;  %vm198_vm9 = vcmp.eq.s32.totalorder %v6685_v55, %v4883_v6  ;;  %vm195_vm10 = vcmp.eq.s32.totalorder %v6688_v47, %v4883_v6 }
 0x151   :  { %v543_v54 = vpack.c.bf16 %v534_v31, %v533_v37  ;;  %vm196_vm11 = vcmp.eq.s32.totalorder %v6687_v16, %v4883_v6  ;;  %v3454_v44 = vsel %vm197_vm8, 1.0, %v6691_v1  ;;  %v3455_v31 = vsel %vm198_vm9, 1.0, %v6691_v1 }
 0x152   :  { %636 = vrot.lane.b32.xlu1 %v542_v32, %s4742_s14  ;;  %v3448_v32 = vsel %vm191_vm6, 1.0, %v6691_v1  ;;  %v3452_v37 = vsel %vm195_vm10, 1.0, %v6691_v1  ;;  %v3453_v38 = vsel %vm196_vm11, 1.0, %v6691_v1  ;;  %v5211_v6 = vpack.i.bf16 %v3455_v31, %v3454_v44 }
 0x153   :  { %634 = vrot.lane.b32.xlu0 %v541_v12, %s4742_s14  ;;  %v544_v12 = vpack.c.bf16 %v536_v62, %v535_v13  ;;  %v5200_v62 = vpack.i.bf16 %v3451_v53, %v3450_v18  ;;  %v5203_v13 = vpack.i.bf16 %v3449_v46, %v3448_v32  ;;  %v5215_v18 = vpack.i.bf16 %v3453_v38, %v3452_v37 }
 0x154   :  { %v6693_v31 = vsub.s32 0, %v4869_v2 }
 0x156   :  { %640 = vrot.lane.b32.xlu1 %v544_v12, %s4742_s14  ;;  %v322_v45 = vrot.slane %v5052_v34, %v6693_v31 }
 0x157   :  { %638 = vrot.lane.b32.xlu0 %v543_v54, %s4742_s14 }
 0x158   :  { %v5232_v16 = vadd.f32 %v5045_v26, %v322_v45  ;;  %v5235_v47 = vadd.f32 %v5050_v30, %v322_v45 }
 0x15a   :  { %4338 = vrot.lane.b32.xlu1 %v5200_v62, %s4741_s4 }
 0x15b   :  { %4333 = vrot.lane.b32.xlu0 %v5203_v13, %s4741_s4 }
 0x15e   :  { %4348 = vrot.lane.b32.xlu1 %v5211_v6, %s4741_s4 }
 0x15f   :  { %4343 = vrot.lane.b32.xlu0 %v5215_v18, %s4741_s4 }
 0x1bc   :  { %v629_v46 = vpop.permute.xlu1 %628 }
 0x1bd   :  { %v627_v54 = vpop.permute.xlu0 %626  ;;  %v649_v37 = vsel %vm6739_vm5, %v629_v46, 0 }
 0x1be   :  { %v646_v53 = vsel %vm6739_vm5, %v627_v54, 0 }
 0x1bf   :  { %3801 = vmatpush3.bf16.xpose.msra.mxu0 %v646_v53 }
 0x1c0   :  { %v633_v32 = vpop.permute.xlu1 %632  ;;  %3802 = vmatprep.subr.bf16.mxu0 %v6691_v1 }
 0x1c1   :  { %v631_v44 = vpop.permute.xlu0 %630 }
 0x1c2   :  { %v652_v34 = vsel %vm6739_vm5, %v631_v44, 0  ;;  %v6780_v44 = vmov 0.0  }
 0x1c4   :  { %v637_v12 = vpop.permute.xlu1 %636 }
 0x1c5   :  { %v635_v38 = vpop.permute.xlu0 %634 }
 0x1c7   :  { %3803 = vmatpush3.bf16.xpose.msra.mxu0 %v649_v37 }
 0x1c8   :  { %v641_v55 = vpop.permute.xlu1 %640  ;;  %3804 = vmatprep.subr.bf16.mxu0 %v6691_v1 }
 0x1c9   :  { %v639_v54 = vpop.permute.xlu0 %638 }
 0x1cc   :  { %v5229_v53 = vpop.permute.xlu1 %4338 }
 0x1cd   :  { %v6698_v14 = vunpack.i.h.bf16 %v5229_v53  ;;  %v6701_v46 = vunpack.i.l.bf16 %v5229_v53  ;;  %v5239_v37 = vpop.permute.xlu0 %4333 }
 0x1ce   :  { %v6704_v8 = vunpack.i.h.bf16 %v5239_v37  ;;  %v6705_v1 = vunpack.i.l.bf16 %v5239_v37 }
 0x1cf   :  { %v910_v26 = vmul.f32 %v6698_v14, %v5235_v47  ;;  %v909_v30 = vmul.f32 %v6701_v46, %v5232_v16  ;;  %3805 = vmatpush3.bf16.xpose.msra.mxu0 %v652_v34 }
 0x1d0   :  { %v908_v45 = vmul.f32 %v6704_v8, %v5235_v47  ;;  %v907_v31 = vmul.f32 %v6705_v1, %v5232_v16  ;;  %v5256_v33 = vpop.permute.xlu1 %4348  ;;  %3806 = vmatprep.subr.bf16.mxu0 %v6780_v44 }
 0x1d1   :  { %v6717_v35 = vunpack.i.h.bf16 %v5256_v33  ;;  %v6732_v14 = vunpack.i.l.bf16 %v5256_v33  ;;  %v5261_v20 = vpop.permute.xlu0 %4343  ;;  %v916_v46 = vpack.c.bf16 %v910_v26, %v909_v30  ;;  %v655_v30 = vsel %vm6739_vm5, %v633_v32, 0 }
 0x1d2   :  { %v6710_v34 = vunpack.i.h.bf16 %v5261_v20  ;;  %v6730_v25 = vunpack.i.l.bf16 %v5261_v20  ;;  %v915_v8 = vpack.c.bf16 %v908_v45, %v907_v31 }
 0x1d3   :  { %v914_v1 = vmul.f32 %v6717_v35, %v5235_v47  ;;  %v913_v27 = vmul.f32 %v6732_v14, %v5232_v16  ;;  %963 = vrot.lane.b32.xlu1 %v916_v46, %s4742_s14  ;;  %v658_v46 = vsel %vm6739_vm5, %v635_v38, 0 }
 0x1d4   :  { %v912_v58 = vmul.f32 %v6710_v34, %v5235_v47  ;;  %v911_v26 = vmul.f32 %v6730_v25, %v5232_v16  ;;  %961 = vrot.lane.b32.xlu0 %v915_v8, %s4742_s14  ;;  %v661_v34 = vsel %vm6739_vm5, %v637_v12, 0  ;;  %v667_v8 = vsel %vm6739_vm5, %v641_v55, 0 }
 0x1d5   :  { %v918_v31 = vpack.c.bf16 %v914_v1, %v913_v27  ;;  %v664_v1 = vsel %vm6739_vm5, %v639_v54, 0  ;;  %v955_v27 = vpack.c.bf16 %v5075_v57, %v5067_v17 }
 0x1d6   :  { %v917_v45 = vpack.c.bf16 %v912_v58, %v911_v26  ;;  %v617_v58 = vpack.c.bf16 %v5235_v47, %v5232_v16 }
 0x1d7   :  { %967 = vrot.lane.b32.xlu1 %v918_v31, %s4742_s14  ;;  %3807 = vmatpush3.bf16.xpose.msra.mxu0 %v655_v30  ;;  %v956_v30 = vpack.c.bf16 %v5070_v28, %v5063_v56 }
 0x1d8   :  { %965 = vrot.lane.b32.xlu0 %v917_v45, %s4742_s14  ;;  %3808 = vmatprep.subr.bf16.mxu0 %v6780_v44  ;;  %v239_v45 = vshra.s32 %v4871_v3, 5 }
 0x1df   :  { %3809 = vmatpush3.bf16.xpose.msra.mxu0 %v658_v46  ;;  %v6781_v46 = vshra.s32 %v4869_v2, 5 }
 0x1e0   :  { %3810 = vmatprep.subr.bf16.mxu0 %v6780_v44 }
 0x1e1   :  { %vm240_vm12 = vcmp.eq.s32.totalorder %v6781_v46, %v239_v45 }
 0x1e7   :  { %3811 = vmatpush3.bf16.xpose.msra.mxu0 %v661_v34 }
 0x1e8   :  { %3812 = vmatprep.subr.bf16.mxu0 %v6780_v44 }
 0x1ef   :  { %3813 = vmatpush3.bf16.xpose.msra.mxu0 %v664_v1  ;;  %v6782_v1 = vshra.s32 %v4886_v7, 5 }
 0x1f0   :  { %3814 = vmatprep.subr.bf16.mxu0 %v6780_v44 }
 0x1f1   :  { %vm241_vm13 = vcmp.eq.s32.totalorder %v6782_v1, %v239_v45  ;;  %v6797_v1 = vshra.s32 %v4965_v48, 5 }
 0x1f2   :  { %vm5319_vm1 = vmpackc.low %vm241_vm13, %vm240_vm12 }
 0x1f3   :  { %vm248_vm10 = vcmp.eq.s32.totalorder %v6797_v1, %v239_v45 }
 0x1f7   :  { %3815 = vmatpush3.bf16.xpose.msra.mxu0 %v667_v8  ;;  %v6783_v8 = vshra.s32 %v4896_v11, 5  ;;  %v6790_v11 = vshra.s32 %v4880_v5, 5 }
 0x1f9   :  { %vm242_vm14 = vcmp.eq.s32.totalorder %v6783_v8, %v239_v45  ;;  %vm245_vm4 = vcmp.eq.s32.totalorder %v6790_v11, %v239_v45  ;;  %v6798_v8 = vshra.s32 %v4968_v49, 5  ;;  %v6802_v11 = vshra.s32 %v4951_v42, 5 }
 0x1fa   :  { %v6806_v42 = vshra.s32 %v5006_v61, 5  ;;  %v217_v61 = vand.u32 31, %v4871_v3  ;;  %v6877_v49 = vunpack.i.l.bf16 %v5229_v53 }
 0x1fb   :  { %vm249_vm11 = vcmp.eq.s32.totalorder %v6798_v8, %v239_v45 }
 0x1fc   :  { %vm5373_vm12 = vmpackc.low %vm249_vm11, %vm248_vm10 }
 0x1fe   :  { %3817 = vmatmul.mubr.msk.bf16.vlgmr.msra.gmra.mrb[0].mxu0 %vm6739_vm5, %v617_v58  ;;  %v6784_v58 = vshra.s32 %v4902_v15, 5 }
 0x1ff   :  { %3883 = vmatprep.mubr.msk.bf16.mxu0 %vm6739_vm5, %v955_v27  ;;  %v5992_v27 = vld [vmem:[#allocation10 + $0x8] sm:$0xff] }
 0x200   :  { %vm243_vm15 = vcmp.eq.s32.totalorder %v6784_v58, %v239_v45  ;;  %6875 = vst [vmem:[#allocation39_spill] sm:$0xff] %v5992_v27 }
 0x201   :  { %vm5326_vm2 = vmpackc.low %vm243_vm15, %vm242_vm14  ;;  %vm251_vm14 = vcmp.eq.s32.totalorder %v6802_v11, %v239_v45  ;;  %v216_v11 = vshra.s32 %v4886_v7, 3 }
 0x245   :  { %v964_v38 = vpop.permute.xlu1 %963 }
 0x246   :  { %v962_v32 = vpop.permute.xlu0 %961  ;;  %v979_v55 = vsel %vm6739_vm5, %v964_v38, 0 }
 0x247   :  { %4266 = vmatprep.subr.msk.bf16.mxu0 %vm6739_vm5, %v962_v32  ;;  %v976_v12 = vsel %vm6739_vm5, %v962_v32, 0  ;;  %v6751_v32 = vmov 1.0|1.0  }
 0x248   :  { %3876 = vmatpush3.bf16.xpose.msra.mxu0 %v976_v12  ;;  %4171 = vmatprep.subr.msk.bf16.mxu1 %vm5319_vm1, %v6751_v32  ;;  %v6876_v12 = vsub.s32 0, %v4869_v2 }
 0x249   :  { %4267 = vmatprep.subr.msk.bf16.mxu0 %vm6739_vm5, %v964_v38  ;;  %v968_v26 = vpop.permute.xlu1 %967  ;;  %v6789_v38 = vshra.s32 %v4877_v4, 5  ;;  %4173 = vmatpush3.bf16.msk.msra.mxu1 %vm5319_vm1, %v6751_v32 }
 0x24a   :  { %v966_v54 = vpop.permute.xlu0 %965  ;;  %v985_v31 = vsel %vm6739_vm5, %v968_v26, 0  ;;  %4175 = vmatprep.subr.msk.bf16.mxu1 %vm5326_vm2, %v6751_v32  ;;  %v1947_v15 = vrot.slane %v5992_v27, %v6876_v12 }
 0x24b   :  { %v982_v34 = vsel %vm6739_vm5, %v966_v54, 0  ;;  %vm244_vm3 = vcmp.eq.s32.totalorder %v6789_v38, %v239_v45  ;;  %v6801_v38 = vshra.s32 %v4941_v39, 5  ;;  %v6805_v39 = vshra.s32 %v4995_v59, 5 }
 0x24c   :  { %vm5340_vm6 = vmpackc.low %vm245_vm4, %vm244_vm3  ;;  %vm253_vm4 = vcmp.eq.s32.totalorder %v6806_v42, %v239_v45 }
 0x24d   :  { %4177 = vmatpush3.bf16.msk.msra.mxu1 %vm5326_vm2, %v6751_v32  ;;  %vm250_vm13 = vcmp.eq.s32.totalorder %v6801_v38, %v239_v45  ;;  %vm252_vm3 = vcmp.eq.s32.totalorder %v6805_v39, %v239_v45 }
 0x24e   :  { %4179 = vmatprep.subr.msk.bf16.mxu1 %vm5340_vm6, %v6751_v32  ;;  %vm5384_vm15 = vmpackc.low %vm251_vm14, %vm250_vm13 }
 0x250   :  { %3878 = vmatpush3.bf16.xpose.msra.mxu0 %v979_v55  ;;  %v6793_v55 = vshra.s32 %v4890_v9, 5 }
 0x251   :  { %4268 = vmatprep.subr.msk.bf16.mxu0 %vm6739_vm5, %v966_v54  ;;  %v6794_v54 = vshra.s32 %v4893_v10, 5  ;;  %4181 = vmatpush3.bf16.msk.msra.mxu1 %vm5340_vm6, %v6751_v32 }
 0x252   :  { %vm246_vm7 = vcmp.eq.s32.totalorder %v6793_v55, %v239_v45 }
 0x253   :  { %vm247_vm8 = vcmp.eq.s32.totalorder %v6794_v54, %v239_v45  ;;  %v215_v54 = vshra.s32 %v4869_v2, 3 }
 0x254   :  { %vm5354_vm9 = vmpackc.low %vm247_vm8, %vm246_vm7 }
 0x255   :  { %4183 = vmatprep.subr.msk.bf16.mxu1 %vm5354_vm9, %v6751_v32  ;;  %vm5407_vm7 = vmpackc.low %vm253_vm4, %vm252_vm3  ;;  %vm6740_vm3 = vcmask 523264  }
 0x256   :  { %4185 = vmatpush3.bf16.msk.msra.mxu1 %vm5354_vm9, %v6751_v32 }
 0x257   :  { %4187 = vmatprep.subr.msk.bf16.mxu1 %vm5373_vm12, %v6751_v32 }
 0x258   :  { %3880 = vmatpush3.bf16.xpose.msra.mxu0 %v982_v34 }
 0x259   :  { %4269 = vmatprep.subr.msk.bf16.mxu0 %vm6739_vm5, %v968_v26 }
 0x25a   :  { %4189 = vmatpush3.bf16.msk.msra.mxu1 %vm5373_vm12, %v6751_v32 }
 0x25b   :  { %4191 = vmatprep.subr.msk.bf16.mxu1 %vm5384_vm15, %v6751_v32 }
 0x25e   :  { %4193 = vmatpush3.bf16.msk.msra.mxu1 %vm5384_vm15, %v6751_v32 }
 0x25f   :  { %4195 = vmatprep.subr.msk.bf16.mxu1 %vm5407_vm7, %v6751_v32 }
 0x260   :  { %3882 = vmatpush3.bf16.xpose.msra.mxu0 %v985_v31 }
 0x261   :  { %3921 = vmatprep.subr.bf16.mxu0 %v6780_v44 }
 0x262   :  { %4197 = vmatpush3.bf16.msk.msra.mxu1 %vm5407_vm7, %v6751_v32 }
 0x267   :  { %3884 = vmatmul.mubr.msk.bf16.vlgmr.msra.gmra.mrb[4].mxu0 %vm6739_vm5, %v956_v30 }
 0x268   :  { %3925 = vmatprep.mubr.msk.bf16.mxu0 %vm6737_vm0, %v6780_v44 }
 0x2d1   :  { %v703_v26 = vpop.f32.mrb[0].mxu0 }
 0x2d2   :  { %v3818_v31 = vpop.f32.mrb[1].mxu0  ;;  %710 = vmax.xlane.f32.xlu0 %v703_v26 }
 0x2d3   :  { %v706_v30 = vpop.f32.mrb[2].mxu0  ;;  %v218_v31 = vshra.s32 %v217_v61, 4 }
 0x2d4   :  { %712 = vmax.xlane.f32.xlu1 %v706_v30  ;;  %v3819_v46 = vpop.f32.mrb[3].mxu0 }
 0x2d5   :  { %vm219_vm13 = vcmp.eq.s32.totalorder %v215_v54, %v218_v31  ;;  %vm5477_vm14 = vcmp.eq.s32.totalorder %v216_v11, %v218_v31 }
 0x2d6   :  { %v5493_v11 = vsel %vm219_vm13, 1.0, %v6780_v44 }
 0x2e5   :  { %4358 = vrot.lane.b32.xlu1 %v4972_v50, %s4732_s1 }
 0x2e8   :  { %4353 = vrot.lane.b32.xlu0 %v4930_v36, %s4732_s1 }
 0x2e9   :  { %4368 = vrot.lane.b32.xlu1 %v4954_v43, %s4732_s1  ;;  %v6809_v43 = vshra.s32 %v4978_v51, 5 }
 0x2eb   :  { %vm254_vm8 = vcmp.eq.s32.totalorder %v6809_v43, %v239_v45 }
 0x2ec   :  { %4363 = vrot.lane.b32.xlu0 %v4919_v23, %s4732_s1  ;;  %v6810_v23 = vshra.s32 %v4981_v52, 5 }
 0x2ed   :  { %4378 = vrot.lane.b32.xlu1 %v4997_v60, %s4732_s1 }
 0x2ee   :  { %vm255_vm10 = vcmp.eq.s32.totalorder %v6810_v23, %v239_v45 }
 0x2ef   :  { %vm5425_vm11 = vmpackc.low %vm255_vm10, %vm254_vm8 }
 0x2f0   :  { %4373 = vrot.lane.b32.xlu0 %v5018_v0, %s4732_s1  ;;  %4199 = vmatprep.subr.msk.bf16.mxu1 %vm5425_vm11, %v6751_v32 }
 0x2f1   :  { %4388 = vrot.lane.b32.xlu1 %v5024_v19, %s4732_s1  ;;  %4201 = vmatpush3.bf16.msk.msra.mxu1 %vm5425_vm11, %v6751_v32 }
 0x2f2   :  { %3855 = vmatprep.subr.bf16.mxu1 %v6780_v44 }
 0x2f4   :  { %4383 = vrot.lane.b32.xlu0 %v5039_v24, %s4732_s1 }
 0x33a   :  { %v5440_v50 = vpop.f32.mrb[4].mxu0 }
 0x33b   :  { %v5442_v51 = vpop.f32.mrb[5].mxu0 }
 0x33c   :  { %v5444_v52 = vpop.f32.mrb[6].mxu0 }
 0x33d   :  { %v5446_v59 = vpop.f32.mrb[7].mxu0 }
 0x35f   :  { %v711_v60 = vpop.xlane.xlu0 %710 }
 0x360   :  { %v714_v0 = vsub.f32 %v703_v26, %v711_v60 }
 0x361   :  { %v713_v19 = vpop.xlane.xlu1 %712 }
 0x362   :  { %v716_v24 = vmul.f32 1.442695, %v714_v0  ;;  %v715_v45 = vsub.f32 %v706_v30, %v713_v19 }
 0x363   :  { %v5449_v55 = vpop.permute.xlu0 %4353 }
 0x364   :  { %4436 = vpow2.f32 %v716_v24  ;;  %v718_v46 = vmul.f32 1.442695, %v715_v45  ;;  %v6711_v1 = vunpack.i.h.bf16 %v5449_v55  ;;  %v6712_v8 = vunpack.i.l.bf16 %v5449_v55 }
 0x365   :  { %v5454_v38 = vpop.permute.xlu1 %4358 }
 0x366   :  { %4438 = vpow2.f32 %v718_v46  ;;  %v6715_v26 = vunpack.i.h.bf16 %v5454_v38  ;;  %v6716_v30 = vunpack.i.l.bf16 %v5454_v38  ;;  %v593_v39 = vmul.f32 %v6712_v8, %v5067_v17 }
 0x367   :  { %v5462_v42 = vpop.permute.xlu0 %4363  ;;  %v594_v43 = vmul.f32 %v6711_v1, %v5075_v57 }
 0x368   :  { %v6713_v23 = vunpack.i.h.bf16 %v5462_v42  ;;  %v6714_v7 = vunpack.i.l.bf16 %v5462_v42  ;;  %v595_v60 = vmul.f32 %v6716_v30, %v5063_v56  ;;  %v596_v61 = vmul.f32 %v6715_v26, %v5070_v28 }
 0x369   :  { %v5475_v0 = vpop.permute.xlu1 %4368  ;;  %v609_v19 = vpack.c.bf16 %v594_v43, %v593_v39 }
 0x36a   :  { %v6719_v45 = vunpack.i.h.bf16 %v5475_v0  ;;  %v6718_v54 = vunpack.i.l.bf16 %v5475_v0  ;;  %v610_v46 = vpack.c.bf16 %v596_v61, %v595_v60  ;;  %v597_v1 = vmul.f32 %v6714_v7, %v5067_v17 }
 0x36b   :  { %810 = vrot.lane.b32.xlu0 %v609_v19, %s4732_s1  ;;  %v5487_v8 = vpop.permute.xlu0 %4373  ;;  %v598_v31 = vmul.f32 %v6713_v23, %v5075_v57  ;;  %v5509_v7 = vsel %vm5477_vm14, 1.0, %v6780_v44 }
 0x36c   :  { %v6722_v39 = vunpack.i.h.bf16 %v5487_v8  ;;  %v6723_v43 = vunpack.i.l.bf16 %v5487_v8  ;;  %812 = vrot.lane.b32.xlu1 %v610_v46, %s4732_s1  ;;  %v599_v60 = vmul.f32 %v6718_v54, %v5063_v56  ;;  %v600_v61 = vmul.f32 %v6719_v45, %v5070_v28  ;;  %6815 = vst [vmem:[#allocation26_spill] sm:$0xff] %v5509_v7 }
 0x36d   :  { %v5504_v19 = vpop.permute.xlu1 %4378  ;;  %v611_v23 = vpack.c.bf16 %v598_v31, %v597_v1 }
 0x36e   :  { %v4437_v26 = vpop.eup %4436  ;;  %v6720_v30 = vunpack.i.h.bf16 %v5504_v19  ;;  %v6721_v46 = vunpack.i.l.bf16 %v5504_v19  ;;  %v612_v35 = vpack.c.bf16 %v600_v61, %v599_v60  ;;  %v601_v54 = vmul.f32 %v6723_v43, %v5067_v17 }
 0x36f   :  { %814 = vrot.lane.b32.xlu0 %v611_v23, %s4732_s1  ;;  %v5518_v45 = vmul.f32 %v4437_v26, %v5493_v11  ;;  %v602_v1 = vmul.f32 %v6722_v39, %v5075_v57 }
 0x370   :  { %v4439_v24 = vpop.eup %4438  ;;  %816 = vrot.lane.b32.xlu1 %v612_v35, %s4732_s1  ;;  %v603_v31 = vmul.f32 %v6721_v46, %v5063_v56  ;;  %v604_v60 = vmul.f32 %v6720_v30, %v5070_v28  ;;  %v1043_v35 = vsel %vm6740_vm3, %v5440_v50, -inf }
 0x371   :  { %3852 = vmatprep.mubr.f32.mxu1 %v5518_v45  ;;  %v5532_v26 = vmul.f32 %v4439_v24, %v5509_v7  ;;  %v613_v23 = vpack.c.bf16 %v602_v1, %v601_v54  ;;  %v1037_v24 = vsel %vm6740_vm3, %v5442_v51, -inf  ;;  %v1046_v54 = vsel %vm6740_vm3, %v5444_v52, -inf }
 0x372   :  { %v614_v61 = vpack.c.bf16 %v604_v60, %v603_v31  ;;  %v1040_v1 = vsel %vm6740_vm3, %v5446_v59, -inf  ;;  %v5547_v31 = vpop.permute.xlu0 %4383  ;;  %v5549_v60 = vpop.permute.xlu1 %4388 }
 0x373   :  { %3853 = vmatmul.mubr.f32.vlgmr.msra.gmra.mrb[8].mxu1 %v5532_v26 }
 0x374   :  { %818 = vrot.lane.b32.xlu1 %v613_v23, %s4732_s1  ;;  %820 = vrot.lane.b32.xlu0 %v614_v61, %s4732_s1  ;;  %v6726_v23 = vunpack.i.h.bf16 %v5547_v31  ;;  %v6727_v61 = vunpack.i.l.bf16 %v5547_v31 }
 0x375   :  { %3871 = vmatprep.mubr.msk.bf16.mxu1 %vm6737_vm0, %v6780_v44 }
 0x393   :  { %1044 = vmax.xlane.f32.xlu0 %v1043_v35  ;;  %v6724_v35 = vunpack.i.h.bf16 %v5549_v60 }
 0x395   :  { %v608_v46 = vmul.f32 %v6724_v35, %v5070_v28 }
 0x397   :  { %1038 = vmax.xlane.f32.xlu0 %v1037_v24  ;;  %v6725_v24 = vunpack.i.l.bf16 %v5549_v60 }
 0x398   :  { %1047 = vmax.xlane.f32.xlu1 %v1046_v54  ;;  %v605_v54 = vmul.f32 %v6727_v61, %v5067_v17 }
 0x399   :  { %v607_v30 = vmul.f32 %v6725_v24, %v5063_v56 }
 0x39b   :  { %v616_v43 = vpack.c.bf16 %v608_v46, %v607_v30  ;;  %v5590_v46 = vshra.s32 %v4871_v3, 4 }
 0x39c   :  { %1041 = vmax.xlane.f32.xlu1 %v1040_v1  ;;  %v606_v1 = vmul.f32 %v6726_v23, %v5075_v57 }
 0x39d   :  { %vm289_vm4 = vcmp.eq.s32.totalorder %v5120_v29, %v5590_v46  ;;  %vm290_vm8 = vcmp.eq.s32.totalorder %v5123_v22, %v5590_v46  ;;  %vm291_vm14 = vcmp.eq.s32.totalorder %v5107_v21, %v5590_v46 }
 0x39e   :  { %v615_v39 = vpack.c.bf16 %v606_v1, %v605_v54  ;;  %vm5609_vm10 = vmpackc.low %vm290_vm8, %vm289_vm4  ;;  %vm292_vm4 = vcmp.eq.s32.totalorder %v5110_v63, %v5590_v46 }
 0x39f   :  { %vm5675_vm8 = vmpackc.low %vm292_vm4, %vm291_vm14 }
 0x3ad   :  { %822 = vrot.lane.b32.xlu1 %v615_v39, %s4732_s1  ;;  %824 = vrot.lane.b32.xlu0 %v616_v43, %s4732_s1 }
 0x3b1   :  { %4393 = vrot.lane.b32.xlu0 %v5203_v13, %s4732_s1  ;;  %4398 = vrot.lane.b32.xlu1 %v5200_v62, %s4732_s1 }
 0x3b5   :  { %4403 = vrot.lane.b32.xlu0 %v5215_v18, %s4732_s1  ;;  %4408 = vrot.lane.b32.xlu1 %v5211_v6, %s4732_s1 }
 0x3dd   :  { %v811_v57 = vpop.permute.xlu0 %810 }
 0x3de   :  { %3856 = vmatpush3.bf16.msra.mxu1 %v811_v57  ;;  %v813_v56 = vpop.permute.xlu1 %812 }
 0x3df   :  { %3857 = vmatprep.subr.bf16.mxu1 %v6780_v44 }
 0x3e1   :  { %v815_v17 = vpop.permute.xlu0 %814 }
 0x3e2   :  { %3858 = vmatpush3.bf16.msra.mxu1 %v813_v56  ;;  %v817_v28 = vpop.permute.xlu1 %816 }
 0x3e3   :  { %3859 = vmatprep.subr.bf16.mxu1 %v6780_v44 }
 0x3e6   :  { %3860 = vmatpush3.bf16.msra.mxu1 %v815_v17  ;;  %v819_v62 = vpop.permute.xlu1 %818  ;;  %v821_v13 = vpop.permute.xlu0 %820 }
 0x3e7   :  { %3861 = vmatprep.subr.bf16.mxu1 %v6780_v44 }
 0x3ea   :  { %3862 = vmatpush3.bf16.msra.mxu1 %v817_v28 }
 0x3eb   :  { %3863 = vmatprep.subr.bf16.mxu1 %v6780_v44 }
 0x3ee   :  { %3864 = vmatpush3.bf16.msra.mxu1 %v819_v62 }
 0x3ef   :  { %3865 = vmatprep.subr.bf16.mxu1 %v6780_v44 }
 0x3f2   :  { %3866 = vmatpush3.bf16.msra.mxu1 %v821_v13 }
 0x3f3   :  { %3867 = vmatprep.subr.bf16.mxu1 %v6780_v44 }
 0x420   :  { %v5583_v6 = vpop.xlane.xlu0 %1044 }
 0x424   :  { %v1039_v18 = vpop.xlane.xlu0 %1038 }
 0x425   :  { %v5585_v30 = vpop.xlane.xlu1 %1047 }
 0x428   :  { %v825_v39 = vpop.permute.xlu0 %824 }
 0x429   :  { %v5587_v43 = vpop.xlane.xlu1 %1041 }
 0x42c   :  { %v5592_v54 = vpop.permute.xlu0 %4393 }
 0x42d   :  { %v6729_v1 = vunpack.i.h.bf16 %v5592_v54  ;;  %v6728_v57 = vunpack.i.l.bf16 %v5592_v54  ;;  %v823_v56 = vpop.permute.xlu1 %822 }
 0x42e   :  { %3868 = vmatpush3.bf16.msra.mxu1 %v823_v56 }
 0x42f   :  { %3869 = vmatprep.subr.bf16.mxu1 %v6780_v44  ;;  %v943_v17 = vmul.f32 %v6728_v57, %v5232_v16  ;;  %v944_v28 = vmul.f32 %v6729_v1, %v5235_v47 }
 0x430   :  { %v5607_v62 = vpop.permute.xlu0 %4403 }
 0x431   :  { %v6733_v35 = vunpack.i.h.bf16 %v5607_v62  ;;  %v6731_v56 = vunpack.i.l.bf16 %v5607_v62  ;;  %v5615_v24 = vpop.permute.xlu1 %4398  ;;  %v951_v23 = vpack.c.bf16 %v944_v28, %v943_v17 }
 0x432   :  { %v6735_v61 = vunpack.i.h.bf16 %v5615_v24  ;;  %v6750_v57 = vunpack.i.l.bf16 %v5615_v24  ;;  %3870 = vmatpush3.bf16.msra.mxu1 %v825_v39  ;;  %v5635_v39 = vld [vmem:[#allocation7 + $0x8] ss:$16 sps:$4 sm:$0xff]  }
 0x433   :  { %1176 = vrot.lane.b32.xlu0 %v951_v23, %s4732_s1  ;;  %v947_v1 = vmul.f32 %v6731_v56, %v5232_v16  ;;  %v948_v25 = vmul.f32 %v6733_v35, %v5235_v47  ;;  %4203 = vmatprep.subr.msk.bf16.mxu1 %vm5609_vm10, %v6751_v32 }
 0x434   :  { %v945_v17 = vmul.f32 %v6750_v57, %v5232_v16  ;;  %v946_v23 = vmul.f32 %v6735_v61, %v5235_v47  ;;  %3922 = vmatpush3.bf16.msra.mxu0 %v5635_v39 }
 0x435   :  { %v5637_v28 = vpop.permute.xlu1 %4408  ;;  %v953_v56 = vpack.c.bf16 %v948_v25, %v947_v1  ;;  %3923 = vmatprep.subr.bf16.mxu0 %v6780_v44 }
 0x436   :  { %v6745_v14 = vunpack.i.h.bf16 %v5637_v28  ;;  %v6736_v35 = vunpack.i.l.bf16 %v5637_v28  ;;  %v952_v7 = vpack.c.bf16 %v946_v23, %v945_v17 }
 0x437   :  { %1180 = vrot.lane.b32.xlu0 %v953_v56, %s4732_s1  ;;  %v1049_v56 = vsub.f32 %v5442_v51, %v1039_v18 }
 0x438   :  { %1178 = vrot.lane.b32.xlu1 %v952_v7, %s4732_s1  ;;  %v949_v61 = vmul.f32 %v6736_v35, %v5232_v16  ;;  %v950_v25 = vmul.f32 %v6745_v14, %v5235_v47  ;;  %v225_v16 = vand.u32 15, %v4871_v3  ;;  %v1050_v47 = vsub.f32 %v5446_v59, %v5587_v43 }
 0x439   :  { %v1053_v17 = vmul.f32 1.442695, %v1049_v56  ;;  %v1052_v3 = vsub.f32 %v5444_v52, %v5585_v30  ;;  %v6822_v43 = vshra.s32 %v4880_v5, 4  ;;  %v6826_v5 = vshra.s32 %v4890_v9, 4 }
 0x43a   :  { %v954_v1 = vpack.c.bf16 %v950_v25, %v949_v61  ;;  %v226_v35 = vshra.s32 %v225_v16, 3  ;;  %v1051_v25 = vsub.f32 %v5440_v50, %v5583_v6  ;;  %v6821_v6 = vshra.s32 %v4877_v4, 4 }
 0x43b   :  { %1354 = vrot.lane.b32.xlu0 %v5635_v39, %s4742_s14  ;;  %vm294_vm0 = vcmp.eq.s32.totalorder %v6822_v43, %v5590_v46  ;;  %v1059_v52 = vmul.f32 1.442695, %v1052_v3  ;;  %v6823_v4 = vmov 0  ;;  %vm295_vm4 = vcmp.eq.s32.totalorder %v6826_v5, %v5590_v46 }
 0x43c   :  { %1182 = vrot.lane.b32.xlu1 %v954_v1, %s4732_s1  ;;  %vm227_vm13 = vcmp.eq.s32.totalorder %v5120_v29, %v226_v35  ;;  %v1055_v29 = vmul.f32 1.442695, %v1050_v47  ;;  %v1057_v50 = vmul.f32 1.442695, %v1051_v25  ;;  %v6827_v30 = vshra.s32 %v4893_v10, 4 }
 0x43e   :  { %vm296_vm5 = vcmp.eq.s32.totalorder %v6827_v30, %v5590_v46 }
 0x446   :  { %v3854_v23 = vpop.f32.mrb[8].mxu1 }
 0x447   :  { %4440 = vrcp.f32 %v3854_v23  ;;  %v788_v7 = vpop.f32.mrb[9].mxu1  ;;  %v6828_v23 = vmov 0 }
 0x448   :  { %4442 = vrcp.f32 %v788_v7 }
 0x449   :  { %4444 = vpow2.f32 %v1053_v17  ;;  %v5664_v17 = vsel %vm227_vm13, 1.0, %v6780_v44  ;;  %vm293_vm13 = vcmp.eq.s32.totalorder %v6821_v6, %v5590_v46 }
 0x44a   :  { %4446 = vpow2.f32 %v1055_v29  ;;  %vm5693_vm14 = vmpackc.low %vm294_vm0, %vm293_vm13  ;;  %vm228_vm13 = vcmp.eq.s32.totalorder %v5123_v22, %v226_v35 }
 0x44b   :  { %4448 = vpow2.f32 %v1057_v50  ;;  %v6824_v4 = vsel %vm5693_vm14, 4294967295, %v6823_v4  ;;  %vm5709_vm0 = vmpackc.low %vm296_vm5, %vm295_vm4  ;;  %v5722_v10 = vsel %vm228_vm13, 1.0, %v6780_v44  ;;  %vm230_vm5 = vcmp.eq.s32.totalorder %v5110_v63, %v226_v35 }
 0x44c   :  { %6825 = vst [vmem:[#allocation28_spill] sm:$0xff] %v6824_v4  ;;  %4450 = vpow2.f32 %v1059_v52  ;;  %v6829_v23 = vsel %vm5709_vm0, 4294967295, %v6828_v23  ;;  %6831 = vst [vmem:[#allocation30_spill] sm:$0xff] %v5722_v10  ;;  %v5734_v47 = vsel %vm230_vm5, 1.0, %v6780_v44  ;;  %vm6834_vm4 = vcmask 523264  }
 0x44d   :  { %6830 = vst [vmem:[#allocation29_spill] sm:$0xff] %v6829_v23  ;;  %6833 = vst [vmem:[#allocation32_spill] sm:$0xff] %v5734_v47  ;;  %vm6837_vm5 = vcmask 261120  }
 0x44e   :  { %vm6835_vm13 = vmmov %vm6834_vm4 }
 0x451   :  { %v4441_v61 = vpop.eup %4440 }
 0x452   :  { %v4443_v1 = vpop.eup %4442  ;;  %v800_v51 = vmul.f32 %v4441_v61, %v5532_v26 }
 0x453   :  { %v4445_v18 = vpop.eup %4444  ;;  %v799_v56 = vmul.f32 %v4443_v1, %v5518_v45  ;;  %v6818_v45 = vmov 0  ;;  %v5740_v1 = vld [vmem:[#allocation7 + $0x28] ss:$16 sps:$4 sm:$0xff]  }
 0x454   :  { %v5673_v26 = vmul.f32 %v4445_v18, %v5664_v17  ;;  %v6819_v45 = vsel %vm5675_vm8, 4294967295, %v6818_v45  ;;  %v4447_v9 = vpop.eup %4446  ;;  %3924 = vmatpush3.bf16.msra.mxu0 %v5740_v1  ;;  %1356 = vrot.lane.b32.xlu1 %v5740_v1, %s4742_s14  ;;  %v6968_v13 = vld [vmem:[#allocation29_spill] sm:$0xff] }
 0x455   :  { %v801_v59 = vpack.c.bf16 %v800_v51, %v799_v56  ;;  %6820 = vst [vmem:[#allocation27_spill] sm:$0xff] %v6819_v45  ;;  %v4449_v46 = vpop.eup %4448  ;;  %v1062_v22 = vmul.f32 %v4447_v9, %v5722_v10  ;;  %3937 = vmatprep.subr.bf16.mxu0 %v6780_v44 }
 0x457   :  { %3872 = vmatmul.mubr.bf16.vlgmr.msra.gmra.mrb[12].mxu1 %v801_v59 }
 0x458   :  { %4205 = vmatpush3.bf16.msk.msra.mxu1 %vm5609_vm10, %v6751_v32  ;;  %3903 = vmatprep.mubr.msk.f32.mxu1 %vm6740_vm3, %v5673_v26  ;;  %vm229_vm3 = vcmp.eq.s32.totalorder %v5107_v21, %v226_v35  ;;  %v4451_v21 = vpop.eup %4450 }
 0x459   :  { %4207 = vmatprep.subr.msk.bf16.mxu1 %vm5675_vm8, %v6751_v32  ;;  %v5725_v7 = vsel %vm229_vm3, 1.0, %v6780_v44  ;;  %v1064_v61 = vmul.f32 %v4451_v21, %v5734_v47  ;;  %vm6836_vm3 = vmmov %vm6834_vm4 }
 0x45a   :  { %6832 = vst [vmem:[#allocation31_spill] sm:$0xff] %v5725_v7  ;;  %v1063_v16 = vmul.f32 %v4449_v46, %v5725_v7 }
 0x45c   :  { %4209 = vmatpush3.bf16.msk.msra.mxu1 %vm5675_vm8, %v6751_v32 }
 0x45d   :  { %4211 = vmatprep.subr.msk.bf16.mxu1 %vm5693_vm14, %v6751_v32 }
 0x460   :  { %4213 = vmatpush3.bf16.msk.msra.mxu1 %vm5693_vm14, %v6751_v32 }
 0x461   :  { %4215 = vmatprep.subr.msk.bf16.mxu1 %vm5709_vm0, %v6751_v32 }
 0x464   :  { %4217 = vmatpush3.bf16.msk.msra.mxu1 %vm5709_vm0, %v6751_v32 }
 0x467   :  { %3904 = vmatmul.mubr.msk.f32.vlgmr.msra.gmra.mrb[10].mxu1 %vm6834_vm4, %v1062_v22  ;;  %vm6838_vm4 = vmmov 0  }
 0x468   :  { %3906 = vmatprep.mubr.msk.f32.mxu1 %vm6835_vm13, %v1063_v16  ;;  %vm6839_vm13 = vmmov %vm6836_vm3 }
 0x46b   :  { %3907 = vmatmul.mubr.msk.f32.gmra.mrb[16].mxu1 %vm6836_vm3, %v1064_v61 }
 0x4a5   :  { %v1177_v63 = vpop.permute.xlu0 %1176 }
 0x4a6   :  { %3909 = vmatprep.subr.bf16.mxu1 %v1177_v63 }
 0x4a7   :  { %3910 = vmatpush3.bf16.msra.mxu1 %v1177_v63 }
 0x4a9   :  { %v1181_v25 = vpop.permute.xlu0 %1180 }
 0x4aa   :  { %v1179_v35 = vpop.permute.xlu1 %1178 }
 0x4ab   :  { %3911 = vmatprep.subr.bf16.mxu1 %v1179_v35 }
 0x4ac   :  { %3912 = vmatpush3.bf16.msra.mxu1 %v1179_v35 }
 0x4ad   :  { %3913 = vmatprep.subr.bf16.mxu1 %v1181_v25 }
 0x4ae   :  { %v1183_v51 = vpop.permute.xlu1 %1182 }
 0x4b0   :  { %3914 = vmatpush3.bf16.msra.mxu1 %v1181_v25 }
 0x4b1   :  { %3915 = vmatprep.subr.bf16.mxu1 %v1183_v51 }
 0x4b4   :  { %3916 = vmatpush3.bf16.msra.mxu1 %v1183_v51 }
 0x52a   :  { %v868_v18 = vpop.f32.mrb[12].mxu1 }
 0x52b   :  { %v3873_v56 = vpop.f32.mrb[13].mxu1 }
 0x52c   :  { %v871_v3 = vpop.f32.mrb[14].mxu1  ;;  %v1355_v56 = vpop.permute.xlu0 %1354 }
 0x52d   :  { %v1243_v29 = vpack.c.bf16 %v871_v3, %v868_v18  ;;  %v3874_v50 = vpop.f32.mrb[15].mxu1  ;;  %3929 = vmatprep.subr.bf16.mxu1 %v1355_v56  ;;  %v1357_v3 = vpop.permute.xlu1 %1356 }
 0x52f   :  { %3926 = vmatmul.mubr.msk.bf16.vlgmr.msra.gmra.mrb[8].mxu0 %vm6837_vm5, %v1243_v29 }
 0x530   :  { %3941 = vmatprep.mubr.msk.bf16.mxu0 %vm6838_vm4, %v6780_v44 }
 0x53a   :  { %v3905_v59 = vpop.f32.mrb[10].mxu1 }
 0x53b   :  { %4452 = vrcp.f32 %v3905_v59  ;;  %v1143_v6 = vpop.f32.mrb[11].mxu1 }
 0x53c   :  { %4454 = vrcp.f32 %v1143_v6 }
 0x53e   :  { %v3908_v43 = vpop.f32.mrb[16].mxu1 }
 0x53f   :  { %4456 = vrcp.f32 %v3908_v43  ;;  %v1153_v52 = vpop.f32.mrb[17].mxu1 }
 0x540   :  { %4458 = vrcp.f32 %v1153_v52  ;;  %v4557_v52 = vld [vmem:[#allocation2] sm:$0xff] }
 0x545   :  { %v4453_v5 = vpop.eup %4452 }
 0x546   :  { %v4455_v30 = vpop.eup %4454  ;;  %v1167_v9 = vmul.f32 %v4453_v5, %v1062_v22  ;;  %v5754_v22 = vld [vmem:[#allocation10] sm:$0xff] }
 0x547   :  { %v1166_v46 = vmul.f32 %v4455_v30, %v5673_v26  ;;  %v6744_v26 = vsub.s32 2, %v4869_v2 }
 0x549   :  { %v4457_v21 = vpop.eup %4456  ;;  %v1170_v63 = vpack.c.bf16 %v1167_v9, %v1166_v46  ;;  %v4558_v9 = vld [vmem:[#allocation2 + $0x8] sm:$0xff] }
 0x54a   :  { %v4459_v35 = vpop.eup %4458  ;;  %v1169_v25 = vmul.f32 %v4457_v21, %v1064_v61 }
 0x54b   :  { %v1168_v51 = vmul.f32 %v4459_v35, %v1063_v16  ;;  %3917 = vmatprep.mubr.msk.bf16.mxu1 %vm6839_vm13, %v1170_v63  ;;  %v5759_v16 = vrot.slane %v5754_v22, %v6744_v26  ;;  %vm6840_vm13 = vmmov %vm6837_vm5 }
 0x54d   :  { %v1171_v18 = vpack.c.bf16 %v1169_v25, %v1168_v51 }
 0x54f   :  { %3918 = vmatmul.mubr.msk.bf16.vlgmr.msra.gmra.mrb[20].mxu1 %vm6836_vm3, %v1171_v18  ;;  %vm6841_vm3 = vmmov %vm6837_vm5 }
 0x550   :  { %3930 = vmatpush3.bf16.msra.mxu1 %v1355_v56  ;;  %vm6842_vm0 = vmmov %vm6841_vm3 }
 0x551   :  { %3931 = vmatprep.subr.bf16.mxu1 %v1357_v3  ;;  %vm6846_vm14 = vmmov %vm6842_vm0 }
 0x554   :  { %3932 = vmatpush3.bf16.msra.mxu1 %v1357_v3  ;;  %v6743_v3 = vsub.s32 3, %v4869_v2 }
 0x555   :  { %3945 = vmatprep.subr.bf16.mxu1 %v6780_v44 }
 0x602   :  { %v1301_v61 = vpop.f32.mrb[8].mxu0 }
 0x603   :  { %v1302_v29 = vadd.f32 %v1301_v61, %v5759_v16  ;;  %v3927_v50 = vpop.f32.mrb[9].mxu0 }
 0x604   :  { %v1304_v59 = vpop.f32.mrb[10].mxu0  ;;  %v5773_v50 = vrot.slane %v5754_v22, %v6743_v3  ;;  %v4561_v3 = vld [vmem:[#allocation5 + $0x8] sm:$0xff] }
 0x605   :  { %v1305_v6 = vadd.f32 %v1304_v59, %v5759_v16  ;;  %v3928_v43 = vpop.f32.mrb[11].mxu0  ;;  %v1308_v5 = vadd.f32 %v4557_v52, %v1302_v29 }
 0x607   :  { %v1310_v30 = vsel %vm6837_vm5, %v1308_v5, 0.0  ;;  %v1309_v46 = vadd.f32 %v4558_v9, %v1305_v6  ;;  %vm6843_vm5 = vmmov %vm6842_vm0 }
 0x608   :  { %1311 = vadd.xlane.f32.xlu0 %v1310_v30 }
 0x609   :  { %v1313_v21 = vsel %vm6840_vm13, %v1309_v46, 0.0  ;;  %vm6844_vm13 = vmmov %vm6842_vm0 }
 0x60a   :  { %1314 = vadd.xlane.f32.xlu1 %v1313_v21 }
 0x622   :  { %v3919_v63 = vpop.f32.mrb[20].mxu1 }
 0x623   :  { %v1228_v35 = vpop.f32.mrb[21].mxu1 }
 0x624   :  { %v3920_v25 = vpop.f32.mrb[22].mxu1 }
 0x625   :  { %v1349_v51 = vpack.c.bf16 %v3920_v25, %v3919_v63  ;;  %v1231_v18 = vpop.f32.mrb[23].mxu1 }
 0x626   :  { %v1348_v56 = vpack.c.bf16 %v1231_v18, %v1228_v35  ;;  %v4559_v35 = vld [vmem:[#allocation5 + $0x10] sm:$0xff]  ;;  %v4560_v18 = vld [vmem:[#allocation5] sm:$0xff] }
 0x628   :  { %3933 = vmatprep.mubr.msk.bf16.mxu1 %vm6841_vm3, %v1348_v56  ;;  %vm6845_vm3 = vmmov %vm6842_vm0 }
 0x629   :  { %3934 = vmatmul.mubr.msk.bf16.vlgmr.msra.gmra.mrb[24].mxu1 %vm6842_vm0, %v1349_v51 }
 0x62a   :  { %3953 = vmatprep.mubr.msk.bf16.mxu1 %vm6838_vm4, %v6780_v44 }
 0x695   :  { %v1312_v61 = vpop.xlane.xlu0 %1311 }
 0x696   :  { %v1317_v29 = vmul.f32 0.03125, %v1312_v61 }
 0x697   :  { %v1315_v21 = vpop.xlane.xlu1 %1314 }
 0x698   :  { %v5775_v6 = vsub.f32 %v1308_v5, %v1317_v29  ;;  %v1318_v29 = vmul.f32 0.03125, %v1315_v21 }
 0x69a   :  { %v1321_v5 = vmul.f32 %v5775_v6, %v5775_v6 }
 0x6fc   :  { %v3935_v59 = vpop.f32.mrb[24].mxu1 }
 0x6fd   :  { %v1409_v43 = vadd.f32 %v3935_v59, %v5773_v50  ;;  %v1400_v52 = vpop.f32.mrb[25].mxu1 }
 0x6fe   :  { %v1401_v30 = vadd.f32 %v1400_v52, %v5773_v50  ;;  %v3936_v9 = vpop.f32.mrb[26].mxu1 }
 0x6ff   :  { %v1403_v63 = vpop.f32.mrb[27].mxu1  ;;  %v1417_v25 = vadd.f32 %v4559_v35, %v1409_v43  ;;  %v1412_v59 = vadd.f32 %v3936_v9, %v5773_v50  ;;  %v1323_v43 = vsel %vm6844_vm13, %v1321_v5, 0.0  ;;  %v1320_v35 = vsub.f32 %v1309_v46, %v1318_v29  ;;  %vm6849_vm13 = vmmov %vm6842_vm0 }
 0x700   :  { %v1404_v51 = vadd.f32 %v1403_v63, %v5773_v50  ;;  %v1415_v56 = vadd.f32 %v4560_v18, %v1401_v30  ;;  %v4562_v63 = vld [vmem:[#allocation5 + $0x18] sm:$0xff] }
 0x701   :  { %v1425_v61 = vsel %vm6842_vm0, %v1417_v25, 0.0  ;;  %v1418_v18 = vadd.f32 %v4562_v63, %v1412_v59  ;;  %v1322_v21 = vmul.f32 %v1320_v35, %v1320_v35 }
 0x702   :  { %1426 = vadd.xlane.f32.xlu1 %v1425_v61  ;;  %v1419_v52 = vsel %vm6843_vm5, %v1415_v56, 0.0  ;;  %v1416_v26 = vadd.f32 %v4561_v3, %v1404_v51  ;;  %vm6848_vm5 = vmmov %vm6842_vm0 }
 0x703   :  { %1420 = vadd.xlane.f32.xlu0 %v1419_v52  ;;  %v1428_v14 = vsel %vm6842_vm0, %v1418_v18, 0.0  ;;  %v1326_v9 = vsel %vm6846_vm14, %v1322_v21, 0.0  ;;  %vm6847_vm14 = vmmov %vm6842_vm0 }
 0x704   :  { %v1422_v30 = vsel %vm6845_vm3, %v1416_v26, 0.0  ;;  %vm6850_vm3 = vmmov %vm6842_vm0 }
 0x706   :  { %1324 = vadd.xlane.f32.xlu1 %v1323_v43 }
 0x707   :  { %1423 = vadd.xlane.f32.xlu0 %v1422_v30 }
 0x70b   :  { %1429 = vadd.xlane.f32.xlu0 %v1428_v14 }
 0x70f   :  { %1327 = vadd.xlane.f32.xlu0 %v1326_v9 }
 0x717   :  { %1491 = vrot.lane.b32.xlu1 %v5635_v39, %s4732_s1 }
 0x71b   :  { %1343 = vrot.lane.b32.xlu1 %v5759_v16, %s4732_s1 }
 0x71f   :  { %1493 = vrot.lane.b32.xlu1 %v5740_v1, %s4732_s1 }
 0x725   :  { %1338 = vrot.lane.b32.xlu0 %v5759_v16, %s4742_s14 }
 0x78f   :  { %v1427_v46 = vpop.xlane.xlu1 %1426 }
 0x790   :  { %v1433_v3 = vmul.f32 0.03125, %v1427_v46  ;;  %v1421_v51 = vpop.xlane.xlu0 %1420 }
 0x791   :  { %v1431_v61 = vmul.f32 0.03125, %v1421_v51 }
 0x792   :  { %v5797_v14 = vsub.f32 %v1417_v25, %v1433_v3 }
 0x793   :  { %v5799_v5 = vsub.f32 %v1415_v56, %v1431_v61  ;;  %v1325_v29 = vpop.xlane.xlu1 %1324 }
 0x794   :  { %v1329_v59 = vmul.f32 0.03125, %v1325_v29  ;;  %v1424_v39 = vpop.xlane.xlu0 %1423  ;;  %v1441_v52 = vmul.f32 %v5797_v14, %v5797_v14 }
 0x795   :  { %v1439_v1 = vmul.f32 %v5799_v5, %v5799_v5  ;;  %v1432_v30 = vmul.f32 0.03125, %v1424_v39 }
 0x796   :  { %v1449_v43 = vsel %vm6847_vm14, %v1441_v52, 0.0  ;;  %v1331_v16 = vadd.f32 1e-12, %v1329_v59  ;;  %vm6851_vm14 = vmmov %vm6842_vm0 }
 0x797   :  { %1450 = vadd.xlane.f32.xlu1 %v1449_v43  ;;  %v1492_v63 = vpop.permute.xlu1 %1491  ;;  %v1443_v56 = vsel %vm6848_vm5, %v1439_v1, 0.0  ;;  %v5808_v9 = vsub.f32 %v1416_v26, %v1432_v30  ;;  %vm6852_vm5 = vmmov %vm6842_vm0 }
 0x798   :  { %v1430_v21 = vpop.xlane.xlu0 %1429  ;;  %3938 = vmatpush3.bf16.msra.mxu0 %v1492_v63  ;;  %4460 = vrsqrt.f32 %v1331_v16 }
 0x799   :  { %v1434_v25 = vmul.f32 0.03125, %v1430_v21  ;;  %3939 = vmatprep.subr.bf16.mxu0 %v6780_v44  ;;  %v1440_v52 = vmul.f32 %v5808_v9, %v5808_v9 }
 0x79b   :  { %v5810_v46 = vsub.f32 %v1418_v18, %v1434_v25  ;;  %1444 = vadd.xlane.f32.xlu1 %v1443_v56  ;;  %v1344_v3 = vpop.permute.xlu1 %1343  ;;  %v1446_v26 = vsel %vm6850_vm3, %v1440_v52, 0.0  ;;  %v4423_v52 = vld [vmem:[#allocation8 + $0x18] sm:$0xff]  }
 0x79c   :  { %v1328_v51 = vpop.xlane.xlu0 %1327 }
 0x79d   :  { %v1330_v61 = vmul.f32 0.03125, %v1328_v51  ;;  %v1442_v29 = vmul.f32 %v5810_v46, %v5810_v46 }
 0x79f   :  { %v1332_v59 = vadd.f32 1e-12, %v1330_v61  ;;  %v1452_v39 = vsel %vm6849_vm13, %v1442_v29, 0.0  ;;  %v1494_v43 = vpop.permute.xlu1 %1493  ;;  %v4420_v29 = vld [vmem:[#allocation8] sm:$0xff]   ;;  %vm6853_vm13 = vcmask 523264  }
 0x7a0   :  { %1453 = vadd.xlane.f32.xlu0 %v1452_v39  ;;  %3940 = vmatpush3.bf16.msra.mxu0 %v1494_v43  ;;  %v1339_v16 = vpop.permute.xlu0 %1338  ;;  %v4422_v39 = vld [vmem:[#allocation8 + $0x10] sm:$0xff]   ;;  %vm6854_vm3 = vmmov %vm6853_vm13 }
 0x7a1   :  { %4462 = vrsqrt.f32 %v1332_v59  ;;  %v4421_v59 = vld [vmem:[#allocation8 + $0x8] sm:$0xff]   ;;  %3946 = vmatpush3.bf16.msra.mxu1 %v4420_v29 }
 0x7a2   :  { %v4461_v18 = vpop.eup %4460  ;;  %3947 = vmatprep.subr.bf16.mxu1 %v6780_v44 }
 0x7a3   :  { %v1335_v1 = vmul.f32 %v4461_v18, %v5775_v6  ;;  %v4418_v6 = vld [vmem:[#allocation7 + $0xc] ss:$16 sps:$4 sm:$0xff]  }
 0x7a4   :  { %1447 = vadd.xlane.f32.xlu0 %v1446_v26  ;;  %3957 = vmatprep.subr.bf16.mxu0 %v4418_v6  ;;  %v6748_v26 = vsub.s32 5, %v4869_v2 }
 0x7a5   :  { %v1341_v21 = vmul.f32 %v1339_v16, %v1335_v1  ;;  %3948 = vmatpush3.bf16.msra.mxu1 %v4421_v59 }
 0x7a6   :  { %3949 = vmatprep.subr.bf16.mxu1 %v6780_v44 }
 0x7a7   :  { %v5821_v56 = vadd.f32 %v1344_v3, %v1341_v21 }
 0x7a9   :  { %3950 = vmatpush3.bf16.msra.mxu1 %v4422_v39 }
 0x7aa   :  { %3951 = vmatprep.subr.bf16.mxu1 %v6780_v44 }
 0x7ab   :  { %v4463_v30 = vpop.eup %4462 }
 0x7ac   :  { %v1336_v63 = vmul.f32 %v4463_v30, %v1320_v35  ;;  %1479 = vrot.lane.b32.xlu1 %v5773_v50, %s4732_s1  ;;  %v4419_v35 = vld [vmem:[#allocation7 + $0x2c] ss:$16 sps:$4 sm:$0xff]   ;;  %v5847_v30 = vrot.slane %v5754_v22, %v6748_v26 }
 0x7ad   :  { %3952 = vmatpush3.bf16.msra.mxu1 %v4423_v52 }
 0x7ae   :  { %v1342_v25 = vmul.f32 %v1339_v16, %v1336_v63  ;;  %3977 = vmatprep.subr.bf16.mxu1 %v6780_v44 }
 0x7b0   :  { %v5823_v51 = vadd.f32 %v1344_v3, %v1342_v25  ;;  %1797 = vrot.lane.b32.xlu1 %v4421_v59, %s4742_s14  ;;  %v6749_v3 = vsub.s32 4, %v4869_v2 }
 0x7b2   :  { %v1486_v61 = vpack.c.bf16 %v5823_v51, %v5821_v56 }
 0x7b4   :  { %3942 = vmatmul.mubr.msk.bf16.vlgmr.msra.gmra.mrb[12].mxu0 %vm6842_vm0, %v1486_v61  ;;  %1801 = vrot.lane.b32.xlu1 %v4423_v52, %s4742_s14  ;;  %vm6855_vm0 = vmmov %vm6854_vm3 }
 0x7b5   :  { %3958 = vmatpush3.bf16.msra.mxu0 %v4418_v6 }
 0x7b6   :  { %3959 = vmatprep.subr.bf16.mxu0 %v4419_v35 }
 0x7b8   :  { %1808 = vrot.lane.b32.xlu1 %v5847_v30, %s4732_s1 }
 0x7b9   :  { %3960 = vmatpush3.bf16.msra.mxu0 %v4419_v35 }
 0x7ba   :  { %1472 = vrot.lane.b32.xlu0 %v5773_v50, %s4742_s14  ;;  %v1490_v50 = vrot.slane %v5754_v22, %v6749_v3 }
 0x7be   :  { %1795 = vrot.lane.b32.xlu0 %v4420_v29, %s4742_s14 }
 0x7c2   :  { %1799 = vrot.lane.b32.xlu0 %v4422_v39, %s4742_s14 }
 0x7c6   :  { %1593 = vrot.lane.b32.xlu0 %v1490_v50, %s4732_s1 }
 0x824   :  { %v1451_v43 = vpop.xlane.xlu1 %1450 }
 0x825   :  { %v1457_v1 = vmul.f32 0.03125, %v1451_v43 }
 0x827   :  { %v1461_v21 = vadd.f32 1e-12, %v1457_v1 }
 0x828   :  { %v1445_v18 = vpop.xlane.xlu1 %1444 }
 0x829   :  { %v1455_v16 = vmul.f32 0.03125, %v1445_v18 }
 0x82b   :  { %v1459_v63 = vadd.f32 1e-12, %v1455_v16 }
 0x82d   :  { %v1454_v25 = vpop.xlane.xlu0 %1453  ;;  %4464 = vrsqrt.f32 %v1459_v63 }
 0x82e   :  { %v1458_v61 = vmul.f32 0.03125, %v1454_v25  ;;  %4466 = vrsqrt.f32 %v1461_v21 }
 0x830   :  { %v1462_v6 = vadd.f32 1e-12, %v1458_v61 }
 0x831   :  { %v1448_v35 = vpop.xlane.xlu0 %1447 }
 0x832   :  { %4468 = vrsqrt.f32 %v1462_v6  ;;  %v1456_v29 = vmul.f32 0.03125, %v1448_v35  ;;  %v1480_v35 = vpop.permute.xlu1 %1479 }
 0x834   :  { %v1460_v59 = vadd.f32 1e-12, %v1456_v29 }
 0x835   :  { %v1473_v1 = vpop.permute.xlu0 %1472 }
 0x836   :  { %4470 = vrsqrt.f32 %v1460_v59 }
 0x837   :  { %v4465_v39 = vpop.eup %4464 }
 0x838   :  { %v4467_v52 = vpop.eup %4466  ;;  %v1467_v18 = vmul.f32 %v4465_v39, %v5799_v5 }
 0x839   :  { %v1469_v16 = vmul.f32 %v4467_v52, %v5797_v14 }
 0x83a   :  { %v1475_v21 = vmul.f32 %v1473_v1, %v1467_v18 }
 0x83b   :  { %v1477_v61 = vmul.f32 %v1473_v1, %v1469_v16 }
 0x83c   :  { %v4469_v43 = vpop.eup %4468  ;;  %v5857_v59 = vadd.f32 %v1480_v35, %v1475_v21 }
 0x83d   :  { %v1470_v26 = vmul.f32 %v4469_v43, %v5810_v46  ;;  %v5861_v5 = vadd.f32 %v1480_v35, %v1477_v61 }
 0x83f   :  { %v1478_v25 = vmul.f32 %v1473_v1, %v1470_v26 }
 0x840   :  { %v4471_v3 = vpop.eup %4470 }
 0x841   :  { %v1468_v63 = vmul.f32 %v4471_v3, %v5808_v9  ;;  %v5855_v29 = vadd.f32 %v1480_v35, %v1478_v25 }
 0x843   :  { %v1476_v6 = vmul.f32 %v1473_v1, %v1468_v63  ;;  %v1681_v46 = vpack.c.bf16 %v5855_v29, %v5861_v5 }
 0x845   :  { %v5859_v57 = vadd.f32 %v1480_v35, %v1476_v6 }
 0x847   :  { %v1680_v14 = vpack.c.bf16 %v5859_v57, %v5857_v59 }
 0x849   :  { %3961 = vmatprep.mubr.msk.bf16.mxu0 %vm6851_vm14, %v1680_v14  ;;  %vm6856_vm14 = vmmov %vm6852_vm5 }
 0x84a   :  { %3962 = vmatmul.mubr.msk.bf16.vlgmr.msra.gmra.mrb[16].mxu0 %vm6852_vm5, %v1681_v46 }
 0x887   :  { %v1534_v9 = vpop.f32.mrb[12].mxu0 }
 0x888   :  { %v1535_v3 = vadd.f32 %v1534_v9, %v1490_v50  ;;  %v3943_v26 = vpop.f32.mrb[13].mxu0 }
 0x889   :  { %v1537_v39 = vpop.f32.mrb[14].mxu0 }
 0x88a   :  { %v1543_v52 = vmul.f32 0.044715, %v1535_v3  ;;  %v1538_v43 = vadd.f32 %v1537_v39, %v1490_v50  ;;  %v3944_v18 = vpop.f32.mrb[15].mxu0  ;;  %v1541_v9 = vmul.f32 0.5, %v1535_v3 }
 0x88b   :  { %v1798_v18 = vpop.permute.xlu1 %1797 }
 0x88c   :  { %v1545_v16 = vmul.f32 %v1543_v52, %v1535_v3  ;;  %v1544_v1 = vmul.f32 0.044715, %v1538_v43  ;;  %v1542_v26 = vmul.f32 0.5, %v1538_v43  ;;  %v1796_v52 = vpop.permute.xlu0 %1795 }
 0x88d   :  { %3965 = vmatprep.subr.bf16.mxu0 %v1796_v52 }
 0x88e   :  { %v1547_v25 = vmul.f32 %v1545_v16, %v1535_v3  ;;  %v1546_v63 = vmul.f32 %v1544_v1, %v1538_v43  ;;  %3966 = vmatpush3.bf16.msra.mxu0 %v1796_v52 }
 0x88f   :  { %3967 = vmatprep.subr.bf16.mxu0 %v1798_v18  ;;  %v1802_v16 = vpop.permute.xlu1 %1801 }
 0x890   :  { %v1549_v21 = vadd.f32 %v1547_v25, %v1535_v3  ;;  %v1548_v61 = vmul.f32 %v1546_v63, %v1538_v43 }
 0x892   :  { %v1551_v6 = vmul.f32 0.7978846, %v1549_v21  ;;  %v1550_v35 = vadd.f32 %v1548_v61, %v1538_v43  ;;  %3968 = vmatpush3.bf16.msra.mxu0 %v1798_v18 }
 0x894   :  { %4472 = vtanh.f32 %v1551_v6  ;;  %v1552_v32 = vmul.f32 0.7978846, %v1550_v35 }
 0x896   :  { %4474 = vtanh.f32 %v1552_v32  ;;  %v1800_v32 = vpop.permute.xlu0 %1799 }
 0x897   :  { %3969 = vmatprep.subr.bf16.mxu0 %v1800_v32 }
 0x898   :  { %3970 = vmatpush3.bf16.msra.mxu0 %v1800_v32 }
 0x899   :  { %3971 = vmatprep.subr.bf16.mxu0 %v1802_v16 }
 0x89c   :  { %3972 = vmatpush3.bf16.msra.mxu0 %v1802_v16 }
 0x89d   :  { %3993 = vmatprep.subr.bf16.mxu0 %v6780_v44 }
 0x89e   :  { %v4473_v14 = vpop.eup %4472 }
 0x89f   :  { %v1555_v46 = vadd.f32 1.0, %v4473_v14 }
 0x8a0   :  { %v4475_v47 = vpop.eup %4474 }
 0x8a1   :  { %v1556_v7 = vadd.f32 1.0, %v4475_v47  ;;  %v1557_v10 = vmul.f32 %v1555_v46, %v1541_v9 }
 0x8a3   :  { %v1558_v50 = vmul.f32 %v1556_v7, %v1542_v26 }
 0x8a5   :  { %v1559_v39 = vpack.c.bf16 %v1558_v50, %v1557_v10 }
 0x8a7   :  { %3954 = vmatmul.mubr.msk.bf16.vlgmr.msra.gmra.mrb[28].mxu1 %vm6853_vm13, %v1559_v39  ;;  %vm6857_vm13 = vmmov %vm6852_vm5 }
 0x8a8   :  { %3981 = vmatprep.mubr.msk.bf16.mxu1 %vm6838_vm4, %v6780_v44 }
 0x91d   :  { %v3963_v10 = vpop.f32.mrb[16].mxu0 }
 0x91e   :  { %v1751_v7 = vadd.f32 %v3963_v10, %v5847_v30  ;;  %v1742_v47 = vpop.f32.mrb[17].mxu0 }
 0x91f   :  { %v1743_v3 = vadd.f32 %v1742_v47, %v5847_v30  ;;  %v3964_v43 = vpop.f32.mrb[18].mxu0 }
 0x920   :  { %v1763_v1 = vmul.f32 0.044715, %v1751_v7  ;;  %v1754_v25 = vadd.f32 %v3964_v43, %v5847_v30  ;;  %v1745_v63 = vpop.f32.mrb[19].mxu0 }
 0x921   :  { %v1761_v21 = vmul.f32 0.044715, %v1743_v3  ;;  %v1746_v61 = vadd.f32 %v1745_v63, %v5847_v30 }
 0x922   :  { %v1767_v6 = vmul.f32 %v1763_v1, %v1751_v7  ;;  %v1764_v35 = vmul.f32 0.044715, %v1754_v25 }
 0x923   :  { %v1765_v14 = vmul.f32 %v1761_v21, %v1743_v3  ;;  %v1762_v46 = vmul.f32 0.044715, %v1746_v61 }
 0x924   :  { %v1771_v9 = vmul.f32 %v1767_v6, %v1751_v7  ;;  %v1768_v26 = vmul.f32 %v1764_v35, %v1754_v25 }
 0x925   :  { %v1769_v50 = vmul.f32 %v1765_v14, %v1743_v3  ;;  %v1766_v39 = vmul.f32 %v1762_v46, %v1746_v61  ;;  %v1759_v46 = vmul.f32 0.5, %v1751_v7 }
 0x926   :  { %v1775_v52 = vadd.f32 %v1771_v9, %v1751_v7  ;;  %v1772_v18 = vmul.f32 %v1768_v26, %v1754_v25  ;;  %v1760_v9 = vmul.f32 0.5, %v1754_v25 }
 0x927   :  { %v1773_v32 = vadd.f32 %v1769_v50, %v1743_v3  ;;  %v1770_v16 = vmul.f32 %v1766_v39, %v1746_v61  ;;  %v1757_v50 = vmul.f32 0.5, %v1743_v3  ;;  %v1758_v39 = vmul.f32 0.5, %v1746_v61 }
 0x928   :  { %v1779_v10 = vmul.f32 0.7978846, %v1775_v52  ;;  %v1776_v47 = vadd.f32 %v1772_v18, %v1754_v25 }
 0x929   :  { %v1777_v23 = vmul.f32 0.7978846, %v1773_v32  ;;  %v1774_v43 = vadd.f32 %v1770_v16, %v1746_v61 }
 0x92a   :  { %4476 = vtanh.f32 %v1779_v10  ;;  %v1780_v4 = vmul.f32 0.7978846, %v1776_v47 }
 0x92b   :  { %4478 = vtanh.f32 %v1777_v23  ;;  %v1778_v30 = vmul.f32 0.7978846, %v1774_v43 }
 0x92c   :  { %4480 = vtanh.f32 %v1780_v4  ;;  %v1594_v4 = vpop.permute.xlu0 %1593 }
 0x92d   :  { %4482 = vtanh.f32 %v1778_v30 }
 0x934   :  { %v4477_v1 = vpop.eup %4476 }
 0x935   :  { %v4479_v63 = vpop.eup %4478  ;;  %v1787_v21 = vadd.f32 1.0, %v4477_v1 }
 0x936   :  { %v4481_v6 = vpop.eup %4480  ;;  %v1785_v35 = vadd.f32 1.0, %v4479_v63 }
 0x937   :  { %v4483_v14 = vpop.eup %4482  ;;  %v1788_v26 = vadd.f32 1.0, %v4481_v6  ;;  %v1791_v18 = vmul.f32 %v1787_v21, %v1759_v46 }
 0x938   :  { %v1786_v52 = vadd.f32 1.0, %v4483_v14  ;;  %v1789_v16 = vmul.f32 %v1785_v35, %v1757_v50  ;;  %v1809_v14 = vpop.permute.xlu1 %1808 }
 0x939   :  { %v1792_v32 = vmul.f32 %v1788_v26, %v1760_v9 }
 0x93a   :  { %v1790_v10 = vmul.f32 %v1786_v52, %v1758_v39 }
 0x93b   :  { %v1794_v23 = vpack.c.bf16 %v1792_v32, %v1791_v18 }
 0x93c   :  { %v1793_v47 = vpack.c.bf16 %v1790_v10, %v1789_v16 }
 0x93e   :  { %3973 = vmatprep.mubr.msk.bf16.mxu0 %vm6854_vm3, %v1793_v47  ;;  %vm6858_vm3 = vmmov %vm6852_vm5 }
 0x93f   :  { %3974 = vmatmul.mubr.msk.bf16.vlgmr.msra.gmra.mrb[20].mxu0 %vm6855_vm0, %v1794_v23  ;;  %vm6859_vm0 = vmmov %vm6858_vm3 }
 0x940   :  { %4009 = vmatprep.mubr.msk.bf16.mxu0 %vm6838_vm4, %v6780_v44 }
 0x97a   :  { %v1633_v7 = vpop.f32.mrb[28].mxu1 }
 0x97b   :  { %v1634_v25 = vadd.f32 %v1633_v7, %v1594_v4  ;;  %v3955_v43 = vpop.f32.mrb[29].mxu1 }
 0x97c   :  { %v1636_v3 = vpop.f32.mrb[30].mxu1 }
 0x97d   :  { %v1637_v61 = vadd.f32 %v1636_v3, %v1594_v4  ;;  %v3956_v30 = vpop.f32.mrb[31].mxu1  ;;  %v1640_v1 = vadd.f32 %v1634_v25, %v5821_v56 }
 0x97f   :  { %v1642_v63 = vsel %vm6856_vm14, %v1640_v1, 0.0  ;;  %v1641_v21 = vadd.f32 %v1637_v61, %v5823_v51  ;;  %vm6860_vm14 = vmmov %vm6859_vm0 }
 0x980   :  { %1643 = vadd.xlane.f32.xlu0 %v1642_v63 }
 0x981   :  { %v1645_v6 = vsel %vm6852_vm5, %v1641_v21, 0.0  ;;  %vm6861_vm5 = vmmov %vm6859_vm0 }
 0x982   :  { %1646 = vadd.xlane.f32.xlu1 %v1645_v6  ;;  %v6760_v6 = vsub.s32 6, %v4869_v2 }
 0xa0d   :  { %v1644_v35 = vpop.xlane.xlu0 %1643 }
 0xa0e   :  { %v1648_v46 = vmul.f32 0.03125, %v1644_v35 }
 0xa0f   :  { %v1647_v32 = vpop.xlane.xlu1 %1646 }
 0xa10   :  { %v5885_v26 = vsub.f32 %v1640_v1, %v1648_v46  ;;  %v1649_v4 = vmul.f32 0.03125, %v1647_v32 }
 0xa12   :  { %v3975_v9 = vpop.f32.mrb[20].mxu0  ;;  %v1652_v47 = vmul.f32 %v5885_v26, %v5885_v26  ;;  %v1651_v61 = vsub.f32 %v1641_v21, %v1649_v4  ;;  %v4424_v21 = vld [vmem:[#allocation7 + $0x40] ss:$16 sps:$4 sm:$0xff]  }
 0xa13   :  { %v1860_v50 = vadd.f32 %v3975_v9, %v1809_v14  ;;  %v1851_v39 = vpop.f32.mrb[21].mxu0  ;;  %3978 = vmatpush3.bf16.msra.mxu1 %v4424_v21 }
 0xa14   :  { %v1852_v52 = vadd.f32 %v1851_v39, %v1809_v14  ;;  %v3976_v18 = vpop.f32.mrb[22].mxu0  ;;  %v1654_v3 = vsel %vm6859_vm0, %v1652_v47, 0.0  ;;  %v1653_v1 = vmul.f32 %v1651_v61, %v1651_v61  ;;  %3979 = vmatprep.subr.bf16.mxu1 %v6780_v44 }
 0xa15   :  { %v1854_v56 = vpop.f32.mrb[23].mxu0  ;;  %v1868_v16 = vadd.f32 %v1860_v50, %v5861_v5  ;;  %v1863_v7 = vadd.f32 %v3976_v18, %v1809_v14 }
 0xa16   :  { %v1855_v10 = vadd.f32 %v1854_v56, %v1809_v14  ;;  %v1866_v51 = vadd.f32 %v1852_v52, %v5857_v59 }
 0xa17   :  { %v1876_v23 = vsel %vm6857_vm13, %v1868_v16, 0.0  ;;  %v1869_v59 = vadd.f32 %v1863_v7, %v5855_v29  ;;  %vm6862_vm13 = vmmov %vm6859_vm0  ;;  %v4425_v29 = vld [vmem:[#allocation7 + $0x60] ss:$16 sps:$4 sm:$0xff]  }
 0xa18   :  { %1877 = vadd.xlane.f32.xlu1 %v1876_v23  ;;  %v1870_v25 = vsel %vm6858_vm3, %v1866_v51, 0.0  ;;  %v1867_v43 = vadd.f32 %v1855_v10, %v5859_v57  ;;  %v1657_v63 = vsel %vm6862_vm13, %v1653_v1, 0.0  ;;  %v1671_v57 = vrot.slane %v5754_v22, %v6760_v6  ;;  %3980 = vmatpush3.bf16.msra.mxu1 %v4425_v29  ;;  %vm6863_vm3 = vmmov %vm6859_vm0 }
 0xa19   :  { %1871 = vadd.xlane.f32.xlu0 %v1870_v25  ;;  %v1879_v30 = vsel %vm6861_vm5, %v1869_v59, 0.0  ;;  %vm6865_vm5 = vmmov %vm6859_vm0 }
 0xa1a   :  { %v1873_v5 = vsel %vm6860_vm14, %v1867_v43, 0.0  ;;  %vm6864_vm14 = vmmov %vm6859_vm0 }
 0xa1b   :  { %vm6868_vm13 = vmmov %vm6859_vm0 }
 0xa1c   :  { %1655 = vadd.xlane.f32.xlu1 %v1654_v3 }
 0xa1d   :  { %1874 = vadd.xlane.f32.xlu0 %v1873_v5 }
 0xa21   :  { %1880 = vadd.xlane.f32.xlu0 %v1879_v30 }
 0xa25   :  { %1658 = vadd.xlane.f32.xlu0 %v1657_v63 }
 0xa2d   :  { %1675 = vrot.lane.b32.xlu1 %v1671_v57, %s4742_s14 }
 0xaa5   :  { %v1878_v35 = vpop.xlane.xlu1 %1877 }
 0xaa6   :  { %v1884_v14 = vmul.f32 0.03125, %v1878_v35  ;;  %v1872_v46 = vpop.xlane.xlu0 %1871 }
 0xaa7   :  { %v1882_v9 = vmul.f32 0.03125, %v1872_v46 }
 0xaa8   :  { %v5905_v50 = vsub.f32 %v1868_v16, %v1884_v14 }
 0xaa9   :  { %v5907_v39 = vsub.f32 %v1866_v51, %v1882_v9  ;;  %v1656_v52 = vpop.xlane.xlu1 %1655 }
 0xaaa   :  { %v1660_v18 = vmul.f32 0.03125, %v1656_v52  ;;  %v1875_v32 = vpop.xlane.xlu0 %1874  ;;  %v1892_v22 = vmul.f32 %v5905_v50, %v5905_v50 }
 0xaab   :  { %v1890_v10 = vmul.f32 %v5907_v39, %v5907_v39  ;;  %v1883_v47 = vmul.f32 0.03125, %v1875_v32 }
 0xaac   :  { %v1900_v56 = vsel %vm6863_vm3, %v1892_v22, 0.0  ;;  %v1662_v23 = vadd.f32 1e-12, %v1660_v18  ;;  %vm6874_vm3 = vmmov %vm6859_vm0 }
 0xaad   :  { %1901 = vadd.xlane.f32.xlu1 %v1900_v56  ;;  %v1894_v16 = vsel %vm6859_vm0, %v1890_v10, 0.0  ;;  %v1887_v51 = vsub.f32 %v1867_v43, %v1883_v47  ;;  %v4426_v56 = vld [vmem:[#allocation7 + $0x44] ss:$16 sps:$4 sm:$0xff]  }
 0xaae   :  { %v1881_v4 = vpop.xlane.xlu0 %1880  ;;  %4484 = vrsqrt.f32 %v1662_v23  ;;  %3985 = vmatprep.subr.bf16.mxu1 %v4426_v56 }
 0xaaf   :  { %v1885_v7 = vmul.f32 0.03125, %v1881_v4  ;;  %v1891_v21 = vmul.f32 %v1887_v51, %v1887_v51 }
 0xab1   :  { %v1889_v25 = vsub.f32 %v1869_v59, %v1885_v7  ;;  %1895 = vadd.xlane.f32.xlu1 %v1894_v16  ;;  %v1897_v29 = vsel %vm6865_vm5, %v1891_v21, 0.0  ;;  %v1676_v59 = vpop.permute.xlu1 %1675  ;;  %vm6945_vm5 = vmmov %vm6859_vm0 }
 0xab2   :  { %v1659_v3 = vpop.xlane.xlu0 %1658 }
 0xab3   :  { %v1661_v5 = vmul.f32 0.03125, %v1659_v3  ;;  %v1893_v30 = vmul.f32 %v1889_v25, %v1889_v25 }
 0xab5   :  { %v1663_v1 = vadd.f32 1e-12, %v1661_v5  ;;  %v1903_v63 = vsel %vm6864_vm14, %v1893_v30, 0.0  ;;  %vm6944_vm14 = vmmov %vm6859_vm0 }
 0xab6   :  { %1904 = vadd.xlane.f32.xlu0 %v1903_v63 }
 0xab7   :  { %4486 = vrsqrt.f32 %v1663_v1 }
 0xab8   :  { %v4485_v35 = vpop.eup %4484 }
 0xab9   :  { %v1666_v14 = vmul.f32 %v4485_v35, %v5885_v26  ;;  %v4427_v26 = vld [vmem:[#allocation7 + $0x64] ss:$16 sps:$4 sm:$0xff]  }
 0xaba   :  { %1898 = vadd.xlane.f32.xlu0 %v1897_v29 }
 0xabb   :  { %v1672_v9 = vmul.f32 %v1671_v57, %v1666_v14 }
 0xabd   :  { %v5919_v18 = vadd.f32 %v1676_v59, %v1672_v9 }
 0xabf   :  { %6866 = vst [vmem:[#allocation33_spill] sm:$0xff] %v5919_v18 }
 0xac1   :  { %v4487_v46 = vpop.eup %4486 }
 0xac2   :  { %v1667_v43 = vmul.f32 %v4487_v46, %v1651_v61  ;;  %1929 = vrot.lane.b32.xlu1 %v1671_v57, %s4741_s4  ;;  %v6869_v61 = vmov 1.0|1.0  }
 0xac4   :  { %v1673_v52 = vmul.f32 %v1671_v57, %v1667_v43 }
 0xac6   :  { %v5921_v32 = vadd.f32 %v1676_v59, %v1673_v52 }
 0xac8   :  { %6867 = vst [vmem:[#allocation34_spill] sm:$0xff] %v5921_v32  ;;  %v1938_v22 = vpack.c.bf16 %v5921_v32, %v5919_v18 }
 0xaca   :  { %3982 = vmatmul.mubr.msk.bf16.vlgmr.msra.gmra.mrb[32].mxu1 %vm6868_vm13, %v1938_v22  ;;  %vm6947_vm13 = vmmov %vm6859_vm0 }
 0xacb   :  { %3986 = vmatpush3.bf16.msra.mxu1 %v4426_v56 }
 0xacc   :  { %3987 = vmatprep.subr.bf16.mxu1 %v4427_v26 }
 0xacf   :  { %3988 = vmatpush3.bf16.msra.mxu1 %v4427_v26 }
 0xad0   :  { %1922 = vrot.lane.b32.xlu0 %v1671_v57, %s4732_s1  ;;  %4219 = vmatprep.subr.msk.bf16.mxu1 %vm5319_vm1, %v6869_v61 }
 0xb3a   :  { %v1902_v10 = vpop.xlane.xlu1 %1901 }
 0xb3b   :  { %v1908_v47 = vmul.f32 0.03125, %v1902_v10 }
 0xb3d   :  { %v1912_v16 = vadd.f32 1e-12, %v1908_v47 }
 0xb3e   :  { %v1896_v23 = vpop.xlane.xlu1 %1895 }
 0xb3f   :  { %v1906_v4 = vmul.f32 0.03125, %v1896_v23 }
 0xb41   :  { %v1910_v7 = vadd.f32 1e-12, %v1906_v4 }
 0xb42   :  { %v1930_v23 = vpop.permute.xlu1 %1929 }
 0xb43   :  { %v1905_v3 = vpop.xlane.xlu0 %1904  ;;  %4488 = vrsqrt.f32 %v1910_v7 }
 0xb44   :  { %v1909_v5 = vmul.f32 0.03125, %v1905_v3  ;;  %4490 = vrsqrt.f32 %v1912_v16 }
 0xb46   :  { %v1913_v57 = vadd.f32 1e-12, %v1909_v5  ;;  %v6878_v5 = vunpack.i.l.bf16 %v5239_v37 }
 0xb47   :  { %v1899_v30 = vpop.xlane.xlu0 %1898 }
 0xb48   :  { %4492 = vrsqrt.f32 %v1913_v57  ;;  %v1907_v1 = vmul.f32 0.03125, %v1899_v30  ;;  %v6879_v30 = vunpack.i.l.bf16 %v5256_v33 }
 0xb4a   :  { %v1911_v63 = vadd.f32 1e-12, %v1907_v1 }
 0xb4b   :  { %v1923_v43 = vpop.permute.xlu0 %1922 }
 0xb4c   :  { %4494 = vrsqrt.f32 %v1911_v63  ;;  %v6880_v63 = vunpack.i.l.bf16 %v5261_v20 }
 0xb4d   :  { %v4489_v21 = vpop.eup %4488 }
 0xb4e   :  { %v4491_v29 = vpop.eup %4490  ;;  %v1918_v14 = vmul.f32 %v4489_v21, %v5907_v39 }
 0xb4f   :  { %v1920_v9 = vmul.f32 %v4491_v29, %v5905_v50  ;;  %v6881_v29 = vunpack.i.l.bf16 %v5592_v54 }
 0xb50   :  { %v1925_v56 = vmul.f32 %v1923_v43, %v1918_v14  ;;  %v6882_v14 = vunpack.i.l.bf16 %v5607_v62 }
 0xb51   :  { %v1927_v26 = vmul.f32 %v1923_v43, %v1920_v9  ;;  %v6883_v9 = vunpack.i.l.bf16 %v5615_v24 }
 0xb52   :  { %v4493_v35 = vpop.eup %4492  ;;  %v5934_v4 = vadd.f32 %v1930_v23, %v1925_v56 }
 0xb53   :  { %v1921_v46 = vmul.f32 %v4493_v35, %v1889_v25  ;;  %v5938_v16 = vadd.f32 %v1930_v23, %v1927_v26  ;;  %v6886_v26 = vunpack.i.h.bf16 %v5256_v33  ;;  %v6890_v33 = vunpack.i.h.bf16 %v5615_v24 }
 0xb54   :  { %6871 = vst [vmem:[#allocation36_spill] sm:$0xff] %v5934_v4 }
 0xb55   :  { %v1928_v52 = vmul.f32 %v1923_v43, %v1921_v46  ;;  %6873 = vst [vmem:[#allocation38_spill] sm:$0xff] %v5938_v16 }
 0xb56   :  { %v4495_v59 = vpop.eup %4494 }
 0xb57   :  { %v1919_v22 = vmul.f32 %v4495_v59, %v1887_v51  ;;  %v5932_v47 = vadd.f32 %v1930_v23, %v1928_v52  ;;  %v6884_v59 = vunpack.i.h.bf16 %v5229_v53 }
 0xb59   :  { %v1926_v10 = vmul.f32 %v1923_v43, %v1919_v22  ;;  %6870 = vst [vmem:[#allocation35_spill] sm:$0xff] %v5932_v47  ;;  %v2005_v50 = vpack.c.bf16 %v5932_v47, %v5938_v16  ;;  %v6885_v22 = vunpack.i.h.bf16 %v5239_v37  ;;  %v6889_v37 = vunpack.i.h.bf16 %v5607_v62  ;;  %v6900_v62 = vld [vmem:[#allocation20_spill] sm:$0xff] }
 0xb5a   :  { %v6901_v53 = vunpack.i.l.bf16 %v6900_v62  ;;  %v6907_v47 = vld [vmem:[#allocation24_spill] sm:$0xff] }
 0xb5b   :  { %v5936_v7 = vadd.f32 %v1930_v23, %v1926_v10  ;;  %v6887_v23 = vunpack.i.h.bf16 %v5261_v20 }
 0xb5d   :  { %6872 = vst [vmem:[#allocation37_spill] sm:$0xff] %v5936_v7  ;;  %v2004_v39 = vpack.c.bf16 %v5936_v7, %v5934_v4  ;;  %v6908_v7 = vunpack.i.l.bf16 %v6907_v47 }
 0xb5f   :  { %3989 = vmatprep.mubr.msk.bf16.mxu1 %vm6874_vm3, %v2004_v39  ;;  %vm6948_vm3 = vmmov %vm6859_vm0 }
 0xb60   :  { %3990 = vmatmul.mubr.msk.bf16.vlgmr.msra.gmra.mrb[36].mxu1 %vm6859_vm0, %v2005_v50  ;;  %v6888_v50 = vunpack.i.h.bf16 %v5592_v54 }
 0xb61   :  { %4221 = vmatpush3.bf16.msk.msra.mxu1 %vm5319_vm1, %v6869_v61  ;;  %vm6936_vm1 = vmmov %vm6859_vm0 }
 0xb62   :  { %4223 = vmatprep.subr.msk.bf16.mxu1 %vm5326_vm2, %v6869_v61 }
 0xb65   :  { %4225 = vmatpush3.bf16.msk.msra.mxu1 %vm5326_vm2, %v6869_v61  ;;  %vm6937_vm2 = vmmov %vm6859_vm0 }
 0xb66   :  { %4227 = vmatprep.subr.msk.bf16.mxu1 %vm5340_vm6, %v6869_v61 }
 0xb69   :  { %4229 = vmatpush3.bf16.msk.msra.mxu1 %vm5340_vm6, %v6869_v61  ;;  %vm6938_vm6 = vmmov %vm6859_vm0 }
 0xb6a   :  { %4231 = vmatprep.subr.msk.bf16.mxu1 %vm5354_vm9, %v6869_v61 }
 0xb6d   :  { %4233 = vmatpush3.bf16.msk.msra.mxu1 %vm5354_vm9, %v6869_v61  ;;  %vm6939_vm9 = vmmov %vm6859_vm0 }
 0xb6e   :  { %4235 = vmatprep.subr.msk.bf16.mxu1 %vm5373_vm12, %v6869_v61 }
 0xb71   :  { %4237 = vmatpush3.bf16.msk.msra.mxu1 %vm5373_vm12, %v6869_v61  ;;  %vm6940_vm12 = vmmov %vm6859_vm0 }
 0xb72   :  { %4239 = vmatprep.subr.msk.bf16.mxu1 %vm5384_vm15, %v6869_v61 }
 0xb75   :  { %4241 = vmatpush3.bf16.msk.msra.mxu1 %vm5384_vm15, %v6869_v61  ;;  %vm6941_vm15 = vmmov %vm6859_vm0 }
 0xb76   :  { %4243 = vmatprep.subr.msk.bf16.mxu1 %vm5407_vm7, %v6869_v61 }
 0xb79   :  { %4245 = vmatpush3.bf16.msk.msra.mxu1 %vm5407_vm7, %v6869_v61  ;;  %vm6942_vm7 = vmmov %vm6859_vm0 }
 0xb7a   :  { %4247 = vmatprep.subr.msk.bf16.mxu1 %vm5425_vm11, %v6869_v61 }
 0xb7d   :  { %4249 = vmatpush3.bf16.msk.msra.mxu1 %vm5425_vm11, %v6869_v61  ;;  %vm6943_vm11 = vmmov %vm6859_vm0 }
 0xb7e   :  { %4048 = vmatprep.subr.bf16.mxu1 %v6780_v44 }
 0xb9d   :  { %v1997_v34 = vpop.f32.mrb[32].mxu1 }
 0xb9e   :  { %v5997_v58 = vadd.f32 %v1997_v34, %v1947_v15  ;;  %v3983_v48 = vpop.f32.mrb[33].mxu1 }
 0xb9f   :  { %v2000_v36 = vpop.f32.mrb[34].mxu1 }
 0xba0   :  { %v5999_v51 = vadd.f32 %v2000_v36, %v1947_v15  ;;  %v3984_v25 = vpop.f32.mrb[35].mxu1  ;;  %v6004_v3 = vmul.f32 %v6877_v49, %v5997_v58  ;;  %v6009_v57 = vmul.f32 %v6878_v5, %v5997_v58  ;;  %v6014_v1 = vmul.f32 %v6879_v30, %v5997_v58 }
 0xba1   :  { %v6019_v21 = vmul.f32 %v6880_v63, %v5997_v58  ;;  %v6024_v35 = vmul.f32 %v6881_v29, %v5997_v58  ;;  %v6029_v46 = vmul.f32 %v6882_v14, %v5997_v58  ;;  %v6034_v43 = vmul.f32 %v6883_v9, %v5997_v58 }
 0xba2   :  { %v6039_v52 = vmul.f32 %v6884_v59, %v5999_v51  ;;  %v6044_v56 = vmul.f32 %v6885_v22, %v5999_v51  ;;  %v6049_v10 = vmul.f32 %v6886_v26, %v5999_v51  ;;  %v6054_v39 = vmul.f32 %v6887_v23, %v5999_v51 }
 0xba3   :  { %v6061_v12 = vmul.f32 %v6888_v50, %v5999_v51  ;;  %v6066_v15 = vmul.f32 %v6889_v37, %v5999_v51  ;;  %v6071_v34 = vmul.f32 %v6890_v33, %v5999_v51  ;;  %v6891_v49 = vunpack.i.l.bf16 %v5637_v28 }
 0xba4   :  { %v6892_v30 = vunpack.i.h.bf16 %v5637_v28  ;;  %v6893_v14 = vsub.s32 1, %v4869_v2  ;;  %v6894_v28 = vunpack.i.l.bf16 %v5059_v41 }
 0xba5   :  { %v6090_v5 = vmul.f32 %v6891_v49, %v5997_v58 }
 0xba6   :  { %v6095_v63 = vmul.f32 %v6892_v30, %v5999_v51  ;;  %v2013_v9 = vrot.slane %v5992_v27, %v6893_v14  ;;  %v6895_v30 = vunpack.i.l.bf16 %v5057_v40  ;;  %v6896_v14 = vld [vmem:[#allocation22_spill] sm:$0xff] }
 0xba7   :  { %v6897_v29 = vunpack.i.l.bf16 %v6896_v14 }
 0xc33   :  { %v3991_v59 = vpop.f32.mrb[36].mxu1 }
 0xc34   :  { %v6102_v22 = vadd.f32 %v3991_v59, %v2013_v9  ;;  %v2066_v26 = vpop.f32.mrb[37].mxu1 }
 0xc35   :  { %v6104_v23 = vadd.f32 %v2066_v26, %v2013_v9  ;;  %v3992_v50 = vpop.f32.mrb[38].mxu1  ;;  %v6898_v26 = vld [vmem:[#allocation21_spill] sm:$0xff] }
 0xc36   :  { %v6106_v37 = vadd.f32 %v3992_v50, %v2013_v9  ;;  %v2069_v33 = vpop.f32.mrb[39].mxu1  ;;  %v2083_v49 = vmul.f32 %v6894_v28, %v6102_v22  ;;  %v2087_v6 = vmul.f32 %v6895_v30, %v6102_v22  ;;  %v2091_v59 = vmul.f32 %v6897_v29, %v6102_v22  ;;  %v6902_v28 = vld [vmem:[#allocation23_spill] sm:$0xff] }
 0xc37   :  { %v6117_v25 = vadd.f32 %v2069_v33, %v2013_v9  ;;  %v6899_v24 = vunpack.i.l.bf16 %v6898_v26  ;;  %v2085_v36 = vmul.f32 %v6901_v53, %v6104_v23  ;;  %v6903_v54 = vunpack.i.l.bf16 %v6902_v28 }
 0xc38   :  { %v6904_v30 = vunpack.i.h.bf16 %v5059_v41  ;;  %v6905_v29 = vunpack.i.h.bf16 %v5057_v40  ;;  %v6906_v33 = vunpack.i.h.bf16 %v6896_v14  ;;  %v2095_v53 = vmul.f32 %v6908_v7, %v6102_v22  ;;  %v6913_v7 = vld [vmem:[#allocation25_spill] sm:$0xff] }
 0xc39   :  { %v2081_v50 = vmul.f32 %v6899_v24, %v6104_v23  ;;  %v2089_v48 = vmul.f32 %v6903_v54, %v6104_v23  ;;  %v6909_v16 = vunpack.i.h.bf16 %v6898_v26  ;;  %v6910_v41 = vunpack.i.h.bf16 %v6900_v62 }
 0xc3a   :  { %v2084_v20 = vmul.f32 %v6904_v30, %v6106_v37  ;;  %v2088_v9 = vmul.f32 %v6905_v29, %v6106_v37  ;;  %v2092_v24 = vmul.f32 %v6906_v33, %v6106_v37  ;;  %v6911_v40 = vunpack.i.h.bf16 %v6902_v28 }
 0xc3b   :  { %v2082_v54 = vmul.f32 %v6909_v16, %v6117_v25  ;;  %v2086_v30 = vmul.f32 %v6910_v41, %v6117_v25  ;;  %v6912_v14 = vunpack.i.h.bf16 %v6907_v47  ;;  %v6914_v27 = vunpack.i.l.bf16 %v6913_v7 }
 0xc3c   :  { %v2090_v29 = vmul.f32 %v6911_v40, %v6117_v25  ;;  %v2098_v4 = vpack.c.bf16 %v2084_v20, %v2083_v49  ;;  %v2100_v32 = vpack.c.bf16 %v2088_v9, %v2087_v6  ;;  %v2102_v18 = vpack.c.bf16 %v2092_v24, %v2091_v59 }
 0xc3d   :  { %v2096_v33 = vmul.f32 %v6912_v14, %v6106_v37  ;;  %v2093_v26 = vmul.f32 %v6914_v27, %v6104_v23  ;;  %v2097_v16 = vpack.c.bf16 %v2082_v54, %v2081_v50  ;;  %v2099_v2 = vpack.c.bf16 %v2086_v30, %v2085_v36 }
 0xc3e   :  { %v2101_v45 = vpack.c.bf16 %v2090_v29, %v2089_v48  ;;  %2140 = vrot.lane.b32.xlu0 %v2098_v4, %s4742_s14  ;;  %v6915_v28 = vunpack.i.h.bf16 %v6913_v7  ;;  %v2411_v47 = vpack.c.bf16 %v6117_v25, %v6104_v23  ;;  %v2412_v6 = vpack.c.bf16 %v6106_v37, %v6102_v22 }
 0xc3f   :  { %v2104_v62 = vpack.c.bf16 %v2096_v33, %v2095_v53  ;;  %v6916_v20 = vunpack.i.l.bf16 %v5454_v38  ;;  %2138 = vrot.lane.b32.xlu1 %v2097_v16, %s4742_s14  ;;  %v6917_v4 = vunpack.i.h.bf16 %v5454_v38  ;;  %v6918_v36 = vunpack.i.l.bf16 %v5462_v42 }
 0xc40   :  { %v2094_v41 = vmul.f32 %v6915_v28, %v6117_v25  ;;  %v6919_v59 = vunpack.i.h.bf16 %v5462_v42  ;;  %v6920_v9 = vunpack.i.l.bf16 %v5449_v55  ;;  %v6921_v38 = vunpack.i.h.bf16 %v5449_v55 }
 0xc41   :  { %v6166_v27 = vmul.f32 %v6916_v20, %v6102_v22  ;;  %v6172_v48 = vmul.f32 %v6917_v4, %v6106_v37  ;;  %v6177_v49 = vmul.f32 %v6918_v36, %v6104_v23  ;;  %v6922_v30 = vunpack.i.l.bf16 %v5475_v0 }
 0xc42   :  { %v6182_v50 = vmul.f32 %v6919_v59, %v6117_v25  ;;  %v6187_v24 = vmul.f32 %v6920_v9, %v6104_v23  ;;  %v2103_v53 = vpack.c.bf16 %v2094_v41, %v2093_v26  ;;  %v6192_v54 = vmul.f32 %v6921_v38, %v6117_v25  ;;  %2144 = vrot.lane.b32.xlu0 %v2100_v32, %s4742_s14 }
 0xc43   :  { %v6197_v40 = vmul.f32 %v6922_v30, %v6102_v22  ;;  %v6923_v42 = vunpack.i.h.bf16 %v5475_v0  ;;  %v2122_v14 = vpack.c.bf16 %v6172_v48, %v6166_v27  ;;  %v6924_v55 = vunpack.i.l.bf16 %v5487_v8  ;;  %2142 = vrot.lane.b32.xlu1 %v2099_v2, %s4742_s14 }
 0xc44   :  { %v2123_v33 = vpack.c.bf16 %v6182_v50, %v6177_v49  ;;  %v6925_v26 = vunpack.i.h.bf16 %v5487_v8  ;;  %v2121_v0 = vpack.c.bf16 %v6192_v54, %v6187_v24  ;;  %v6926_v41 = vunpack.i.l.bf16 %v5504_v19 }
 0xc45   :  { %v6202_v29 = vmul.f32 %v6923_v42, %v6106_v37  ;;  %v6211_v7 = vmul.f32 %v6924_v55, %v6104_v23  ;;  %v6927_v4 = vunpack.i.h.bf16 %v5504_v19  ;;  %v6928_v32 = vunpack.i.l.bf16 %v5547_v31 }
 0xc46   :  { %v6216_v16 = vmul.f32 %v6925_v26, %v6117_v25  ;;  %v6226_v20 = vmul.f32 %v6926_v41, %v6102_v22  ;;  %v6929_v9 = vunpack.i.h.bf16 %v5547_v31  ;;  %v6930_v30 = vunpack.i.l.bf16 %v5549_v60  ;;  %2148 = vrot.lane.b32.xlu0 %v2102_v18, %s4742_s14 }
 0xc47   :  { %v2124_v28 = vpack.c.bf16 %v6202_v29, %v6197_v40  ;;  %v6231_v36 = vmul.f32 %v6927_v4, %v6106_v37  ;;  %v6239_v59 = vmul.f32 %v6928_v32, %v6104_v23  ;;  %v6931_v42 = vunpack.i.h.bf16 %v5549_v60  ;;  %2146 = vrot.lane.b32.xlu1 %v2101_v45, %s4742_s14 }
 0xc48   :  { %v2125_v8 = vpack.c.bf16 %v6216_v16, %v6211_v7  ;;  %v6244_v38 = vmul.f32 %v6929_v9, %v6117_v25  ;;  %v6251_v2 = vmul.f32 %v6930_v30, %v6102_v22  ;;  %v6932_v60 = vpack.c.bf16 %v6039_v52, %v6004_v3 }
 0xc49   :  { %v2126_v19 = vpack.c.bf16 %v6231_v36, %v6226_v20  ;;  %v6256_v55 = vmul.f32 %v6931_v42, %v6106_v37  ;;  %v6933_v41 = vpack.c.bf16 %v6044_v56, %v6009_v57  ;;  %v6934_v18 = vpack.c.bf16 %v6049_v10, %v6014_v1 }
 0xc4a   :  { %v2127_v26 = vpack.c.bf16 %v6244_v38, %v6239_v59  ;;  %2152 = vrot.lane.b32.xlu0 %v2104_v62, %s4742_s14  ;;  %v6935_v45 = vpack.c.bf16 %v6054_v39, %v6019_v21  ;;  %v6959_v54 = vpack.c.bf16 %v6061_v12, %v6024_v35  ;;  %v6960_v40 = vpack.c.bf16 %v6066_v15, %v6029_v46 }
 0xc4b   :  { %v2128_v31 = vpack.c.bf16 %v6256_v55, %v6251_v2  ;;  %2150 = vrot.lane.b32.xlu1 %v2103_v53, %s4742_s14  ;;  %v6961_v29 = vpack.c.bf16 %v6071_v34, %v6034_v43  ;;  %v6962_v35 = vpack.c.bf16 %v6095_v63, %v6090_v5  ;;  %v6963_v43 = vld [vmem:[#allocation26_spill] sm:$0xff] }
 0xc4e   :  { %2419 = vrot.lane.b32.xlu0 %v6932_v60, %s4742_s14 }
 0xc4f   :  { %2417 = vrot.lane.b32.xlu1 %v6933_v41, %s4742_s14 }
 0xc52   :  { %2423 = vrot.lane.b32.xlu0 %v6934_v18, %s4742_s14 }
 0xc53   :  { %2421 = vrot.lane.b32.xlu1 %v6935_v45, %s4742_s14  ;;  %v6946_v45 = vpack.c.bf16 %v5999_v51, %v5997_v58 }
 0xcb0   :  { %v2141_v3 = vpop.permute.xlu0 %2140 }
 0xcb1   :  { %v2139_v62 = vpop.permute.xlu1 %2138  ;;  %v2161_v57 = vsel %vm6937_vm2, %v2141_v3, 0  ;;  %vm6950_vm2 = vmmov %vm6859_vm0 }
 0xcb2   :  { %v2158_v53 = vsel %vm6936_vm1, %v2139_v62, 0  ;;  %vm6949_vm1 = vmmov %vm6859_vm0 }
 0xcb3   :  { %3994 = vmatpush3.bf16.xpose.msra.mxu0 %v2158_v53 }
 0xcb4   :  { %3995 = vmatprep.subr.bf16.mxu0 %v6780_v44  ;;  %v2145_v21 = vpop.permute.xlu0 %2144 }
 0xcb5   :  { %v2143_v52 = vpop.permute.xlu1 %2142  ;;  %v2167_v56 = vsel %vm6939_vm9, %v2145_v21, 0  ;;  %vm6952_vm9 = vmmov %vm6859_vm0 }
 0xcb6   :  { %v2164_v1 = vsel %vm6938_vm6, %v2143_v52, 0  ;;  %vm6951_vm6 = vmmov %vm6859_vm0 }
 0xcb8   :  { %v2149_v4 = vpop.permute.xlu0 %2148 }
 0xcb9   :  { %v2147_v10 = vpop.permute.xlu1 %2146  ;;  %v2173_v32 = vsel %vm6941_vm15, %v2149_v4, 0  ;;  %vm6954_vm15 = vmmov %vm6859_vm0 }
 0xcba   :  { %v2170_v39 = vsel %vm6940_vm12, %v2147_v10, 0  ;;  %vm6953_vm12 = vmmov %vm6859_vm0  ;;  %v6402_v10 = vld [vmem:[#allocation7 + $0x48] ss:$16 sps:$4 sm:$0xff]  }
 0xcbb   :  { %3996 = vmatpush3.bf16.xpose.msra.mxu0 %v2161_v57 }
 0xcbc   :  { %3997 = vmatprep.subr.bf16.mxu0 %v6780_v44  ;;  %v2153_v42 = vpop.permute.xlu0 %2152 }
 0xcbd   :  { %v2151_v9 = vpop.permute.xlu1 %2150  ;;  %v2179_v60 = vsel %vm6943_vm11, %v2153_v42, 0 }
 0xcbe   :  { %v2176_v30 = vsel %vm6942_vm7, %v2151_v9, 0  ;;  %vm6955_vm7 = vcmask 523264  }
 0xcbf   :  { %vm6956_vm11 = vmmov %vm6955_vm7 }
 0xcc0   :  { %v2420_v62 = vpop.permute.xlu0 %2419 }
 0xcc1   :  { %v2418_v41 = vpop.permute.xlu1 %2417  ;;  %v2435_v53 = vsel %vm6949_vm1, %v2420_v62, 0 }
 0xcc2   :  { %v2432_v18 = vsel %vm6945_vm5, %v2418_v41, 0  ;;  %vm6958_vm5 = vmmov %vm6955_vm7 }
 0xcc3   :  { %3998 = vmatpush3.bf16.xpose.msra.mxu0 %v2164_v1 }
 0xcc4   :  { %3999 = vmatprep.subr.bf16.mxu0 %v6780_v44  ;;  %v2424_v58 = vpop.permute.xlu0 %2423 }
 0xcc5   :  { %v2422_v3 = vpop.permute.xlu1 %2421  ;;  %v2441_v51 = vsel %vm6953_vm12, %v2424_v58, 0  ;;  %vm6983_vm12 = vmmov %vm6950_vm2 }
 0xcc6   :  { %v2438_v57 = vsel %vm6951_vm6, %v2422_v3, 0 }
 0xccb   :  { %4000 = vmatpush3.bf16.xpose.msra.mxu0 %v2167_v56 }
 0xccc   :  { %4001 = vmatprep.subr.bf16.mxu0 %v6780_v44 }
 0xcd3   :  { %4002 = vmatpush3.bf16.xpose.msra.mxu0 %v2170_v39 }
 0xcd4   :  { %4003 = vmatprep.subr.bf16.mxu0 %v6780_v44 }
 0xcdb   :  { %4004 = vmatpush3.bf16.xpose.msra.mxu0 %v2173_v32 }
 0xcdc   :  { %4005 = vmatprep.subr.bf16.mxu0 %v6780_v44 }
 0xce3   :  { %4006 = vmatpush3.bf16.xpose.msra.mxu0 %v2176_v30 }
 0xce4   :  { %4007 = vmatprep.subr.bf16.mxu0 %v6780_v44 }
 0xceb   :  { %4008 = vmatpush3.bf16.xpose.msra.mxu0 %v2179_v60 }
 0xcec   :  { %4270 = vmatprep.subr.msk.bf16.mxu0 %vm6944_vm14, %v2418_v41  ;;  %vm6957_vm14 = vmmov %vm6955_vm7 }
 0xcf2   :  { %4010 = vmatmul.mubr.msk.bf16.vlgmr.msra.gmra.mrb[24].mxu0 %vm6947_vm13, %v6946_v45  ;;  %vm6964_vm13 = vmmov %vm6958_vm5 }
 0xcf3   :  { %4069 = vmatpush3.bf16.xpose.msra.mxu0 %v2432_v18  ;;  %4076 = vmatprep.mubr.msk.bf16.mxu0 %vm6948_vm3, %v2411_v47 }
 0xcf4   :  { %4271 = vmatprep.subr.msk.bf16.mxu0 %vm6859_vm0, %v2420_v62  ;;  %vm6973_vm0 = vmmov %vm6958_vm5 }
 0xcf5   :  { %vm6975_vm1 = vmmov %vm6973_vm0 }
 0xcf6   :  { %vm6976_vm6 = vmmov %vm6973_vm0 }
 0xcfb   :  { %4071 = vmatpush3.bf16.xpose.msra.mxu0 %v2435_v53 }
 0xcfc   :  { %4272 = vmatprep.subr.msk.bf16.mxu0 %vm6950_vm2, %v2422_v3 }
 0xd03   :  { %4073 = vmatpush3.bf16.xpose.msra.mxu0 %v2438_v57 }
 0xd04   :  { %4273 = vmatprep.subr.msk.bf16.mxu0 %vm6952_vm9, %v2424_v58  ;;  %vm6977_vm9 = vmmov %vm6973_vm0 }
 0xd0b   :  { %4075 = vmatpush3.bf16.xpose.msra.mxu0 %v2441_v51 }
 0xd0c   :  { %4114 = vmatprep.subr.bf16.mxu0 %v6780_v44 }
 0xd12   :  { %4077 = vmatmul.mubr.msk.bf16.vlgmr.msra.gmra.mrb[28].mxu0 %vm6954_vm15, %v2412_v6  ;;  %vm6984_vm15 = vmmov %vm6950_vm2 }
 0xd13   :  { %4118 = vmatprep.mubr.msk.bf16.mxu0 %vm6838_vm4, %v6780_v44  ;;  %4115 = vmatpush3.bf16.msra.mxu0 %v6402_v10 }
 0xd14   :  { %4116 = vmatprep.subr.bf16.mxu0 %v6780_v44 }
 0xdc5   :  { %v2215_v25 = vpop.f32.mrb[24].mxu0 }
 0xdc6   :  { %2222 = vmax.xlane.f32.xlu1 %v2215_v25  ;;  %v4011_v23 = vpop.f32.mrb[25].mxu0 }
 0xdc7   :  { %v2218_v47 = vpop.f32.mrb[26].mxu0  ;;  %v6970_v23 = vld [vmem:[#allocation30_spill] sm:$0xff] }
 0xdc8   :  { %2224 = vmax.xlane.f32.xlu0 %v2218_v47  ;;  %v4012_v52 = vpop.f32.mrb[27].mxu0 }
 0xdd7   :  { %2324 = vrot.lane.b32.xlu1 %v2122_v14, %s4732_s1 }
 0xddb   :  { %2326 = vrot.lane.b32.xlu1 %v2123_v33, %s4732_s1 }
 0xdde   :  { %2322 = vrot.lane.b32.xlu0 %v2121_v0, %s4732_s1 }
 0xde2   :  { %2328 = vrot.lane.b32.xlu0 %v2124_v28, %s4732_s1 }
 0xde5   :  { %v6336_v22 = vpop.f32.mrb[28].mxu0 }
 0xde6   :  { %2330 = vrot.lane.b32.xlu0 %v2125_v8, %s4732_s1  ;;  %v6342_v37 = vpop.f32.mrb[29].mxu0  ;;  %v2498_v48 = vsel %vm6955_vm7, %v6336_v22, -inf  ;;  %vm6985_vm7 = vmmov %vm6950_vm2 }
 0xde7   :  { %v6344_v6 = vpop.f32.mrb[30].mxu0  ;;  %v2492_v49 = vsel %vm6956_vm11, %v6342_v37, -inf  ;;  %vm6986_vm11 = vmmov %vm6950_vm2 }
 0xde8   :  { %v6346_v27 = vpop.f32.mrb[31].mxu0  ;;  %v2501_v50 = vsel %vm6957_vm14, %v6344_v6, -inf  ;;  %vm6993_vm14 = vmmov %vm6950_vm2 }
 0xde9   :  { %v2495_v24 = vsel %vm6958_vm5, %v6346_v27, -inf }
 0xdea   :  { %2332 = vrot.lane.b32.xlu0 %v2126_v19, %s4732_s1 }
 0xdff   :  { %2499 = vmax.xlane.f32.xlu1 %v2498_v48 }
 0xe03   :  { %2493 = vmax.xlane.f32.xlu1 %v2492_v49 }
 0xe07   :  { %2502 = vmax.xlane.f32.xlu1 %v2501_v50  ;;  %v6437_v50 = vld [vmem:[#allocation7 + $0x68] ss:$16 sps:$4 sm:$0xff]  }
 0xe08   :  { %4117 = vmatpush3.bf16.msra.mxu0 %v6437_v50 }
 0xe09   :  { %2496 = vmax.xlane.f32.xlu0 %v2495_v24  ;;  %4130 = vmatprep.subr.bf16.mxu0 %v6780_v44 }
 0xe18   :  { %2334 = vrot.lane.b32.xlu1 %v2127_v26, %s4732_s1 }
 0xe1c   :  { %2631 = vrot.lane.b32.xlu1 %v6959_v54, %s4732_s1 }
 0xe1f   :  { %2336 = vrot.lane.b32.xlu0 %v2128_v31, %s4732_s1 }
 0xe20   :  { %2635 = vrot.lane.b32.xlu1 %v6960_v40, %s4732_s1 }
 0xe23   :  { %2633 = vrot.lane.b32.xlu0 %v6961_v29, %s4732_s1 }
 0xe24   :  { %2808 = vrot.lane.b32.xlu1 %v6402_v10, %s4742_s14 }
 0xe27   :  { %2637 = vrot.lane.b32.xlu0 %v6962_v35, %s4732_s1 }
 0xe2b   :  { %2810 = vrot.lane.b32.xlu0 %v6437_v50, %s4742_s14 }
 0xe53   :  { %v2223_v12 = vpop.xlane.xlu1 %2222 }
 0xe54   :  { %v2226_v14 = vsub.f32 %v2215_v25, %v2223_v12 }
 0xe55   :  { %v2225_v33 = vpop.xlane.xlu0 %2224 }
 0xe56   :  { %v2228_v7 = vmul.f32 1.442695, %v2226_v14  ;;  %v2227_v16 = vsub.f32 %v2218_v47, %v2225_v33 }
 0xe57   :  { %v2325_v5 = vpop.permute.xlu1 %2324 }
 0xe58   :  { %4496 = vpow2.f32 %v2228_v7  ;;  %v2230_v0 = vmul.f32 1.442695, %v2227_v16 }
 0xe59   :  { %v2323_v20 = vpop.permute.xlu0 %2322 }
 0xe5a   :  { %4498 = vpow2.f32 %v2230_v0 }
 0xe5b   :  { %v2327_v63 = vpop.permute.xlu1 %2326 }
 0xe5d   :  { %v2329_v36 = vpop.permute.xlu0 %2328 }
 0xe62   :  { %v4497_v46 = vpop.eup %4496 }
 0xe63   :  { %v2232_v15 = vmul.f32 %v4497_v46, %v5493_v11  ;;  %v2331_v11 = vpop.permute.xlu0 %2330 }
 0xe64   :  { %v4499_v28 = vpop.eup %4498 }
 0xe65   :  { %4045 = vmatprep.mubr.f32.mxu1 %v2232_v15  ;;  %v2233_v34 = vmul.f32 %v4499_v28, %v6963_v43 }
 0xe67   :  { %4046 = vmatmul.mubr.f32.vlgmr.msra.gmra.mrb[18].mxu1 %v2233_v34  ;;  %v2333_v8 = vpop.permute.xlu0 %2332 }
 0xe68   :  { %4049 = vmatpush3.bf16.msra.mxu1 %v2323_v20  ;;  %4064 = vmatprep.mubr.msk.bf16.mxu1 %vm6838_vm4, %v6780_v44 }
 0xe69   :  { %4050 = vmatprep.subr.bf16.mxu1 %v6780_v44 }
 0xe6c   :  { %4051 = vmatpush3.bf16.msra.mxu1 %v2325_v5 }
 0xe6d   :  { %4052 = vmatprep.subr.bf16.mxu1 %v6780_v44 }
 0xe70   :  { %4053 = vmatpush3.bf16.msra.mxu1 %v2327_v63 }
 0xe71   :  { %4054 = vmatprep.subr.bf16.mxu1 %v6780_v44 }
 0xe74   :  { %4055 = vmatpush3.bf16.msra.mxu1 %v2329_v36 }
 0xe75   :  { %4056 = vmatprep.subr.bf16.mxu1 %v6780_v44 }
 0xe78   :  { %4057 = vmatpush3.bf16.msra.mxu1 %v2331_v11 }
 0xe79   :  { %4058 = vmatprep.subr.bf16.mxu1 %v6780_v44 }
 0xe7c   :  { %4059 = vmatpush3.bf16.msra.mxu1 %v2333_v8  ;;  %v6978_v8 = vld [vmem:[#allocation19_spill] sm:$0xff] }
 0xe7d   :  { %4060 = vmatprep.subr.bf16.mxu1 %v6780_v44 }
 0xe8c   :  { %v2500_v59 = vpop.xlane.xlu1 %2499 }
 0xe8d   :  { %v2506_v38 = vsub.f32 %v6336_v22, %v2500_v59  ;;  %v6971_v22 = vld [vmem:[#allocation31_spill] sm:$0xff]  ;;  %v6979_v59 = vsub.s32 2, %v6978_v8 }
 0xe8f   :  { %v2512_v45 = vmul.f32 1.442695, %v2506_v38  ;;  %v6980_v38 = vld [vmem:[#allocation39_spill] sm:$0xff] }
 0xe90   :  { %v2494_v19 = vpop.xlane.xlu1 %2493 }
 0xe91   :  { %v2504_v2 = vsub.f32 %v6342_v37, %v2494_v19  ;;  %v2706_v19 = vrot.slane %v6980_v38, %v6979_v59 }
 0xe93   :  { %v2508_v39 = vmul.f32 1.442695, %v2504_v2 }
 0xe94   :  { %v2503_v55 = vpop.xlane.xlu1 %2502 }
 0xe95   :  { %v2507_v26 = vsub.f32 %v6344_v6, %v2503_v55 }
 0xe96   :  { %v2497_v31 = vpop.xlane.xlu0 %2496 }
 0xe97   :  { %v2505_v1 = vsub.f32 %v6346_v27, %v2497_v31  ;;  %v2514_v3 = vmul.f32 1.442695, %v2507_v26  ;;  %v6974_v27 = vld [vmem:[#allocation32_spill] sm:$0xff] }
 0xe98   :  { %v2335_v21 = vpop.permute.xlu1 %2334 }
 0xe99   :  { %4061 = vmatpush3.bf16.msra.mxu1 %v2335_v21  ;;  %v2510_v18 = vmul.f32 1.442695, %v2505_v1  ;;  %v6981_v1 = vld [vmem:[#allocation33_spill] sm:$0xff] }
 0xe9a   :  { %4062 = vmatprep.subr.bf16.mxu1 %v6780_v44  ;;  %v2337_v56 = vpop.permute.xlu0 %2336 }
 0xe9c   :  { %v2632_v25 = vpop.permute.xlu1 %2631 }
 0xe9d   :  { %4063 = vmatpush3.bf16.msra.mxu1 %v2337_v56 }
 0xe9e   :  { %4251 = vmatprep.subr.msk.bf16.mxu1 %vm5609_vm10, %v6869_v61  ;;  %v2634_v6 = vpop.permute.xlu0 %2633 }
 0xea0   :  { %v2636_v49 = vpop.permute.xlu1 %2635 }
 0xea4   :  { %v2809_v36 = vpop.permute.xlu1 %2808 }
 0xf3a   :  { %v4047_v4 = vpop.f32.mrb[18].mxu1 }
 0xf3b   :  { %4500 = vrcp.f32 %v4047_v4  ;;  %v2300_v32 = vpop.f32.mrb[19].mxu1  ;;  %v6982_v4 = vld [vmem:[#allocation34_spill] sm:$0xff] }
 0xf3c   :  { %4502 = vrcp.f32 %v2300_v32 }
 0xf3d   :  { %4504 = vpow2.f32 %v2508_v39 }
 0xf3e   :  { %4506 = vpow2.f32 %v2510_v18 }
 0xf3f   :  { %4508 = vpow2.f32 %v2512_v45 }
 0xf40   :  { %4510 = vpow2.f32 %v2514_v3 }
 0xf45   :  { %v4501_v9 = vpop.eup %4500 }
 0xf46   :  { %v4503_v30 = vpop.eup %4502  ;;  %v2312_v42 = vmul.f32 %v4501_v9, %v2233_v34 }
 0xf47   :  { %v4505_v60 = vpop.eup %4504  ;;  %v2311_v41 = vmul.f32 %v4503_v30, %v2232_v15 }
 0xf48   :  { %v2516_v53 = vmul.f32 %v4505_v60, %v5664_v17  ;;  %v6966_v17 = vld [vmem:[#allocation28_spill] sm:$0xff]  ;;  %v4507_v58 = vpop.eup %4506 }
 0xf49   :  { %v2313_v62 = vpack.c.bf16 %v2312_v42, %v2311_v41  ;;  %vm6967_vm3 = vnez %v6966_v17  ;;  %v4509_v51 = vpop.eup %4508  ;;  %v2517_v47 = vmul.f32 %v4507_v58, %v6970_v23 }
 0xf4a   :  { %v4511_v52 = vpop.eup %4510  ;;  %v2518_v37 = vmul.f32 %v4509_v51, %v6971_v22 }
 0xf4b   :  { %4065 = vmatmul.mubr.bf16.vlgmr.msra.gmra.mrb[40].mxu1 %v2313_v62  ;;  %v2519_v48 = vmul.f32 %v4511_v52, %v6974_v27 }
 0xf4c   :  { %4253 = vmatpush3.bf16.msk.msra.mxu1 %vm5609_vm10, %v6869_v61  ;;  %4096 = vmatprep.mubr.msk.f32.mxu1 %vm6964_vm13, %v2516_v53  ;;  %vm6969_vm10 = vnez %v6968_v13  ;;  %vm6995_vm13 = vmmov %vm6950_vm2 }
 0xf4d   :  { %4255 = vmatprep.subr.msk.bf16.mxu1 %vm5675_vm8, %v6869_v61 }
 0xf50   :  { %4257 = vmatpush3.bf16.msk.msra.mxu1 %vm5675_vm8, %v6869_v61  ;;  %vm6972_vm8 = vmmov %vm6958_vm5 }
 0xf51   :  { %4259 = vmatprep.subr.msk.bf16.mxu1 %vm6967_vm3, %v6869_v61  ;;  %vm6994_vm5 = vmmov %vm6950_vm2 }
 0xf54   :  { %4261 = vmatpush3.bf16.msk.msra.mxu1 %vm6967_vm3, %v6869_v61  ;;  %vm6996_vm3 = vmmov %vm6950_vm2 }
 0xf55   :  { %4263 = vmatprep.subr.msk.bf16.mxu1 %vm6969_vm10, %v6869_v61 }
 0xf58   :  { %4265 = vmatpush3.bf16.msk.msra.mxu1 %vm6969_vm10, %v6869_v61  ;;  %v2638_v61 = vpop.permute.xlu0 %2637  ;;  %vm6997_vm10 = vmmov %vm6950_vm2 }
 0xf59   :  { %4102 = vmatprep.subr.bf16.mxu1 %v2632_v25 }
 0xf5b   :  { %4097 = vmatmul.mubr.msk.f32.vlgmr.msra.gmra.mrb[44].mxu1 %vm6972_vm8, %v2517_v47  ;;  %vm6998_vm8 = vmmov %vm6950_vm2 }
 0xf5c   :  { %4099 = vmatprep.mubr.msk.f32.mxu1 %vm6973_vm0, %v2518_v37  ;;  %4103 = vmatpush3.bf16.msra.mxu1 %v2632_v25  ;;  %v2811_v11 = vpop.permute.xlu0 %2810  ;;  %vm6999_vm0 = vmmov %vm6950_vm2 }
 0xf5d   :  { %4104 = vmatprep.subr.bf16.mxu1 %v2634_v6 }
 0xf5f   :  { %4100 = vmatmul.mubr.msk.f32.gmra.mrb[46].mxu1 %vm6975_vm1, %v2519_v48  ;;  %vm7000_vm1 = vmmov %vm6999_vm0 }
 0xf60   :  { %4105 = vmatpush3.bf16.msra.mxu1 %v2634_v6 }
 0xf61   :  { %4106 = vmatprep.subr.bf16.mxu1 %v2636_v49 }
 0xf64   :  { %4107 = vmatpush3.bf16.msra.mxu1 %v2636_v49 }
 0xf65   :  { %4108 = vmatprep.subr.bf16.mxu1 %v2638_v61 }
 0xf68   :  { %4109 = vmatpush3.bf16.msra.mxu1 %v2638_v61  ;;  %v6989_v61 = vld [vmem:[#allocation38_spill] sm:$0xff] }
 0xf69   :  { %4122 = vmatprep.subr.bf16.mxu1 %v2809_v36 }
0x101e   :  { %v2380_v24 = vpop.f32.mrb[40].mxu1 }
0x101f   :  { %v4066_v54 = vpop.f32.mrb[41].mxu1 }
0x1020   :  { %v2383_v40 = vpop.f32.mrb[42].mxu1  ;;  %v6990_v54 = vld [vmem:[#allocation37_spill] sm:$0xff] }
0x1021   :  { %v2698_v29 = vpack.c.bf16 %v2383_v40, %v2380_v24  ;;  %v4067_v35 = vpop.f32.mrb[43].mxu1 }
0x1023   :  { %4119 = vmatmul.mubr.msk.bf16.vlgmr.msra.gmra.mrb[32].mxu0 %vm6950_vm2, %v2698_v29 }
0x1024   :  { %4134 = vmatprep.mubr.msk.bf16.mxu0 %vm6838_vm4, %v6780_v44 }
0x102e   :  { %v4098_v12 = vpop.f32.mrb[44].mxu1 }
0x102f   :  { %4512 = vrcp.f32 %v4098_v12  ;;  %v2598_v14 = vpop.f32.mrb[45].mxu1  ;;  %v6992_v12 = vld [vmem:[#allocation35_spill] sm:$0xff] }
0x1030   :  { %4514 = vrcp.f32 %v2598_v14 }
0x1032   :  { %v4101_v33 = vpop.f32.mrb[46].mxu1 }
0x1033   :  { %4516 = vrcp.f32 %v4101_v33  ;;  %v2608_v7 = vpop.f32.mrb[47].mxu1 }
0x1034   :  { %4518 = vrcp.f32 %v2608_v7 }
0x1039   :  { %v4513_v16 = vpop.eup %4512 }
0x103a   :  { %v4515_v0 = vpop.eup %4514  ;;  %v2622_v46 = vmul.f32 %v4513_v16, %v2517_v47 }
0x103b   :  { %v2621_v15 = vmul.f32 %v4515_v0, %v2516_v53  ;;  %v6987_v53 = vsub.s32 3, %v6978_v8 }
0x103d   :  { %v4517_v28 = vpop.eup %4516  ;;  %v2625_v43 = vpack.c.bf16 %v2622_v46, %v2621_v15  ;;  %v6463_v3 = vrot.slane %v6980_v38, %v6987_v53 }
0x103e   :  { %v4519_v34 = vpop.eup %4518  ;;  %v2624_v20 = vmul.f32 %v4517_v28, %v2519_v48 }
0x103f   :  { %v2623_v5 = vmul.f32 %v4519_v34, %v2518_v37  ;;  %4110 = vmatprep.mubr.msk.bf16.mxu1 %vm6976_vm6, %v2625_v43  ;;  %v6988_v37 = vld [vmem:[#allocation36_spill] sm:$0xff]  ;;  %vm7003_vm6 = vmmov %vm6999_vm0 }
0x1041   :  { %v2626_v63 = vpack.c.bf16 %v2624_v20, %v2623_v5 }
0x1043   :  { %4111 = vmatmul.mubr.msk.bf16.vlgmr.msra.gmra.mrb[48].mxu1 %vm6977_vm9, %v2626_v63  ;;  %vm7004_vm9 = vmmov %vm6999_vm0 }
0x1044   :  { %4123 = vmatpush3.bf16.msra.mxu1 %v2809_v36 }
0x1045   :  { %4124 = vmatprep.subr.bf16.mxu1 %v2811_v11 }
0x1048   :  { %4125 = vmatpush3.bf16.msra.mxu1 %v2811_v11 }
0x1049   :  { %4138 = vmatprep.subr.bf16.mxu1 %v6780_v44 }
0x10f6   :  { %v2756_v2 = vpop.f32.mrb[32].mxu0 }
0x10f7   :  { %v2757_v55 = vadd.f32 %v2756_v2, %v2706_v19  ;;  %v4120_v26 = vpop.f32.mrb[33].mxu0 }
0x10f8   :  { %v2759_v31 = vpop.f32.mrb[34].mxu0 }
0x10f9   :  { %v2763_v21 = vadd.f32 %v2757_v55, %v6981_v1  ;;  %v2760_v56 = vadd.f32 %v2759_v31, %v2706_v19  ;;  %v4121_v39 = vpop.f32.mrb[35].mxu0 }
0x10fb   :  { %v2764_v32 = vadd.f32 %v2760_v56, %v6982_v4  ;;  %v2765_v9 = vsel %vm6983_vm12, %v2763_v21, 0.0  ;;  %vm7005_vm12 = vmmov %vm6999_vm0 }
0x10fc   :  { %2766 = vadd.xlane.f32.xlu1 %v2765_v9 }
0x10fd   :  { %v2768_v30 = vsel %vm6984_vm15, %v2764_v32, 0.0  ;;  %vm7007_vm15 = vcmask 523264  }
0x10fe   :  { %2769 = vadd.xlane.f32.xlu0 %v2768_v30 }
0x1116   :  { %v4112_v42 = vpop.f32.mrb[48].mxu1 }
0x1117   :  { %v2683_v60 = vpop.f32.mrb[49].mxu1 }
0x1118   :  { %v4113_v41 = vpop.f32.mrb[50].mxu1 }
0x1119   :  { %v2803_v18 = vpack.c.bf16 %v4113_v41, %v4112_v42  ;;  %v2686_v45 = vpop.f32.mrb[51].mxu1  ;;  %v4432_v42 = vld [vmem:[#allocation8 + $0x20] sm:$0xff]   ;;  %v4434_v41 = vld [vmem:[#allocation8 + $0x30] sm:$0xff]  }
0x111a   :  { %v2802_v62 = vpack.c.bf16 %v2686_v45, %v2683_v60  ;;  %v4433_v60 = vld [vmem:[#allocation8 + $0x28] sm:$0xff]  }
0x111c   :  { %4126 = vmatprep.mubr.msk.bf16.mxu1 %vm6985_vm7, %v2802_v62  ;;  %vm7008_vm7 = vmmov %vm7007_vm15 }
0x111d   :  { %4127 = vmatmul.mubr.msk.bf16.vlgmr.msra.gmra.mrb[52].mxu1 %vm6986_vm11, %v2803_v18  ;;  %v4435_v18 = vld [vmem:[#allocation8 + $0x38] sm:$0xff]   ;;  %vm7009_vm11 = vmmov %vm7008_vm7 }
0x111e   :  { %4146 = vmatprep.mubr.msk.bf16.mxu1 %vm6838_vm4, %v6780_v44  ;;  %vm6991_vm4 = vmmov %vm6950_vm2  ;;  %4139 = vmatpush3.bf16.msra.mxu1 %v4432_v42 }
0x111f   :  { %vm7001_vm2 = vmmov %vm6999_vm0  ;;  %4140 = vmatprep.subr.bf16.mxu1 %v6780_v44 }
0x1122   :  { %4141 = vmatpush3.bf16.msra.mxu1 %v4433_v60 }
0x1123   :  { %4142 = vmatprep.subr.bf16.mxu1 %v6780_v44 }
0x1126   :  { %4143 = vmatpush3.bf16.msra.mxu1 %v4434_v41 }
0x1127   :  { %4144 = vmatprep.subr.bf16.mxu1 %v6780_v44 }
0x112a   :  { %4145 = vmatpush3.bf16.msra.mxu1 %v4435_v18 }
0x1189   :  { %v2767_v57 = vpop.xlane.xlu1 %2766 }
0x118a   :  { %v2771_v51 = vmul.f32 0.03125, %v2767_v57 }
0x118b   :  { %v2770_v13 = vpop.xlane.xlu0 %2769 }
0x118c   :  { %v2772_v22 = vmul.f32 0.03125, %v2770_v13  ;;  %v6470_v49 = vsub.f32 %v2763_v21, %v2771_v51 }
0x118e   :  { %v6475_v35 = vsub.f32 %v2764_v32, %v2772_v22  ;;  %v2775_v16 = vmul.f32 %v6470_v49, %v6470_v49 }
0x1190   :  { %v2776_v46 = vmul.f32 %v6475_v35, %v6475_v35  ;;  %v2777_v15 = vsel %vm6996_vm3, %v2775_v16, 0.0  ;;  %vm7014_vm3 = vmmov %vm6999_vm0 }
0x1192   :  { %v2780_v28 = vsel %vm6997_vm10, %v2776_v46, 0.0  ;;  %vm7015_vm10 = vmmov %vm6999_vm0 }
0x11f0   :  { %v4128_v17 = vpop.f32.mrb[52].mxu1 }
0x11f1   :  { %v2854_v58 = vpop.f32.mrb[53].mxu1  ;;  %v2863_v25 = vadd.f32 %v4128_v17, %v6463_v3 }
0x11f2   :  { %v2855_v23 = vadd.f32 %v2854_v58, %v6463_v3  ;;  %v4129_v47 = vpop.f32.mrb[54].mxu1 }
0x11f3   :  { %v2857_v52 = vpop.f32.mrb[55].mxu1  ;;  %v2866_v27 = vadd.f32 %v4129_v47, %v6463_v3  ;;  %v2871_v24 = vadd.f32 %v2863_v25, %v6989_v61 }
0x11f4   :  { %v2869_v6 = vadd.f32 %v2855_v23, %v6988_v37  ;;  %v2858_v48 = vadd.f32 %v2857_v52, %v6463_v3 }
0x11f5   :  { %v2872_v14 = vadd.f32 %v2866_v27, %v6992_v12  ;;  %v2879_v7 = vsel %vm6994_vm5, %v2871_v24, 0.0  ;;  %v4430_v12 = vld [vmem:[#allocation7 + $0x4c] ss:$16 sps:$4 sm:$0xff]   ;;  %vm7012_vm5 = vmmov %vm6999_vm0 }
0x11f6   :  { %v2870_v40 = vadd.f32 %v2858_v48, %v6990_v54  ;;  %v2873_v29 = vsel %vm6991_vm4, %v2869_v6, 0.0  ;;  %vm7010_vm4 = vmmov %vm6999_vm0 }
0x11f7   :  { %2874 = vadd.xlane.f32.xlu0 %v2873_v29  ;;  %v2882_v0 = vsel %vm6995_vm13, %v2872_v14, 0.0  ;;  %vm7013_vm13 = vmmov %vm6999_vm0 }
0x11f8   :  { %v2876_v33 = vsel %vm6993_vm14, %v2870_v40, 0.0  ;;  %vm7011_vm14 = vmmov %vm6999_vm0 }
0x11f9   :  { %2877 = vadd.xlane.f32.xlu1 %v2876_v33 }
0x11fb   :  { %2880 = vadd.xlane.f32.xlu0 %v2879_v7 }
0x11fd   :  { %2883 = vadd.xlane.f32.xlu1 %v2882_v0  ;;  %v4431_v0 = vld [vmem:[#allocation7 + $0x6c] ss:$16 sps:$4 sm:$0xff]  }
0x11ff   :  { %2778 = vadd.xlane.f32.xlu0 %v2777_v15 }
0x1201   :  { %2781 = vadd.xlane.f32.xlu1 %v2780_v28 }
0x1212   :  { %2792 = vrot.lane.b32.xlu1 %v2706_v19, %s4742_s14 }
0x1215   :  { %2945 = vrot.lane.b32.xlu0 %v6402_v10, %s4732_s1 }
0x1216   :  { %2797 = vrot.lane.b32.xlu1 %v2706_v19, %s4732_s1 }
0x1284   :  { %v2875_v43 = vpop.xlane.xlu0 %2874 }
0x1285   :  { %v2885_v20 = vmul.f32 0.03125, %v2875_v43 }
0x1286   :  { %v2878_v34 = vpop.xlane.xlu1 %2877 }
0x1287   :  { %v2886_v63 = vmul.f32 0.03125, %v2878_v34  ;;  %v6491_v59 = vsub.f32 %v2869_v6, %v2885_v20 }
0x1288   :  { %v2881_v5 = vpop.xlane.xlu0 %2880 }
0x1289   :  { %v2887_v36 = vmul.f32 0.03125, %v2881_v5  ;;  %v6495_v31 = vsub.f32 %v2870_v40, %v2886_v63  ;;  %v2893_v56 = vmul.f32 %v6491_v59, %v6491_v59 }
0x128a   :  { %v2884_v11 = vpop.xlane.xlu1 %2883 }
0x128b   :  { %v6493_v2 = vsub.f32 %v2871_v24, %v2887_v36  ;;  %v2888_v55 = vmul.f32 0.03125, %v2884_v11  ;;  %v2894_v32 = vmul.f32 %v6495_v31, %v6495_v31  ;;  %v2897_v9 = vsel %vm7000_vm1, %v2893_v56, 0.0  ;;  %vm7018_vm1 = vmmov %vm6999_vm0 }
0x128c   :  { %v2779_v26 = vpop.xlane.xlu0 %2778 }
0x128d   :  { %v6497_v1 = vsub.f32 %v2872_v14, %v2888_v55  ;;  %v2895_v10 = vmul.f32 %v6493_v2, %v6493_v2  ;;  %v2900_v30 = vsel %vm7001_vm2, %v2894_v32, 0.0  ;;  %vm7019_vm2 = vmmov %vm6999_vm0 }
0x128e   :  { %v2782_v62 = vpop.xlane.xlu1 %2781 }
0x128f   :  { %v2903_v19 = vsel %vm6998_vm8, %v2895_v10, 0.0  ;;  %v2896_v21 = vmul.f32 %v6497_v1, %v6497_v1  ;;  %v2784_v53 = vmul.f32 0.03125, %v2782_v62  ;;  %vm7016_vm8 = vmmov %vm6999_vm0 }
0x1290   :  { %2904 = vadd.xlane.f32.xlu0 %v2903_v19  ;;  %v2946_v39 = vpop.permute.xlu0 %2945 }
0x1291   :  { %v2906_v4 = vsel %vm6999_vm0, %v2896_v21, 0.0  ;;  %4131 = vmatpush3.bf16.msra.mxu0 %v2946_v39  ;;  %v2786_v57 = vadd.f32 1e-12, %v2784_v53 }
0x1292   :  { %2907 = vadd.xlane.f32.xlu1 %v2906_v4  ;;  %4132 = vmatprep.subr.bf16.mxu0 %v6780_v44  ;;  %v2793_v13 = vpop.permute.xlu1 %2792 }
0x1293   :  { %4520 = vrsqrt.f32 %v2786_v57 }
0x1294   :  { %2898 = vadd.xlane.f32.xlu0 %v2897_v9 }
0x1296   :  { %2901 = vadd.xlane.f32.xlu1 %v2900_v30  ;;  %v2798_v23 = vpop.permute.xlu1 %2797 }
0x129d   :  { %v4521_v58 = vpop.eup %4520 }
0x129e   :  { %v2790_v25 = vmul.f32 %v4521_v58, %v6475_v35 }
0x12a0   :  { %v2796_v37 = vmul.f32 %v2793_v13, %v2790_v25 }
0x12a2   :  { %v6534_v40 = vadd.f32 %v2798_v23, %v2796_v37 }
0x12a7   :  { %2926 = vrot.lane.b32.xlu1 %v6463_v3, %s4742_s14 }
0x12aa   :  { %2947 = vrot.lane.b32.xlu0 %v6437_v50, %s4732_s1  ;;  %v7002_v50 = vsub.s32 4, %v6978_v8 }
0x12ab   :  { %3250 = vrot.lane.b32.xlu1 %v4432_v42, %s4742_s14 }
0x12ac   :  { %v6526_v45 = vrot.slane %v6980_v38, %v7002_v50 }
0x12ae   :  { %2933 = vrot.lane.b32.xlu0 %v6463_v3, %s4732_s1  ;;  %v2783_v3 = vmul.f32 0.03125, %v2779_v26 }
0x12af   :  { %3254 = vrot.lane.b32.xlu1 %v4434_v41, %s4742_s14 }
0x12b0   :  { %v2785_v17 = vadd.f32 1e-12, %v2783_v3 }
0x12b2   :  { %3252 = vrot.lane.b32.xlu0 %v4433_v60, %s4742_s14  ;;  %4522 = vrsqrt.f32 %v2785_v17 }
0x12b3   :  { %3048 = vrot.lane.b32.xlu1 %v6526_v45, %s4732_s1 }
0x12b6   :  { %3256 = vrot.lane.b32.xlu0 %v4435_v18, %s4742_s14 }
0x12bc   :  { %v4523_v51 = vpop.eup %4522 }
0x12bd   :  { %v2789_v47 = vmul.f32 %v4523_v51, %v6470_v49 }
0x12bf   :  { %v2795_v48 = vmul.f32 %v2793_v13, %v2789_v47 }
0x12c1   :  { %v6536_v33 = vadd.f32 %v2798_v23, %v2795_v48 }
0x12c3   :  { %v2940_v16 = vpack.c.bf16 %v6534_v40, %v6536_v33 }
0x131d   :  { %v2905_v52 = vpop.xlane.xlu0 %2904 }
0x131e   :  { %v2911_v22 = vmul.f32 0.03125, %v2905_v52 }
0x131f   :  { %v2908_v44 = vpop.xlane.xlu1 %2907 }
0x1320   :  { %v2915_v6 = vadd.f32 1e-12, %v2911_v22  ;;  %v2912_v27 = vmul.f32 0.03125, %v2908_v44 }
0x1321   :  { %v2899_v61 = vpop.xlane.xlu0 %2898 }
0x1322   :  { %v2916_v24 = vadd.f32 1e-12, %v2912_v27  ;;  %v2909_v54 = vmul.f32 0.03125, %v2899_v61  ;;  %4524 = vrsqrt.f32 %v2915_v6 }
0x1323   :  { %v2902_v29 = vpop.xlane.xlu1 %2901 }
0x1324   :  { %4526 = vrsqrt.f32 %v2916_v24  ;;  %v2913_v35 = vadd.f32 1e-12, %v2909_v54  ;;  %v2910_v14 = vmul.f32 0.03125, %v2902_v29 }
0x1325   :  { %v2948_v49 = vpop.permute.xlu0 %2947 }
0x1326   :  { %4528 = vrsqrt.f32 %v2913_v35  ;;  %v2914_v7 = vadd.f32 1e-12, %v2910_v14  ;;  %4133 = vmatpush3.bf16.msra.mxu0 %v2948_v49 }
0x1327   :  { %4150 = vmatprep.subr.bf16.mxu0 %v4430_v12  ;;  %v2927_v5 = vpop.permute.xlu1 %2926 }
0x1328   :  { %4530 = vrsqrt.f32 %v2914_v7 }
0x1329   :  { %4135 = vmatmul.mubr.msk.bf16.vlgmr.msra.gmra.mrb[36].mxu0 %vm7003_vm6, %v2940_v16  ;;  %v2934_v19 = vpop.permute.xlu0 %2933  ;;  %vm7020_vm6 = vmmov %vm6999_vm0 }
0x132a   :  { %4151 = vmatpush3.bf16.msra.mxu0 %v4430_v12 }
0x132b   :  { %4152 = vmatprep.subr.bf16.mxu0 %v4431_v0  ;;  %v3251_v32 = vpop.permute.xlu1 %3250 }
0x132c   :  { %v4525_v46 = vpop.eup %4524 }
0x132d   :  { %v2923_v34 = vmul.f32 %v4525_v46, %v6493_v2  ;;  %v3253_v9 = vpop.permute.xlu0 %3252 }
0x132e   :  { %v4527_v15 = vpop.eup %4526  ;;  %4153 = vmatpush3.bf16.msra.mxu0 %v4431_v0 }
0x132f   :  { %v2924_v28 = vmul.f32 %v4527_v15, %v6497_v1  ;;  %v2931_v26 = vmul.f32 %v2927_v5, %v2923_v34  ;;  %4158 = vmatprep.subr.bf16.mxu0 %v3251_v32  ;;  %v3255_v30 = vpop.permute.xlu1 %3254 }
0x1330   :  { %v4529_v43 = vpop.eup %4528 }
0x1331   :  { %v2921_v20 = vmul.f32 %v4529_v43, %v6491_v59  ;;  %v2932_v36 = vmul.f32 %v2927_v5, %v2924_v28  ;;  %v6551_v1 = vadd.f32 %v2934_v19, %v2931_v26  ;;  %v3257_v42 = vpop.permute.xlu0 %3256 }
0x1332   :  { %v4531_v63 = vpop.eup %4530 }
0x1333   :  { %v2922_v11 = vmul.f32 %v4531_v63, %v6495_v31  ;;  %v2929_v55 = vmul.f32 %v2927_v5, %v2921_v20  ;;  %v6545_v21 = vadd.f32 %v2934_v19, %v2932_v36  ;;  %v7006_v31 = vsub.s32 5, %v6978_v8 }
0x1335   :  { %v2930_v10 = vmul.f32 %v2927_v5, %v2922_v11  ;;  %v6547_v56 = vadd.f32 %v2934_v19, %v2929_v55  ;;  %v3136_v2 = vpack.c.bf16 %v6545_v21, %v6551_v1  ;;  %v3144_v4 = vrot.slane %v6980_v38, %v7006_v31 }
0x1337   :  { %v6549_v39 = vadd.f32 %v2934_v19, %v2930_v10  ;;  %3263 = vrot.lane.b32.xlu0 %v3144_v4, %s4732_s1 }
0x1339   :  { %v3135_v59 = vpack.c.bf16 %v6549_v39, %v6547_v56 }
0x133b   :  { %4154 = vmatprep.mubr.msk.bf16.mxu0 %vm7004_vm9, %v3135_v59  ;;  %vm7021_vm9 = vmmov %vm6999_vm0 }
0x133c   :  { %4155 = vmatmul.mubr.msk.bf16.vlgmr.msra.gmra.mrb[40].mxu0 %vm7005_vm12, %v3136_v2  ;;  %vm7022_vm12 = vmmov %vm6999_vm0 }
0x133d   :  { %4159 = vmatpush3.bf16.msra.mxu0 %v3251_v32 }
0x133e   :  { %4160 = vmatprep.subr.bf16.mxu0 %v3253_v9 }
0x1341   :  { %4161 = vmatpush3.bf16.msra.mxu0 %v3253_v9 }
0x1342   :  { %4162 = vmatprep.subr.bf16.mxu0 %v3255_v30 }
0x1345   :  { %4163 = vmatpush3.bf16.msra.mxu0 %v3255_v30 }
0x1346   :  { %4164 = vmatprep.subr.bf16.mxu0 %v3257_v42 }
0x1349   :  { %4165 = vmatpush3.bf16.msra.mxu0 %v3257_v42 }
0x13fc   :  { %v2988_v60 = vpop.f32.mrb[36].mxu0 }
0x13fd   :  { %v2989_v41 = vadd.f32 %v2988_v60, %v6526_v45  ;;  %v4136_v18 = vpop.f32.mrb[37].mxu0 }
0x13fe   :  { %v2991_v50 = vpop.f32.mrb[38].mxu0 }
0x13ff   :  { %v2997_v38 = vmul.f32 0.044715, %v2989_v41  ;;  %v2992_v62 = vadd.f32 %v2991_v50, %v6526_v45  ;;  %v4137_v53 = vpop.f32.mrb[39].mxu0  ;;  %v2995_v49 = vmul.f32 0.5, %v2989_v41 }
0x1401   :  { %v2999_v3 = vmul.f32 %v2997_v38, %v2989_v41  ;;  %v2998_v57 = vmul.f32 0.044715, %v2992_v62  ;;  %v2996_v0 = vmul.f32 0.5, %v2992_v62 }
0x1403   :  { %v3001_v17 = vmul.f32 %v2999_v3, %v2989_v41  ;;  %v3000_v13 = vmul.f32 %v2998_v57, %v2992_v62 }
0x1405   :  { %v3003_v58 = vadd.f32 %v3001_v17, %v2989_v41  ;;  %v3002_v51 = vmul.f32 %v3000_v13, %v2992_v62 }
0x1407   :  { %v3005_v25 = vmul.f32 0.7978846, %v3003_v58  ;;  %v3004_v23 = vadd.f32 %v3002_v51, %v2992_v62 }
0x1409   :  { %4532 = vtanh.f32 %v3005_v25  ;;  %v3006_v47 = vmul.f32 0.7978846, %v3004_v23  ;;  %v3049_v23 = vpop.permute.xlu1 %3048 }
0x140b   :  { %4534 = vtanh.f32 %v3006_v47 }
0x140f   :  { %v4156_v52 = vpop.f32.mrb[40].mxu0 }
0x1410   :  { %v3206_v22 = vadd.f32 %v4156_v52, %v3144_v4  ;;  %v3197_v37 = vpop.f32.mrb[41].mxu0 }
0x1411   :  { %v3198_v44 = vadd.f32 %v3197_v37, %v3144_v4  ;;  %v4157_v6 = vpop.f32.mrb[42].mxu0 }
0x1412   :  { %v3218_v27 = vmul.f32 0.044715, %v3206_v22  ;;  %v3209_v48 = vadd.f32 %v4157_v6, %v3144_v4  ;;  %v3200_v45 = vpop.f32.mrb[43].mxu0  ;;  %v3214_v18 = vmul.f32 0.5, %v3206_v22 }
0x1413   :  { %v4533_v61 = vpop.eup %4532  ;;  %v3216_v24 = vmul.f32 0.044715, %v3198_v44  ;;  %v3201_v54 = vadd.f32 %v3200_v45, %v3144_v4  ;;  %v3212_v62 = vmul.f32 0.5, %v3198_v44 }
0x1414   :  { %v3222_v29 = vmul.f32 %v3218_v27, %v3206_v22  ;;  %v3219_v12 = vmul.f32 0.044715, %v3209_v48  ;;  %v3009_v35 = vadd.f32 1.0, %v4533_v61  ;;  %v3215_v50 = vmul.f32 0.5, %v3209_v48 }
0x1415   :  { %v4535_v14 = vpop.eup %4534  ;;  %v3220_v7 = vmul.f32 %v3216_v24, %v3198_v44  ;;  %v3217_v16 = vmul.f32 0.044715, %v3201_v54  ;;  %v3213_v53 = vmul.f32 0.5, %v3201_v54  ;;  %v3264_v24 = vpop.permute.xlu0 %3263 }
0x1416   :  { %v3226_v46 = vmul.f32 %v3222_v29, %v3206_v22  ;;  %v3223_v15 = vmul.f32 %v3219_v12, %v3209_v48  ;;  %v3010_v28 = vadd.f32 1.0, %v4535_v14  ;;  %v3011_v63 = vmul.f32 %v3009_v35, %v2995_v49 }
0x1417   :  { %v3224_v43 = vmul.f32 %v3220_v7, %v3198_v44  ;;  %v3221_v34 = vmul.f32 %v3217_v16, %v3201_v54 }
0x1418   :  { %v3230_v20 = vadd.f32 %v3226_v46, %v3206_v22  ;;  %v3227_v5 = vmul.f32 %v3223_v15, %v3209_v48  ;;  %v3012_v36 = vmul.f32 %v3010_v28, %v2996_v0 }
0x1419   :  { %v3228_v11 = vadd.f32 %v3224_v43, %v3198_v44  ;;  %v3225_v55 = vmul.f32 %v3221_v34, %v3201_v54 }
0x141a   :  { %v3234_v26 = vmul.f32 0.7978846, %v3230_v20  ;;  %v3231_v10 = vadd.f32 %v3227_v5, %v3209_v48  ;;  %v3013_v19 = vpack.c.bf16 %v3012_v36, %v3011_v63 }
0x141b   :  { %v3232_v59 = vmul.f32 0.7978846, %v3228_v11  ;;  %v3229_v2 = vadd.f32 %v3225_v55, %v3201_v54 }
0x141c   :  { %4536 = vtanh.f32 %v3234_v26  ;;  %v3235_v31 = vmul.f32 0.7978846, %v3231_v10  ;;  %4147 = vmatmul.mubr.msk.bf16.vlgmr.msra.gmra.mrb[56].mxu1 %vm7007_vm15, %v3013_v19  ;;  %v4563_v10 = vld [vmem:[#allocation10 + $0x8] sm:$0xff]  ;;  %v7017_v19 = vsub.s32 6, %v6978_v8  ;;  %vm7023_vm15 = vmmov %vm6999_vm0 }
0x141d   :  { %4538 = vtanh.f32 %v3232_v59  ;;  %v3233_v4 = vmul.f32 0.7978846, %v3229_v2 }
0x141e   :  { %4540 = vtanh.f32 %v3235_v31  ;;  %v3126_v59 = vrot.slane %v4563_v10, %v7017_v19 }
0x141f   :  { %4542 = vtanh.f32 %v3233_v4 }
0x1426   :  { %v4537_v32 = vpop.eup %4536 }
0x1427   :  { %v4539_v9 = vpop.eup %4538  ;;  %v3242_v30 = vadd.f32 1.0, %v4537_v32 }
0x1428   :  { %v4541_v42 = vpop.eup %4540  ;;  %v3240_v60 = vadd.f32 1.0, %v4539_v9 }
0x1429   :  { %v4543_v41 = vpop.eup %4542  ;;  %v3243_v38 = vadd.f32 1.0, %v4541_v42  ;;  %v3246_v57 = vmul.f32 %v3242_v30, %v3214_v18 }
0x142a   :  { %v3241_v3 = vadd.f32 1.0, %v4543_v41  ;;  %v3244_v13 = vmul.f32 %v3240_v60, %v3212_v62 }
0x142b   :  { %v3247_v17 = vmul.f32 %v3243_v38, %v3215_v50 }
0x142c   :  { %v3245_v58 = vmul.f32 %v3241_v3, %v3213_v53 }
0x142d   :  { %v3249_v51 = vpack.c.bf16 %v3247_v17, %v3246_v57 }
0x142e   :  { %v3248_v25 = vpack.c.bf16 %v3245_v58, %v3244_v13 }
0x1430   :  { %4166 = vmatprep.mubr.msk.bf16.mxu0 %vm7008_vm7, %v3248_v25 }
0x1431   :  { %4167 = vmatmul.mubr.msk.bf16.vlgmr.msra.gmra.mrb[44].mxu0 %vm7009_vm11, %v3249_v51 }
0x14ef   :  { %v3088_v47 = vpop.f32.mrb[56].mxu1 }
0x14f0   :  { %v3089_v52 = vadd.f32 %v3088_v47, %v3049_v23  ;;  %v4148_v37 = vpop.f32.mrb[57].mxu1 }
0x14f1   :  { %v3091_v22 = vpop.f32.mrb[58].mxu1 }
0x14f2   :  { %v3092_v6 = vadd.f32 %v3091_v22, %v3049_v23  ;;  %v4149_v27 = vpop.f32.mrb[59].mxu1  ;;  %v3095_v44 = vadd.f32 %v3089_v52, %v6536_v33 }
0x14f4   :  { %v3096_v48 = vadd.f32 %v3092_v6, %v6534_v40  ;;  %v3097_v45 = vsel %vm7010_vm4, %v3095_v44, 0.0 }
0x14f5   :  { %3098 = vadd.xlane.f32.xlu1 %v3097_v45 }
0x14f6   :  { %v3100_v61 = vsel %vm7011_vm14, %v3096_v48, 0.0 }
0x14f7   :  { %3101 = vadd.xlane.f32.xlu0 %v3100_v61 }
0x1504   :  { %v4168_v54 = vpop.f32.mrb[44].mxu0 }
0x1505   :  { %v3306_v29 = vpop.f32.mrb[45].mxu0  ;;  %v3315_v12 = vadd.f32 %v4168_v54, %v3264_v24 }
0x1506   :  { %v3307_v35 = vadd.f32 %v3306_v29, %v3264_v24  ;;  %v4169_v14 = vpop.f32.mrb[46].mxu0 }
0x1507   :  { %v3309_v49 = vpop.f32.mrb[47].mxu0  ;;  %v3318_v16 = vadd.f32 %v4169_v14, %v3264_v24  ;;  %v3323_v33 = vadd.f32 %v3315_v12, %v6551_v1 }
0x1508   :  { %v3321_v7 = vadd.f32 %v3307_v35, %v6547_v56  ;;  %v3310_v0 = vadd.f32 %v3309_v49, %v3264_v24 }
0x1509   :  { %v3324_v15 = vadd.f32 %v3318_v16, %v6545_v21  ;;  %v3331_v43 = vsel %vm7014_vm3, %v3323_v33, 0.0 }
0x150a   :  { %v3322_v40 = vadd.f32 %v3310_v0, %v6549_v39  ;;  %v3325_v46 = vsel %vm7012_vm5, %v3321_v7, 0.0 }
0x150b   :  { %3326 = vadd.xlane.f32.xlu0 %v3325_v46  ;;  %v3334_v34 = vsel %vm7015_vm10, %v3324_v15, 0.0 }
0x150c   :  { %v3328_v28 = vsel %vm7013_vm13, %v3322_v40, 0.0 }
0x150d   :  { %3329 = vadd.xlane.f32.xlu1 %v3328_v28 }
0x150f   :  { %3332 = vadd.xlane.f32.xlu0 %v3331_v43 }
0x1511   :  { %3335 = vadd.xlane.f32.xlu1 %v3334_v34 }
0x1582   :  { %v3099_v56 = vpop.xlane.xlu1 %3098 }
0x1583   :  { %v3103_v20 = vmul.f32 0.03125, %v3099_v56 }
0x1584   :  { %v3102_v5 = vpop.xlane.xlu0 %3101 }
0x1585   :  { %v3105_v1 = vsub.f32 %v3095_v44, %v3103_v20  ;;  %v3104_v63 = vmul.f32 0.03125, %v3102_v5 }
0x1587   :  { %v3106_v39 = vsub.f32 %v3096_v48, %v3104_v63  ;;  %v3107_v36 = vmul.f32 %v3105_v1, %v3105_v1 }
0x1589   :  { %v3109_v11 = vsel %vm7016_vm8, %v3107_v36, 0.0  ;;  %v3108_v55 = vmul.f32 %v3106_v39, %v3106_v39 }
0x158a   :  { %3110 = vadd.xlane.f32.xlu0 %v3109_v11 }
0x158b   :  { %v3112_v21 = vsel %vm6999_vm0, %v3108_v55, 0.0 }
0x158c   :  { %3113 = vadd.xlane.f32.xlu1 %v3112_v21 }
0x1598   :  { %v3327_v26 = vpop.xlane.xlu0 %3326 }
0x1599   :  { %v3337_v2 = vmul.f32 0.03125, %v3327_v26 }
0x159a   :  { %v3330_v41 = vpop.xlane.xlu1 %3329 }
0x159b   :  { %v6585_v32 = vsub.f32 %v3321_v7, %v3337_v2  ;;  %v3338_v38 = vmul.f32 0.03125, %v3330_v41 }
0x159c   :  { %v3333_v31 = vpop.xlane.xlu0 %3332 }
0x159d   :  { %v3339_v4 = vmul.f32 0.03125, %v3333_v31  ;;  %3130 = vrot.lane.b32.xlu1 %v3126_v59, %s4742_s14  ;;  %v3345_v60 = vmul.f32 %v6585_v32, %v6585_v32  ;;  %v6597_v53 = vsub.f32 %v3322_v40, %v3338_v38 }
0x159e   :  { %v3336_v18 = vpop.xlane.xlu1 %3335 }
0x159f   :  { %v6587_v9 = vsub.f32 %v3323_v33, %v3339_v4  ;;  %v3349_v8 = vsel %vm7019_vm2, %v3345_v60, 0.0  ;;  %v3340_v50 = vmul.f32 0.03125, %v3336_v18  ;;  %v3346_v17 = vmul.f32 %v6597_v53, %v6597_v53 }
0x15a1   :  { %v3347_v30 = vmul.f32 %v6587_v9, %v6587_v9  ;;  %v6595_v62 = vsub.f32 %v3324_v15, %v3340_v50  ;;  %v3352_v13 = vsel %vm7021_vm9, %v3346_v17, 0.0 }
0x15a3   :  { %v3355_v42 = vsel %vm7018_vm1, %v3347_v30, 0.0  ;;  %v3348_v3 = vmul.f32 %v6595_v62, %v6595_v62 }
0x15a4   :  { %3356 = vadd.xlane.f32.xlu0 %v3355_v42 }
0x15a5   :  { %v3358_v57 = vsel %vm7020_vm6, %v3348_v3, 0.0 }
0x15a8   :  { %3350 = vadd.xlane.f32.xlu0 %v3349_v8 }
0x15be   :  { %3377 = vrot.lane.b32.xlu0 %v3126_v59, %s4732_s1  ;;  %s4744_s1 = smov [#allocation11]  }
0x15bf   :  { %s3402_s15 = sshll.u32 %s4744_s1, 4  ;;  %s3403_s15 = int_to_ptr.vmem [resolvable:$true] %s3402_s15 }
0x15c0   :  { %s4674_s16 = scalar_lea.vmem %s3403_s15, 256  ;;  %p4679_p13 = scmp.lt.s32.totalorder %s3403_s15, %s3403_s15 }
0x15c1   :  { %3359 = vadd.xlane.f32.xlu1 %v3358_v57  ;;  %p4675_p12 = scmp.ne.s32.totalorder %s3403_s15, %s4674_s16  ;;  %p4680_p0 = scmp.lt.s32.totalorder %s4674_s16, %s4674_s16 }
0x15c3   :  { %p4681_p1 = por %p4680_p0, %p4679_p13 }
0x15c5   :  { %3353 = vadd.xlane.f32.xlu1 %v3352_v13  ;;  %p4682_p2 = pnand %p4681_p1, %p4675_p12 }
0x15d6   :  { %3384 = vrot.lane.b32.xlu1 %v3126_v59, %s4741_s4 }
0x1617   :  { %v3111_v58 = vpop.xlane.xlu0 %3110 }
0x1618   :  { %v3115_v51 = vmul.f32 0.03125, %v3111_v58 }
0x1619   :  { %v3114_v25 = vpop.xlane.xlu1 %3113 }
0x161a   :  { %v3117_v23 = vadd.f32 1e-12, %v3115_v51  ;;  %v3116_v47 = vmul.f32 0.03125, %v3114_v25 }
0x161c   :  { %4544 = vrsqrt.f32 %v3117_v23  ;;  %v3118_v52 = vadd.f32 1e-12, %v3116_v47 }
0x161d   :  { %v3131_v48 = vpop.permute.xlu1 %3130 }
0x161e   :  { %4546 = vrsqrt.f32 %v3118_v52 }
0x1626   :  { %v4545_v37 = vpop.eup %4544 }
0x1627   :  { %v3121_v22 = vmul.f32 %v4545_v37, %v3105_v1 }
0x1628   :  { %v4547_v6 = vpop.eup %4546 }
0x1629   :  { %v3122_v27 = vmul.f32 %v4547_v6, %v3106_v39  ;;  %v3127_v44 = vmul.f32 %v3126_v59, %v3121_v22 }
0x162b   :  { %v3128_v45 = vmul.f32 %v3126_v59, %v3122_v27  ;;  %v3133_v61 = vadd.f32 %v3131_v48, %v3127_v44 }
0x162d   :  { %v3134_v24 = vadd.f32 %v3131_v48, %v3128_v45  ;;  %3391 = vst.msk [vmem:[#allocation11] sm:$0xff] %vm7022_vm12, %v3133_v61 }
0x162f   :  { %3392 = vst.msk [vmem:[#allocation11 + $0x8] sm:$0xff] %vm7023_vm15, %v3134_v24 }
0x1630   :  { %4685 = shalt.err (!%p4682_p2)
}
0x1631   :  { %s4686_s19 = scalar_lea.hbm %s6652_s5, 256 }
0x1632   :  { %p4687_p3 = scmp.ne.s32.totalorder %s6652_s5, %s4686_s19  ;;  %p4690_p4 = scmp.lt.u32.totalorder %s4686_s19, %s6652_s5 }
0x1634   :  { %p4692_p5 = pnand %p4690_p4, %p4687_p3 }
0x1636   :  { %4695 = shalt.err (!%p4692_p5)
}
0x1637   :  { %3408 = dma.vmem_to_hbm [thread:$0]  %s3403_s15, 256, %s6652_s5, [#allocation4], %s4730_s9, %s4730_s9, %s4731_s10   ;;  %v3357_v54 = vpop.xlane.xlu0 %3356  ;;  %vm7024_vm7 = vmmov %vm6999_vm0 }
0x1638   :  { %v3363_v12 = vmul.f32 0.03125, %v3357_v54  ;;  %vm7025_vm11 = vmmov %vm6999_vm0  ;;  %s4745_s5 = smov [#allocation12]  }
0x1639   :  { %s3414_s26 = sshll.u32 %s4745_s5, 4  ;;  %vm7026_vm4 = vmmov %vm6999_vm0  ;;  %s3415_s26 = int_to_ptr.vmem [resolvable:$true] %s3414_s26 }
0x163a   :  { %v3367_v14 = vadd.f32 1e-12, %v3363_v12  ;;  %vm7027_vm14 = vmmov %vm6999_vm0  ;;  %s4696_s27 = scalar_lea.vmem %s3415_s26, 512  ;;  %p4701_p7 = scmp.lt.s32.totalorder %s3415_s26, %s3415_s26 }
0x163b   :  { %v3351_v29 = vpop.xlane.xlu0 %3350  ;;  %p4697_p6 = scmp.ne.s32.totalorder %s3415_s26, %s4696_s27  ;;  %p4702_p8 = scmp.lt.s32.totalorder %s4696_s27, %s4696_s27 }
0x163c   :  { %v3361_v35 = vmul.f32 0.03125, %v3351_v29  ;;  %4548 = vrsqrt.f32 %v3367_v14 }
0x163d   :  { %p4703_p9 = por %p4702_p8, %p4701_p7 }
0x163e   :  { %v3365_v49 = vadd.f32 1e-12, %v3361_v35 }
0x163f   :  { %v3378_v28 = vpop.permute.xlu0 %3377  ;;  %p4704_p10 = pnand %p4703_p9, %p4697_p6 }
0x1640   :  { %4550 = vrsqrt.f32 %v3365_v49 }
0x1646   :  { %v4549_v7 = vpop.eup %4548 }
0x1647   :  { %v3375_v46 = vmul.f32 %v4549_v7, %v6587_v9 }
0x1649   :  { %v3382_v20 = vmul.f32 %v3378_v28, %v3375_v46 }
0x164a   :  { %v4551_v16 = vpop.eup %4550 }
0x164b   :  { %v3373_v40 = vmul.f32 %v4551_v16, %v6585_v32 }
0x164d   :  { %v3380_v56 = vmul.f32 %v3378_v28, %v3373_v40 }
0x164e   :  { %v3360_v0 = vpop.xlane.xlu1 %3359 }
0x164f   :  { %v3364_v33 = vmul.f32 0.03125, %v3360_v0 }
0x1651   :  { %v3368_v15 = vadd.f32 1e-12, %v3364_v33 }
0x1652   :  { %v3354_v43 = vpop.xlane.xlu1 %3353 }
0x1653   :  { %4552 = vrsqrt.f32 %v3368_v15  ;;  %v3362_v34 = vmul.f32 0.03125, %v3354_v43 }
0x1655   :  { %v3366_v5 = vadd.f32 1e-12, %v3362_v34 }
0x1656   :  { %v3385_v1 = vpop.permute.xlu1 %3384 }
0x1657   :  { %4554 = vrsqrt.f32 %v3366_v5  ;;  %v3387_v63 = vadd.f32 %v3385_v1, %v3380_v56  ;;  %v3389_v39 = vadd.f32 %v3385_v1, %v3382_v20 }
0x1659   :  { %3393 = vst.msk [vmem:[#allocation12] sm:$0xff] %vm7024_vm7, %v3387_v63 }
0x165a   :  { %3395 = vst.msk [vmem:[#allocation12 + $0x10] sm:$0xff] %vm7025_vm11, %v3389_v39 }
0x165d   :  { %v4553_v36 = vpop.eup %4552 }
0x165e   :  { %v3376_v11 = vmul.f32 %v4553_v36, %v6595_v62 }
0x1660   :  { %v3383_v55 = vmul.f32 %v3378_v28, %v3376_v11 }
0x1661   :  { %v4555_v21 = vpop.eup %4554 }
0x1662   :  { %v3374_v26 = vmul.f32 %v4555_v21, %v6597_v53  ;;  %v3390_v10 = vadd.f32 %v3385_v1, %v3383_v55 }
0x1664   :  { %v3381_v19 = vmul.f32 %v3378_v28, %v3374_v26  ;;  %3396 = vst.msk [vmem:[#allocation12 + $0x18] sm:$0xff] %vm7026_vm4, %v3390_v10 }
0x1666   :  { %v3388_v59 = vadd.f32 %v3385_v1, %v3381_v19 }
0x1668   :  { %3394 = vst.msk [vmem:[#allocation12 + $0x8] sm:$0xff] %vm7027_vm14, %v3388_v59 }
0x1669   :  { %4707 = shalt.err (!%p4704_p10)
}
0x166a   :  { %s4708_s7 = scalar_lea.hbm %s6653_s6, 512 }
0x166b   :  { %p4709_p11 = scmp.ne.s32.totalorder %s6653_s6, %s4708_s7  ;;  %p4712_p12 = scmp.lt.u32.totalorder %s4708_s7, %s6653_s6 }
0x166d   :  { %p4714_p13 = pnand %p4712_p12, %p4709_p11 }
0x166f   :  { %4717 = shalt.err (!%p4714_p13)
}
0x1670   :  { %3420 = dma.vmem_to_hbm [thread:$0]  %s3415_s26, 512, %s6653_s6, [#allocation13], %s4730_s9, %s4730_s9, %s4731_s10  }
0x1671   :  { %4724 = dma.done.wait [#allocation4], 256  }
0x1672   :  { %4725 = vsyncadd [#allocation4], 4294967040 }
0x1673   :  { %4726 = dma.done.wait [#allocation13], 512  }
0x1674   :  { %4727 = vsyncadd [#allocation13], 4294966784 }
0x1675   :  { %3427 = vsyncpa [#allocation3], 1 }
0x1676   :  { %3428 = vsyncpa [#allocation6], 1 }
0x1677   :  { %3429 = vsyncpa [#allocation9], 1 }
0x1678   :  { %3430 = vsyncpa [#allocation4], 1 }
0x1679   :  { %3431 = vsyncpa [#allocation13], 1 }

</bundles_post_ra>
